<compile_context>
chip_gen: v7x
topology: tpu7x:2x2x1
jax: 0.10.0
libtpu: 0.0.40
codegen_flags: <defaults>
</compile_context>

<pallas_src>
import jax
import jax.numpy as jnp
from jax import lax
from jax.experimental import pallas as pl
from jax.experimental.pallas import tpu as pltpu


# ----------------------------------------------------------------------------
# One-time parameter packing into kernel-friendly layouts (hoisted out of fwd).
# ----------------------------------------------------------------------------
def prepare_params(raw):
    cin, cout = raw["up_w"].shape[0], raw["up_w"].shape[1]
    c1_in = raw["c1_w"].shape[2]
    # ConvTranspose2d weight (Cin, Cout, 2, 2) -> (Cin, 4*Cout), cols = (p,q,co)
    up_w = jnp.transpose(raw["up_w"], (0, 2, 3, 1)).reshape(cin, 4 * cout)
    up_b = jnp.tile(raw["up_b"], 4).reshape(1, 4 * cout)
    # conv1 HWIO (3,3,C1,Cout) -> (9*C1, Cout), rows ordered (dy, dx, ci)
    w1 = raw["c1_w"].reshape(9 * c1_in, cout)
    b1 = raw["c1_b"].reshape(1, cout)
    # conv2 HWIO (3,3,Cout,Cout) -> (Cout, 9*Cout), used as A @ B^T so the
    # result comes out already channel-major (lane-dense, NCHW-ready).
    w2_t = raw["c2_w"].reshape(9 * cout, cout).T
    b2 = raw["c2_b"].reshape(cout, 1)
    return {"up_w": up_w, "up_b": up_b, "w1": w1, "b1": b1,
            "w2_t": w2_t, "b2": b2}


# ----------------------------------------------------------------------------
# Fused ExpansionBlock forward: NCHW in -> NCHW out, one pallas_call.
# ----------------------------------------------------------------------------
@jax.jit
def expansion_block_forward(large_nchw, small_nchw, packed):
    N, CL, HL, WL = large_nchw.shape
    _, Cin, HS, WS = small_nchw.shape
    Cout = packed["b1"].shape[1]
    C1 = CL + Cout                       # conv1 input channels after concat
    dh, dw = HL - 2 * HS, WL - 2 * WS    # pad=True zero padding of up-map
    assert dh >= 0 and dw >= 0
    pad_top, pad_left = dh // 2, dw // 2

    # Boundary layout conversion only (tiny, one XLA op each): NCHW -> NHWC.
    small_flat = jnp.transpose(small_nchw, (0, 2, 3, 1)).reshape(N, HS * WS, Cin)
    large_nhwc = jnp.transpose(large_nchw, (0, 2, 3, 1))

    def kernel(small_ref, large_ref, upw_ref, upb_ref, w1_ref, b1_ref,
               w2t_ref, b2_ref, o_ref, pbuf1, pbuf2):
        # --- ConvTranspose2d(2x2, s=2) + bias + ReLU: one MXU matmul ---------
        y = jnp.dot(small_ref[0], upw_ref[...],
                    preferred_element_type=jnp.float32)
        y = jnp.maximum(y + upb_ref[...], 0.0)      # (HS*WS, 4*Cout), (p,q,co)

        # --- pixel-shuffle + zero-pad + copy_and_crop concat, all in VMEM ----
        pbuf1[...] = jnp.zeros((HL + 2, WL + 2, C1), jnp.float32)
        pbuf1[1:1 + HL, 1:1 + WL, 0:CL] = large_ref[0]
        # Per (p, q) sub-pixel planes; every reshape keeps the minor dim = Cout.
        y00 = y[:, 0 * Cout:1 * Cout].reshape(HS, WS, Cout)
        y01 = y[:, 1 * Cout:2 * Cout].reshape(HS, WS, Cout)
        y10 = y[:, 2 * Cout:3 * Cout].reshape(HS, WS, Cout)
        y11 = y[:, 3 * Cout:4 * Cout].reshape(HS, WS, Cout)
        row0 = jnp.stack((y00, y01), axis=2)        # (HS, WS, 2, Cout), p=0
        row1 = jnp.stack((y10, y11), axis=2)        # (HS, WS, 2, Cout), p=1
        up = jnp.stack((row0, row1), axis=1)        # (HS, 2, WS, 2, Cout)
        up = up.reshape(2 * HS, 2 * WS, Cout)       # depth-to-space
        pbuf1[1 + pad_top:1 + pad_top + 2 * HS,
              1 + pad_left:1 + pad_left + 2 * WS, CL:C1] = up

        # --- conv1: im2col slab + ONE matmul (K = 9*C1) + bias + ReLU --------
        taps1 = [pbuf1[dy:dy + HL, dx:dx + WL, :]
                 for dy in range(3) for dx in range(3)]
        slab1 = jnp.concatenate(taps1, axis=-1).reshape(HL * WL, 9 * C1)
        h1 = jnp.dot(slab1, w1_ref[...], preferred_element_type=jnp.float32)
        h1 = jnp.maximum(h1 + b1_ref[...], 0.0)     # (HL*WL, Cout)

        # --- conv2: im2col + transposed matmul -> lane-dense NCHW output -----
        pbuf2[...] = jnp.zeros((HL + 2, WL + 2, Cout), jnp.float32)
        pbuf2[1:1 + HL, 1:1 + WL, :] = h1.reshape(HL, WL, Cout)
        taps2 = [pbuf2[dy:dy + HL, dx:dx + WL, :]
                 for dy in range(3) for dx in range(3)]
        slab2 = jnp.concatenate(taps2, axis=-1).reshape(HL * WL, 9 * Cout)
        # (Cout, HL*WL) = w2_t (Cout, 9*Cout) @ slab2^T   (standard NT matmul)
        h2t = lax.dot_general(w2t_ref[...], slab2,
                              (((1,), (1,)), ((), ())),
                              preferred_element_type=jnp.float32)
        o_ref[0] = jnp.maximum(h2t + b2_ref[...], 0.0)   # (Cout, HL*WL)

    out = pl.pallas_call(
        kernel,
        out_shape=jax.ShapeDtypeStruct((N, Cout, HL * WL), jnp.float32),
        grid=(N,),
        in_specs=[
            pl.BlockSpec((1, HS * WS, Cin), lambda n: (n, 0, 0)),
            pl.BlockSpec((1, HL, WL, CL), lambda n: (n, 0, 0, 0)),
            pl.BlockSpec((Cin, 4 * Cout), lambda n: (0, 0)),
            pl.BlockSpec((1, 4 * Cout), lambda n: (0, 0)),
            pl.BlockSpec((9 * C1, Cout), lambda n: (0, 0)),
            pl.BlockSpec((1, Cout), lambda n: (0, 0)),
            pl.BlockSpec((Cout, 9 * Cout), lambda n: (0, 0)),
            pl.BlockSpec((Cout, 1), lambda n: (0, 0)),
        ],
        out_specs=pl.BlockSpec((1, Cout, HL * WL), lambda n: (n, 0, 0)),
        scratch_shapes=[
            pltpu.VMEM((HL + 2, WL + 2, C1), jnp.float32),
            pltpu.VMEM((HL + 2, WL + 2, Cout), jnp.float32),
        ],
        compiler_params=pltpu.CompilerParams(
            dimension_semantics=("parallel",)),
        # TODO(synk): at production U-Net sizes, tile H into row-bands, set
        # vmem_limit_bytes for v7x's 64 MiB VMEM, and cast matmul operands to
        # bf16 (f32 accumulation) on v6e/v7x; at this toy size f32 whole-image
        # blocks are optimal.
    )(small_flat, large_nhwc, packed["up_w"], packed["up_b"],
      packed["w1"], packed["b1"], packed["w2_t"], packed["b2"])

    # Kernel already produced channel-major data -> free contiguous reshape.
    return out.reshape(N, Cout, HL, WL)


# ----------------------------------------------------------------------------
# Pure-JAX reference (same math) for a correctness check.
# ----------------------------------------------------------------------------
def _ref_forward(large_nchw, small_nchw, raw):
    large = jnp.transpose(large_nchw, (0, 2, 3, 1))
    small = jnp.transpose(small_nchw, (0, 2, 3, 1))
    # ConvTranspose2d 2x2 s2 + bias + ReLU
    y = jnp.einsum("nhwc,copq->nhpwqo", small, raw["up_w"])
    n, h, _, w, _, co = y.shape
    y = y.reshape(n, 2 * h, 2 * w, co) + raw["up_b"]
    y = jnp.maximum(y, 0.0)
    # pad=True: zero-pad to match `large`
    dh = large.shape[1] - y.shape[1]
    dw = large.shape[2] - y.shape[2]
    y = jnp.pad(y, ((0, 0), (dh // 2, dh - dh // 2),
                    (dw // 2, dw - dw // 2), (0, 0)))
    # copy_and_crop (crop is identity after pad=True)
    lh, lw = large.shape[1], large.shape[2]
    sh, sw = y.shape[1], y.shape[2]
    sx, sy = (lh - sh) // 2, (lw - sw) // 2
    x = jnp.concatenate([large[:, sx:sx + sh, sy:sy + sw, :], y], axis=-1)

    def conv(x, wgt, b):
        nb, hh, ww, _ = x.shape
        xp = jnp.pad(x, ((0, 0), (1, 1), (1, 1), (0, 0)))
        out = jnp.zeros((nb, hh, ww, wgt.shape[-1]), jnp.float32)
        for dy in range(3):
            for dx in range(3):
                out = out + jnp.einsum("nhwc,co->nhwo",
                                       xp[:, dy:dy + hh, dx:dx + ww, :],
                                       wgt[dy, dx])
        return jnp.maximum(out + b, 0.0)

    x = conv(x, raw["c1_w"], raw["c1_b"])
    x = conv(x, raw["c2_w"], raw["c2_b"])
    return jnp.transpose(x, (0, 3, 1, 2))


# ----------------------------------------------------------------------------
if __name__ == "__main__":
    IN_CH, OUT_CH = 8, 4
    N, HS, WS = 2, 8, 8            # small: (N, IN_CH, 8, 8)
    HL, WL = 16, 16                # large: (N, IN_CH - OUT_CH, 16, 16)

    key = jax.random.PRNGKey(0)
    ks = jax.random.split(key, 8)

    # Inputs in the PyTorch NCHW convention.
    large_nchw = jax.random.normal(ks[0], (N, IN_CH - OUT_CH, HL, WL), jnp.float32)
    small_nchw = jax.random.normal(ks[1], (N, IN_CH, HS, WS), jnp.float32)

    # Deterministic synthetic parameters (shapes match the nn.Module).
    raw = {
        # ConvTranspose2d(IN_CH, OUT_CH, k=2, s=2): weight (Cin, Cout, 2, 2)
        "up_w": 0.1 * jax.random.normal(ks[2], (IN_CH, OUT_CH, 2, 2), jnp.float32),
        "up_b": 0.1 * jax.random.normal(ks[3], (OUT_CH,), jnp.float32),
        # conv3x3 #1: IN_CH -> OUT_CH, stored HWIO (3, 3, Cin, Cout)
        "c1_w": 0.1 * jax.random.normal(ks[4], (3, 3, IN_CH, OUT_CH), jnp.float32),
        "c1_b": 0.1 * jax.random.normal(ks[5], (OUT_CH,), jnp.float32),
        # conv3x3 #2: OUT_CH -> OUT_CH
        "c2_w": 0.1 * jax.random.normal(ks[6], (3, 3, OUT_CH, OUT_CH), jnp.float32),
        "c2_b": 0.1 * jax.random.normal(ks[7], (OUT_CH,), jnp.float32),
    }
    packed = prepare_params(raw)

    out = expansion_block_forward(large_nchw, small_nchw, packed)
    jax.block_until_ready(out)

    ref = _ref_forward(large_nchw, small_nchw, raw)
    assert out.shape == (N, OUT_CH, HL, WL), out.shape
    assert jnp.allclose(out, ref, atol=1e-3, rtol=1e-3), float(
        jnp.max(jnp.abs(out - ref)))

    print("KERNEL_OK")
</pallas_src>

<mosaic_0001>
module attributes {stable_mosaic.version = 11 : i64} {
  func.func @kernel(%arg0: i32, %arg1: memref<1x64x8xf32, #tpu.memory_space<vmem>>, %arg2: memref<1x16x16x4xf32, #tpu.memory_space<vmem>>, %arg3: memref<8x16xf32, #tpu.memory_space<vmem>>, %arg4: memref<1x16xf32, #tpu.memory_space<vmem>>, %arg5: memref<72x4xf32, #tpu.memory_space<vmem>>, %arg6: memref<1x4xf32, #tpu.memory_space<vmem>>, %arg7: memref<4x36xf32, #tpu.memory_space<vmem>>, %arg8: memref<4x1xf32, #tpu.memory_space<vmem>>, %arg9: memref<1x4x256xf32, #tpu.memory_space<vmem>>, %arg10: memref<18x18x8xf32, #tpu.memory_space<vmem>>, %arg11: memref<18x18x4xf32, #tpu.memory_space<vmem>>) attributes {dimension_semantics = [#tpu.dimension_semantics<parallel>], iteration_bounds = array<i64: 2>, scalar_prefetch = 0 : i64, scratch_operands = 2 : i64, tpu.core_type = #tpu.core_type<tc>, window_params = [{transform_indices = @transform_0, window_bounds = array<i64: 1, 64, 8>}, {transform_indices = @transform_1, window_bounds = array<i64: 1, 16, 16, 4>}, {pipeline_mode = #tpu.pipeline_mode<synchronous>, transform_indices = @transform_2, window_bounds = array<i64: 8, 16>}, {pipeline_mode = #tpu.pipeline_mode<synchronous>, transform_indices = @transform_3, window_bounds = array<i64: 1, 16>}, {pipeline_mode = #tpu.pipeline_mode<synchronous>, transform_indices = @transform_4, window_bounds = array<i64: 72, 4>}, {pipeline_mode = #tpu.pipeline_mode<synchronous>, transform_indices = @transform_5, window_bounds = array<i64: 1, 4>}, {pipeline_mode = #tpu.pipeline_mode<synchronous>, transform_indices = @transform_6, window_bounds = array<i64: 4, 36>}, {pipeline_mode = #tpu.pipeline_mode<synchronous>, transform_indices = @transform_7, window_bounds = array<i64: 4, 1>}, {transform_indices = @transform_8, window_bounds = array<i64: 1, 4, 256>}]} {
    %c0 = arith.constant 0 : index
    %c0_0 = arith.constant 0 : index
    %c0_1 = arith.constant 0 : index
    %0 = vector.load %arg1[%c0, %c0_0, %c0_1] : memref<1x64x8xf32, #tpu.memory_space<vmem>>, vector<1x64x8xf32>
    %1 = vector.shape_cast %0 : vector<1x64x8xf32> to vector<64x8xf32>
    %c0_2 = arith.constant 0 : index
    %c0_3 = arith.constant 0 : index
    %2 = vector.load %arg3[%c0_2, %c0_3] : memref<8x16xf32, #tpu.memory_space<vmem>>, vector<8x16xf32>
    %cst = arith.constant dense<0.000000e+00> : vector<64x16xf32>
    %3 = tpu.matmul %1, %2, %cst {dimension_numbers = #tpu.dot_dimension_numbers<[1], [0], [0], [1], [0, 0, 1, 1], [], []>} : vector<64x8xf32>, vector<8x16xf32>, vector<64x16xf32> -> vector<64x16xf32>
    %c0_4 = arith.constant 0 : index
    %c0_5 = arith.constant 0 : index
    %4 = vector.load %arg4[%c0_4, %c0_5] : memref<1x16xf32, #tpu.memory_space<vmem>>, vector<1x16xf32>
    %5 = vector.broadcast %4 : vector<1x16xf32> to vector<64x16xf32>
    %6 = arith.addf %3, %5 : vector<64x16xf32>
    %cst_6 = arith.constant 0.000000e+00 : f32
    %7 = vector.broadcast %cst_6 : f32 to vector<64x16xf32>
    %8 = arith.maximumf %6, %7 : vector<64x16xf32>
    %cst_7 = arith.constant 0.000000e+00 : f32
    %9 = vector.broadcast %cst_7 : f32 to vector<18x18x8xf32>
    %c0_8 = arith.constant 0 : index
    %c0_9 = arith.constant 0 : index
    %c0_10 = arith.constant 0 : index
    %10 = vector.load %arg10[%c0_8, %c0_9, %c0_10] : memref<18x18x8xf32, #tpu.memory_space<vmem>>, vector<18x18x8xf32>
    tpu.vector_store %arg10[%c0_8, %c0_9, %c0_10], %9 {strides = array<i32>} : memref<18x18x8xf32, #tpu.memory_space<vmem>>, vector<18x18x8xf32>,
    %c0_11 = arith.constant 0 : index
    %c0_12 = arith.constant 0 : index
    %c0_13 = arith.constant 0 : index
    %c0_14 = arith.constant 0 : index
    %11 = vector.load %arg2[%c0_11, %c0_12, %c0_13, %c0_14] : memref<1x16x16x4xf32, #tpu.memory_space<vmem>>, vector<1x16x16x4xf32>
    %12 = vector.shape_cast %11 : vector<1x16x16x4xf32> to vector<16x16x4xf32>
    %c1 = arith.constant 1 : index
    %c1_15 = arith.constant 1 : index
    %c0_16 = arith.constant 0 : index
    %13 = vector.load %arg10[%c1, %c1_15, %c0_16] : memref<18x18x8xf32, #tpu.memory_space<vmem>>, vector<16x16x4xf32>
    tpu.vector_store %arg10[%c1, %c1_15, %c0_16], %12 {strides = array<i32>} : memref<18x18x8xf32, #tpu.memory_space<vmem>>, vector<16x16x4xf32>,
    %14 = vector.extract_strided_slice %8 {offsets = [0, 0], sizes = [64, 4], strides = [1, 1]} : vector<64x16xf32> to vector<64x4xf32>
    %15 = vector.shape_cast %14 : vector<64x4xf32> to vector<8x8x4xf32>
    %16 = vector.extract_strided_slice %8 {offsets = [0, 4], sizes = [64, 4], strides = [1, 1]} : vector<64x16xf32> to vector<64x4xf32>
    %17 = vector.shape_cast %16 : vector<64x4xf32> to vector<8x8x4xf32>
    %18 = vector.extract_strided_slice %8 {offsets = [0, 8], sizes = [64, 4], strides = [1, 1]} : vector<64x16xf32> to vector<64x4xf32>
    %19 = vector.shape_cast %18 : vector<64x4xf32> to vector<8x8x4xf32>
    %20 = vector.extract_strided_slice %8 {offsets = [0, 12], sizes = [64, 4], strides = [1, 1]} : vector<64x16xf32> to vector<64x4xf32>
    %21 = vector.shape_cast %20 : vector<64x4xf32> to vector<8x8x4xf32>
    %22 = vector.shape_cast %15 : vector<8x8x4xf32> to vector<8x8x1x4xf32>
    %23 = vector.shape_cast %17 : vector<8x8x4xf32> to vector<8x8x1x4xf32>
    %24 = tpu.concatenate %22, %23 in 2 : vector<8x8x1x4xf32>, vector<8x8x1x4xf32> -> vector<8x8x2x4xf32>
    %25 = vector.shape_cast %19 : vector<8x8x4xf32> to vector<8x8x1x4xf32>
    %26 = vector.shape_cast %21 : vector<8x8x4xf32> to vector<8x8x1x4xf32>
    %27 = tpu.concatenate %25, %26 in 2 : vector<8x8x1x4xf32>, vector<8x8x1x4xf32> -> vector<8x8x2x4xf32>
    %28 = vector.shape_cast %24 : vector<8x8x2x4xf32> to vector<8x1x8x2x4xf32>
    %29 = vector.shape_cast %27 : vector<8x8x2x4xf32> to vector<8x1x8x2x4xf32>
    %30 = tpu.concatenate %28, %29 in 1 : vector<8x1x8x2x4xf32>, vector<8x1x8x2x4xf32> -> vector<8x2x8x2x4xf32>
    %31 = vector.shape_cast %30 : vector<8x2x8x2x4xf32> to vector<16x16x4xf32>
    %c1_17 = arith.constant 1 : index
    %c1_18 = arith.constant 1 : index
    %c4 = arith.constant 4 : index
    %32 = vector.load %arg10[%c1_17, %c1_18, %c4] : memref<18x18x8xf32, #tpu.memory_space<vmem>>, vector<16x16x4xf32>
    tpu.vector_store %arg10[%c1_17, %c1_18, %c4], %31 {strides = array<i32>} : memref<18x18x8xf32, #tpu.memory_space<vmem>>, vector<16x16x4xf32>,
    %c0_19 = arith.constant 0 : index
    %c0_20 = arith.constant 0 : index
    %c0_21 = arith.constant 0 : index
    %33 = vector.load %arg10[%c0_19, %c0_20, %c0_21] : memref<18x18x8xf32, #tpu.memory_space<vmem>>, vector<16x16x8xf32>
    %c0_22 = arith.constant 0 : index
    %c1_23 = arith.constant 1 : index
    %c0_24 = arith.constant 0 : index
    %34 = vector.load %arg10[%c0_22, %c1_23, %c0_24] : memref<18x18x8xf32, #tpu.memory_space<vmem>>, vector<16x16x8xf32>
    %c0_25 = arith.constant 0 : index
    %c2 = arith.constant 2 : index
    %c0_26 = arith.constant 0 : index
    %35 = vector.load %arg10[%c0_25, %c2, %c0_26] : memref<18x18x8xf32, #tpu.memory_space<vmem>>, vector<16x16x8xf32>
    %c1_27 = arith.constant 1 : index
    %c0_28 = arith.constant 0 : index
    %c0_29 = arith.constant 0 : index
    %36 = vector.load %arg10[%c1_27, %c0_28, %c0_29] : memref<18x18x8xf32, #tpu.memory_space<vmem>>, vector<16x16x8xf32>
    %c1_30 = arith.constant 1 : index
    %c1_31 = arith.constant 1 : index
    %c0_32 = arith.constant 0 : index
    %37 = vector.load %arg10[%c1_30, %c1_31, %c0_32] : memref<18x18x8xf32, #tpu.memory_space<vmem>>, vector<16x16x8xf32>
    %c1_33 = arith.constant 1 : index
    %c2_34 = arith.constant 2 : index
    %c0_35 = arith.constant 0 : index
    %38 = vector.load %arg10[%c1_33, %c2_34, %c0_35] : memref<18x18x8xf32, #tpu.memory_space<vmem>>, vector<16x16x8xf32>
    %c2_36 = arith.constant 2 : index
    %c0_37 = arith.constant 0 : index
    %c0_38 = arith.constant 0 : index
    %39 = vector.load %arg10[%c2_36, %c0_37, %c0_38] : memref<18x18x8xf32, #tpu.memory_space<vmem>>, vector<16x16x8xf32>
    %c2_39 = arith.constant 2 : index
    %c1_40 = arith.constant 1 : index
    %c0_41 = arith.constant 0 : index
    %40 = vector.load %arg10[%c2_39, %c1_40, %c0_41] : memref<18x18x8xf32, #tpu.memory_space<vmem>>, vector<16x16x8xf32>
    %c2_42 = arith.constant 2 : index
    %c2_43 = arith.constant 2 : index
    %c0_44 = arith.constant 0 : index
    %41 = vector.load %arg10[%c2_42, %c2_43, %c0_44] : memref<18x18x8xf32, #tpu.memory_space<vmem>>, vector<16x16x8xf32>
    %42 = tpu.concatenate %33, %34, %35, %36, %37, %38, %39, %40, %41 in 2 : vector<16x16x8xf32>, vector<16x16x8xf32>, vector<16x16x8xf32>, vector<16x16x8xf32>, vector<16x16x8xf32>, vector<16x16x8xf32>, vector<16x16x8xf32>, vector<16x16x8xf32>, vector<16x16x8xf32> -> vector<16x16x72xf32>
    %43 = vector.shape_cast %42 : vector<16x16x72xf32> to vector<256x72xf32>
    %c0_45 = arith.constant 0 : index
    %c0_46 = arith.constant 0 : index
    %44 = vector.load %arg5[%c0_45, %c0_46] : memref<72x4xf32, #tpu.memory_space<vmem>>, vector<72x4xf32>
    %cst_47 = arith.constant dense<0.000000e+00> : vector<256x4xf32>
    %45 = tpu.matmul %43, %44, %cst_47 {dimension_numbers = #tpu.dot_dimension_numbers<[1], [0], [0], [1], [0, 0, 1, 1], [], []>} : vector<256x72xf32>, vector<72x4xf32>, vector<256x4xf32> -> vector<256x4xf32>
    %c0_48 = arith.constant 0 : index
    %c0_49 = arith.constant 0 : index
    %46 = vector.load %arg6[%c0_48, %c0_49] : memref<1x4xf32, #tpu.memory_space<vmem>>, vector<1x4xf32>
    %47 = vector.broadcast %46 : vector<1x4xf32> to vector<256x4xf32>
    %48 = arith.addf %45, %47 : vector<256x4xf32>
    %cst_50 = arith.constant 0.000000e+00 : f32
    %49 = vector.broadcast %cst_50 : f32 to vector<256x4xf32>
    %50 = arith.maximumf %48, %49 : vector<256x4xf32>
    %cst_51 = arith.constant 0.000000e+00 : f32
    %51 = vector.broadcast %cst_51 : f32 to vector<18x18x4xf32>
    %c0_52 = arith.constant 0 : index
    %c0_53 = arith.constant 0 : index
    %c0_54 = arith.constant 0 : index
    %52 = vector.load %arg11[%c0_52, %c0_53, %c0_54] : memref<18x18x4xf32, #tpu.memory_space<vmem>>, vector<18x18x4xf32>
    tpu.vector_store %arg11[%c0_52, %c0_53, %c0_54], %51 {strides = array<i32>} : memref<18x18x4xf32, #tpu.memory_space<vmem>>, vector<18x18x4xf32>,
    %53 = vector.shape_cast %50 : vector<256x4xf32> to vector<16x16x4xf32>
    %c1_55 = arith.constant 1 : index
    %c1_56 = arith.constant 1 : index
    %c0_57 = arith.constant 0 : index
    %54 = vector.load %arg11[%c1_55, %c1_56, %c0_57] : memref<18x18x4xf32, #tpu.memory_space<vmem>>, vector<16x16x4xf32>
    tpu.vector_store %arg11[%c1_55, %c1_56, %c0_57], %53 {strides = array<i32>} : memref<18x18x4xf32, #tpu.memory_space<vmem>>, vector<16x16x4xf32>,
    %c0_58 = arith.constant 0 : index
    %c0_59 = arith.constant 0 : index
    %c0_60 = arith.constant 0 : index
    %55 = vector.load %arg11[%c0_58, %c0_59, %c0_60] : memref<18x18x4xf32, #tpu.memory_space<vmem>>, vector<16x16x4xf32>
    %c0_61 = arith.constant 0 : index
    %c1_62 = arith.constant 1 : index
    %c0_63 = arith.constant 0 : index
    %56 = vector.load %arg11[%c0_61, %c1_62, %c0_63] : memref<18x18x4xf32, #tpu.memory_space<vmem>>, vector<16x16x4xf32>
    %c0_64 = arith.constant 0 : index
    %c2_65 = arith.constant 2 : index
    %c0_66 = arith.constant 0 : index
    %57 = vector.load %arg11[%c0_64, %c2_65, %c0_66] : memref<18x18x4xf32, #tpu.memory_space<vmem>>, vector<16x16x4xf32>
    %c1_67 = arith.constant 1 : index
    %c0_68 = arith.constant 0 : index
    %c0_69 = arith.constant 0 : index
    %58 = vector.load %arg11[%c1_67, %c0_68, %c0_69] : memref<18x18x4xf32, #tpu.memory_space<vmem>>, vector<16x16x4xf32>
    %c1_70 = arith.constant 1 : index
    %c1_71 = arith.constant 1 : index
    %c0_72 = arith.constant 0 : index
    %59 = vector.load %arg11[%c1_70, %c1_71, %c0_72] : memref<18x18x4xf32, #tpu.memory_space<vmem>>, vector<16x16x4xf32>
    %c1_73 = arith.constant 1 : index
    %c2_74 = arith.constant 2 : index
    %c0_75 = arith.constant 0 : index
    %60 = vector.load %arg11[%c1_73, %c2_74, %c0_75] : memref<18x18x4xf32, #tpu.memory_space<vmem>>, vector<16x16x4xf32>
    %c2_76 = arith.constant 2 : index
    %c0_77 = arith.constant 0 : index
    %c0_78 = arith.constant 0 : index
    %61 = vector.load %arg11[%c2_76, %c0_77, %c0_78] : memref<18x18x4xf32, #tpu.memory_space<vmem>>, vector<16x16x4xf32>
    %c2_79 = arith.constant 2 : index
    %c1_80 = arith.constant 1 : index
    %c0_81 = arith.constant 0 : index
    %62 = vector.load %arg11[%c2_79, %c1_80, %c0_81] : memref<18x18x4xf32, #tpu.memory_space<vmem>>, vector<16x16x4xf32>
    %c2_82 = arith.constant 2 : index
    %c2_83 = arith.constant 2 : index
    %c0_84 = arith.constant 0 : index
    %63 = vector.load %arg11[%c2_82, %c2_83, %c0_84] : memref<18x18x4xf32, #tpu.memory_space<vmem>>, vector<16x16x4xf32>
    %64 = tpu.concatenate %55, %56, %57, %58, %59, %60, %61, %62, %63 in 2 : vector<16x16x4xf32>, vector<16x16x4xf32>, vector<16x16x4xf32>, vector<16x16x4xf32>, vector<16x16x4xf32>, vector<16x16x4xf32>, vector<16x16x4xf32>, vector<16x16x4xf32>, vector<16x16x4xf32> -> vector<16x16x36xf32>
    %65 = vector.shape_cast %64 : vector<16x16x36xf32> to vector<256x36xf32>
    %c0_85 = arith.constant 0 : index
    %c0_86 = arith.constant 0 : index
    %66 = vector.load %arg7[%c0_85, %c0_86] : memref<4x36xf32, #tpu.memory_space<vmem>>, vector<4x36xf32>
    %cst_87 = arith.constant dense<0.000000e+00> : vector<4x256xf32>
    %67 = tpu.matmul %66, %65, %cst_87 {dimension_numbers = #tpu.dot_dimension_numbers<[1], [1], [0], [0], [0, 0, 1, 0], [], []>} : vector<4x36xf32>, vector<256x36xf32>, vector<4x256xf32> -> vector<4x256xf32>
    %c0_88 = arith.constant 0 : index
    %c0_89 = arith.constant 0 : index
    %68 = vector.load %arg8[%c0_88, %c0_89] : memref<4x1xf32, #tpu.memory_space<vmem>>, vector<4x1xf32>
    %69 = vector.broadcast %68 : vector<4x1xf32> to vector<4x256xf32>
    %70 = arith.addf %67, %69 : vector<4x256xf32>
    %cst_90 = arith.constant 0.000000e+00 : f32
    %71 = vector.broadcast %cst_90 : f32 to vector<4x256xf32>
    %72 = arith.maximumf %70, %71 : vector<4x256xf32>
    %c0_91 = arith.constant 0 : index
    %c0_92 = arith.constant 0 : index
    %c0_93 = arith.constant 0 : index
    %73 = vector.load %arg9[%c0_91, %c0_92, %c0_93] : memref<1x4x256xf32, #tpu.memory_space<vmem>>, vector<1x4x256xf32>
    %74 = vector.shape_cast %73 : vector<1x4x256xf32> to vector<4x256xf32>
    %75 = vector.shape_cast %72 : vector<4x256xf32> to vector<1x4x256xf32>
    tpu.vector_store %arg9[%c0_91, %c0_92, %c0_93], %75 {strides = array<i32>} : memref<1x4x256xf32, #tpu.memory_space<vmem>>, vector<1x4x256xf32>,
    return
  }
  func.func @transform_0(%arg0: i32) -> (i32, i32, i32) {
    %c0_i32 = arith.constant 0 : i32
    %c0_i32_0 = arith.constant 0 : i32
    %c0_i32_1 = arith.constant 0 : i32
    return %arg0, %c0_i32, %c0_i32_0 : i32, i32, i32
  }
  func.func @transform_1(%arg0: i32) -> (i32, i32, i32, i32) {
    %c0_i32 = arith.constant 0 : i32
    %c0_i32_0 = arith.constant 0 : i32
    %c0_i32_1 = arith.constant 0 : i32
    %c0_i32_2 = arith.constant 0 : i32
    return %arg0, %c0_i32, %c0_i32_0, %c0_i32_1 : i32, i32, i32, i32
  }
  func.func @transform_2(%arg0: i32) -> (i32, i32) {
    %c0_i32 = arith.constant 0 : i32
    %c0_i32_0 = arith.constant 0 : i32
    %c0_i32_1 = arith.constant 0 : i32
    return %c0_i32, %c0_i32_0 : i32, i32
  }
  func.func @transform_3(%arg0: i32) -> (i32, i32) {
    %c0_i32 = arith.constant 0 : i32
    %c0_i32_0 = arith.constant 0 : i32
    %c0_i32_1 = arith.constant 0 : i32
    return %c0_i32, %c0_i32_0 : i32, i32
  }
  func.func @transform_4(%arg0: i32) -> (i32, i32) {
    %c0_i32 = arith.constant 0 : i32
    %c0_i32_0 = arith.constant 0 : i32
    %c0_i32_1 = arith.constant 0 : i32
    return %c0_i32, %c0_i32_0 : i32, i32
  }
  func.func @transform_5(%arg0: i32) -> (i32, i32) {
    %c0_i32 = arith.constant 0 : i32
    %c0_i32_0 = arith.constant 0 : i32
    %c0_i32_1 = arith.constant 0 : i32
    return %c0_i32, %c0_i32_0 : i32, i32
  }
  func.func @transform_6(%arg0: i32) -> (i32, i32) {
    %c0_i32 = arith.constant 0 : i32
    %c0_i32_0 = arith.constant 0 : i32
    %c0_i32_1 = arith.constant 0 : i32
    return %c0_i32, %c0_i32_0 : i32, i32
  }
  func.func @transform_7(%arg0: i32) -> (i32, i32) {
    %c0_i32 = arith.constant 0 : i32
    %c0_i32_0 = arith.constant 0 : i32
    %c0_i32_1 = arith.constant 0 : i32
    return %c0_i32, %c0_i32_0 : i32, i32
  }
  func.func @transform_8(%arg0: i32) -> (i32, i32, i32) {
    %c0_i32 = arith.constant 0 : i32
    %c0_i32_0 = arith.constant 0 : i32
    %c0_i32_1 = arith.constant 0 : i32
    return %arg0, %c0_i32, %c0_i32_0 : i32, i32, i32
  }
}

</mosaic_0001>

<bundles_post_ra>
// kernel: expansion_block_forward.1
= control target key start
LH: loop header
LB: loop body
LE: loop exit
PB: predicated region body
PF: predicated region fallthrough
CT: control target
= control target key end

     0   :  { %s7395_s27 = smov 0   ;;  %s11053_s0 = inlined_call_operand.vmem [shape: f32[2,64,8], index: 0, kind: input, shape index: {}]   ;;  %s11054_s1 = inlined_call_operand.vmem [shape: f32[2,16,16,4], index: 1, kind: input, shape index: {}]   ;;  %s11055_s2 = inlined_call_operand.vmem [shape: f32[8,16], index: 2, kind: input, shape index: {}]   ;;  %s11056_s3 = inlined_call_operand.vmem [shape: f32[1,16], index: 3, kind: input, shape index: {}]   ;;  %s11057_s4 = inlined_call_operand.vmem [shape: f32[72,4], index: 4, kind: input, shape index: {}]   ;;  %s11058_s5 = inlined_call_operand.vmem [shape: f32[1,4], index: 5, kind: input, shape index: {}]   ;;  %s11059_s6 = inlined_call_operand.vmem [shape: f32[4,36], index: 6, kind: input, shape index: {}]   ;;  %s11060_s7 = inlined_call_operand.vmem [shape: f32[4,1], index: 7, kind: input, shape index: {}]   ;;  %s11061_s8 = inlined_call_operand.vmem [shape: f32[2,4,256], index: 8, kind: output, shape index: {}]  }
   0x1 LB: > { %s6301_s28 = sadd.s32 4294967295, %s7330_s27   ;;  %p6305_p0 = scmp.ge.s32.totalorder %s7330_s27, 1  ;;  %s7330_s27 = sphi %s7395_s27, %s18_s27  }
   0x2   : > { %p272_p1 = scmp.lt.s32.totalorder %s7330_s27, 3 }
   0x4   : > { %p273_p2 = pnand %p6305_p0, %p272_p1 }
   0x6   : > { %276 = sbr.rel (%p273_p2) target bundleno = 1904 (0x770), region = 52 }
   0xd   : > { %v334_v0 = vld [vmem:[%s11055_s2] sm:$0xff]  ;;  %p311_p3 = scmp.lt.s32.totalorder %s6301_s28, 1  ;;  %vm342_vm0 = vcmask 64512   ;;  %vm482_vm1 = vcmask 58368   ;;  %v11062_v9 = vmov 0.0   ;;  %s7333_s13 = smov 8   ;;  %v613_v16 = vlaneseq }
   0xe   : > { %6476 = vmatprep.subr.mxu0 %v334_v0  ;;  %481 = vst.msk [vmem:[#allocation2 + $0x8] sm:$0xff] %vm342_vm0, %v11062_v9  ;;  %480 = vst.msk [vmem:[#allocation2] sm:$0xff] %vm342_vm0, %v11062_v9  ;;  %s7334_s14 = smov 16   ;;  %v7335_v14 = vmov 1966171168   ;;  %s7336_s17 = smov 124  }
   0xf   : > { %6477 = vmatpush3.msra.mxu0 %v334_v0  ;;  %s11399_s28 = smov (!%p311_p3, %s6301_s28), 1  ;;  %483 = vst.msk [vmem:[#allocation2 + $0x10] sm:$0x3] %vm482_vm1, %v11062_v9  ;;  %486 = vst.msk [vmem:[#allocation2 + $0x28] sm:$0x3] %vm482_vm1, %v11062_v9  ;;  %v611_v15 = vunpack.c.l.s4 %v7335_v14  ;;  %v7532_v18 = vshrl.u32 %v613_v16, 7 }
  0x10   : > { %s6389_s9 = sshll.u32 %s11399_s28, 6  ;;  %484 = vst.msk [vmem:[#allocation2 + $0x18] sm:$0xff] %vm342_vm0, %v11062_v9  ;;  %485 = vst.msk [vmem:[#allocation2 + $0x20] sm:$0xff] %vm342_vm0, %v11062_v9  ;;  %v7537_v19 = vld [vmem:[%s11056_s3] ss:$0 sm:$0xff]  ;;  %vm1513_vm2 = vcmask 1040384  }
  0x11   : > { %s315_s12 = scalar_lea.vmem %s11053_s0, %s6389_s9  ;;  %487 = vst.msk [vmem:[#allocation2 + $0x30] sm:$0xff] %vm342_vm0, %v11062_v9  ;;  %488 = vst.msk [vmem:[#allocation2 + $0x38] sm:$0xff] %vm342_vm0, %v11062_v9  ;;  %v612_v17 = vunpack.c.0.s8 %v611_v15  ;;  %v7546_v29 = vsub.s32 0, %v7532_v18  ;;  %s7338_s18 = smov 120   ;;  %vm568_vm3 = vcmask 31744   ;;  %vm2410_vm4 = vcmask 64544  }
  0x12   : > { %v326_v1 = vld [vmem:[%s315_s12] sm:$0xff]  ;;  %v327_v2 = vld [vmem:[%s315_s12 + $0x8] sm:$0xff]  ;;  %v328_v3 = vld [vmem:[%s315_s12 + $0x10] sm:$0xff]  ;;  %489 = vst.msk [vmem:[#allocation2 + $0x40] sm:$0x3] %vm482_vm1, %v11062_v9  ;;  %s6390_s19 = sshll.u32 %s11399_s28, 8 }
  0x13   : > { %6478 = vmatprep.mubr.msk.f32.mxu0 %vm342_vm0, %v326_v1  ;;  %v329_v4 = vld [vmem:[%s315_s12 + $0x18] sm:$0xff]  ;;  %v330_v5 = vld [vmem:[%s315_s12 + $0x20] sm:$0xff]  ;;  %v331_v6 = vld [vmem:[%s315_s12 + $0x28] sm:$0xff]  ;;  %490 = vst.msk [vmem:[#allocation2 + $0x48] sm:$0xff] %vm342_vm0, %v11062_v9  ;;  %v7541_v22 = vsub.s32 %v612_v17, %v7532_v18  ;;  %s8212_s22 = scalar_lea.vmem %s11054_s1, %s6390_s19  ;;  %s7339_s23 = smov 4   ;;  %vm3788_vm5 = vcmask 130048  }
  0x14   : > { %6479 = vmatmul.mubr.msk.f32.vlgmr.msra.gmra.mrb[0].mxu0 %vm342_vm0, %v327_v2  ;;  %v332_v7 = vld [vmem:[%s315_s12 + $0x30] sm:$0xff]  ;;  %v333_v8 = vld [vmem:[%s315_s12 + $0x38] sm:$0xff]  ;;  %491 = vst.msk [vmem:[#allocation2 + $0x50] sm:$0xff] %vm342_vm0, %v11062_v9  ;;  %493 = vst.msk [vmem:[#allocation2 + $0x60] sm:$0xff] %vm342_vm0, %v11062_v9  ;;  %s7340_s24 = smov 24   ;;  %s7341_s25 = smov 32  }
  0x15   : > { %6481 = vmatprep.mubr.msk.f32.mxu0 %vm342_vm0, %v328_v3  ;;  %492 = vst.msk [vmem:[#allocation2 + $0x58] sm:$0x3] %vm482_vm1, %v11062_v9  ;;  %495 = vst.msk [vmem:[#allocation2 + $0x70] sm:$0x3] %vm482_vm1, %v11062_v9  ;;  %v2475_v11 = vld [vmem:[#allocation2 + $0x1] sm:$0xff]  ;;  %s7342_s26 = smov 40  }
  0x16   : > { %494 = vst.msk [vmem:[#allocation2 + $0x68] sm:$0xff] %vm342_vm0, %v11062_v9  ;;  %496 = vst.msk [vmem:[#allocation2 + $0x78] sm:$0xff] %vm342_vm0, %v11062_v9  ;;  %v2476_v10 = vld [vmem:[#allocation2 + $0x9] sm:$0xff]  ;;  %2764 = vrot.lane.b32.xlu0 %v2475_v11, %s7333_s13  ;;  %s7343_s29 = smov 48   ;;  %vm3821_vm6 = vcmask 195584   ;;  %vm3854_vm7 = vcmask 261120  }
  0x17   : > { %497 = vst.msk [vmem:[#allocation2 + $0x80] sm:$0xff] %vm342_vm0, %v11062_v9  ;;  %499 = vst.msk [vmem:[#allocation2 + $0x90] sm:$0xff] %vm342_vm0, %v11062_v9  ;;  %2766 = vrot.lane.b32.xlu1 %v2476_v10, %s7333_s13  ;;  %v2508_v12 = vld [vmem:[#allocation2 + $0xa] sm:$0xff]  ;;  %v2507_v13 = vld [vmem:[#allocation2 + $0x2] sm:$0xff]  ;;  %vm3887_vm8 = vcmask 326656   ;;  %vm3920_vm9 = vcmask 392192  }
  0x18   : > { %6482 = vmatmul.mubr.msk.f32.gmra.mrb[2].mxu0 %vm342_vm0, %v329_v4  ;;  %498 = vst.msk [vmem:[#allocation2 + $0x88] sm:$0x3] %vm482_vm1, %v11062_v9  ;;  %501 = vst.msk [vmem:[#allocation2 + $0xa0] sm:$0x3] %vm482_vm1, %v11062_v9  ;;  %vm3953_vm10 = vcmask 457728   ;;  %vm3986_vm11 = vcmask 523264  }
  0x19   : > { %6484 = vmatprep.mubr.msk.f32.mxu0 %vm342_vm0, %v330_v5  ;;  %500 = vst.msk [vmem:[#allocation2 + $0x98] sm:$0xff] %vm342_vm0, %v11062_v9  ;;  %502 = vst.msk [vmem:[#allocation2 + $0xa8] sm:$0xff] %vm342_vm0, %v11062_v9  ;;  %vm4035_vm12 = vcmask 588800   ;;  %vm4391_vm13 = vcmask 25600   ;;  %s7348_s19 = smov 28   ;;  %vm5854_vm14 = vcmask 97280  }
  0x1a   : > { %503 = vst.msk [vmem:[#allocation2 + $0xb0] sm:$0xff] %vm342_vm0, %v11062_v9  ;;  %505 = vst.msk [vmem:[#allocation2 + $0xc0] sm:$0xff] %vm342_vm0, %v11062_v9  ;;  %2892 = vrot.lane.b32.xlu0 %v2507_v13, %s7334_s14  ;;  %vm5919_vm15 = vcmask 162816  }
  0x1b   : > { %504 = vst.msk [vmem:[#allocation2 + $0xb8] sm:$0x3] %vm482_vm1, %v11062_v9  ;;  %507 = vst.msk [vmem:[#allocation2 + $0xd0] sm:$0x3] %vm482_vm1, %v11062_v9  ;;  %2894 = vrot.lane.b32.xlu1 %v2508_v12, %s7334_s14 }
  0x1c   : > { %6485 = vmatmul.mubr.msk.f32.gmra.mrb[4].mxu0 %vm342_vm0, %v331_v6  ;;  %506 = vst.msk [vmem:[#allocation2 + $0xc8] sm:$0xff] %vm342_vm0, %v11062_v9  ;;  %508 = vst.msk [vmem:[#allocation2 + $0xd8] sm:$0xff] %vm342_vm0, %v11062_v9 }
  0x1d   : > { %6487 = vmatprep.mubr.msk.f32.mxu0 %vm342_vm0, %v332_v7  ;;  %509 = vst.msk [vmem:[#allocation2 + $0xe0] sm:$0xff] %vm342_vm0, %v11062_v9  ;;  %511 = vst.msk [vmem:[#allocation2 + $0xf0] sm:$0xff] %vm342_vm0, %v11062_v9 }
  0x1e   : > { %510 = vst.msk [vmem:[#allocation2 + $0xe8] sm:$0x3] %vm482_vm1, %v11062_v9  ;;  %513 = vst.msk [vmem:[#allocation2 + $0x100] sm:$0x3] %vm482_vm1, %v11062_v9 }
  0x1f   : > { %512 = vst.msk [vmem:[#allocation2 + $0xf8] sm:$0xff] %vm342_vm0, %v11062_v9  ;;  %514 = vst.msk [vmem:[#allocation2 + $0x108] sm:$0xff] %vm342_vm0, %v11062_v9 }
  0x20   : > { %6488 = vmatmul.mubr.msk.f32.gmra.mrb[6].mxu0 %vm342_vm0, %v333_v8  ;;  %515 = vst.msk [vmem:[#allocation2 + $0x110] sm:$0xff] %vm342_vm0, %v11062_v9  ;;  %517 = vst.msk [vmem:[#allocation2 + $0x120] sm:$0xff] %vm342_vm0, %v11062_v9 }
  0x21   : > { %516 = vst.msk [vmem:[#allocation2 + $0x118] sm:$0x3] %vm482_vm1, %v11062_v9  ;;  %519 = vst.msk [vmem:[#allocation2 + $0x130] sm:$0x3] %vm482_vm1, %v11062_v9 }
  0x22   : > { %518 = vst.msk [vmem:[#allocation2 + $0x128] sm:$0xff] %vm342_vm0, %v11062_v9  ;;  %520 = vst.msk [vmem:[#allocation2 + $0x138] sm:$0xff] %vm342_vm0, %v11062_v9 }
  0x23   : > { %521 = vst.msk [vmem:[#allocation2 + $0x140] sm:$0xff] %vm342_vm0, %v11062_v9  ;;  %523 = vst.msk [vmem:[#allocation2 + $0x150] sm:$0xff] %vm342_vm0, %v11062_v9 }
  0x24   : > { %522 = vst.msk [vmem:[#allocation2 + $0x148] sm:$0x3] %vm482_vm1, %v11062_v9  ;;  %525 = vst.msk [vmem:[#allocation2 + $0x160] sm:$0x3] %vm482_vm1, %v11062_v9 }
  0x25   : > { %524 = vst.msk [vmem:[#allocation2 + $0x158] sm:$0xff] %vm342_vm0, %v11062_v9  ;;  %526 = vst.msk [vmem:[#allocation2 + $0x168] sm:$0xff] %vm342_vm0, %v11062_v9 }
  0x26   : > { %527 = vst.msk [vmem:[#allocation2 + $0x170] sm:$0xff] %vm342_vm0, %v11062_v9  ;;  %529 = vst.msk [vmem:[#allocation2 + $0x180] sm:$0xff] %vm342_vm0, %v11062_v9 }
  0x27   : > { %528 = vst.msk [vmem:[#allocation2 + $0x178] sm:$0x3] %vm482_vm1, %v11062_v9  ;;  %531 = vst.msk [vmem:[#allocation2 + $0x190] sm:$0x3] %vm482_vm1, %v11062_v9 }
  0x28   : > { %530 = vst.msk [vmem:[#allocation2 + $0x188] sm:$0xff] %vm342_vm0, %v11062_v9  ;;  %532 = vst.msk [vmem:[#allocation2 + $0x198] sm:$0xff] %vm342_vm0, %v11062_v9 }
  0x29   : > { %533 = vst.msk [vmem:[#allocation2 + $0x1a0] sm:$0xff] %vm342_vm0, %v11062_v9 }
  0x2a   : > { %534 = vst.msk [vmem:[#allocation2 + $0x1a8] sm:$0x3] %vm482_vm1, %v11062_v9  ;;  %vm5984_vm1 = vcmask 228352  }
  0x88   : > { %v7945_v9 = vpop.permute.xlu0 %2764 }
  0x89   : > { %11097 = vst [vmem:[#allocation15_spill] sm:$0xff] %v7945_v9 }
  0xe7   : > { %v6480_v20 = vpop.f32.mrb[0].mxu0 }
  0xe8   : > { %v439_v21 = vadd.f32 %v6480_v20, %v7537_v19  ;;  %v433_v23 = vpop.f32.mrb[1].mxu0 }
  0xe9   : > { %v434_v24 = vadd.f32 %v7537_v19, %v433_v23 }
  0xea   : > { %v473_v25 = vmax.f32 %v439_v21, 0.0 }
  0xeb   : > { %v472_v26 = vmax.f32 %v434_v24, 0.0  ;;  %v6483_v27 = vpop.f32.mrb[2].mxu0 }
  0xec   : > { %v665_v28 = vrot.slane %v473_v25, %v7541_v22  ;;  %v443_v30 = vpop.f32.mrb[3].mxu0  ;;  %v658_v32 = vcombine.high %v473_v25, %v473_v25  ;;  %v449_v48 = vadd.f32 %v6483_v27, %v7537_v19 }
  0xed   : > { %v616_v31 = vrot.slane %v472_v26, %v7541_v22  ;;  %v609_v44 = vcombine.high %v472_v26, %v472_v26  ;;  %v444_v62 = vadd.f32 %v7537_v19, %v443_v30 }
  0xee   : > { %v673_v33 = vcombine.high %v665_v28, %v665_v28  ;;  %v7550_v34 = vrot.slane %v665_v28, %v7541_v22  ;;  %v672_v40 = vrot.slane %v658_v32, %v7541_v22  ;;  %v7601_v59 = vmax.f32 %v449_v48, 0.0 }
  0xef   : > { %v7553_v35 = vrot.slane %v616_v31, %v7541_v22  ;;  %v6486_v36 = vpop.f32.mrb[4].mxu0  ;;  %v624_v50 = vcombine.high %v616_v31, %v616_v31  ;;  %v623_v54 = vrot.slane %v609_v44, %v7541_v22  ;;  %v7627_v8 = vmax.f32 %v444_v62, 0.0 }
  0xf0   : > { %v7556_v37 = vrot.slane %v673_v33, %v7541_v22  ;;  %v1100_v38 = vrot.slane %v7550_v34, %v7546_v29  ;;  %v453_v39 = vpop.f32.mrb[5].mxu0  ;;  %v7573_v46 = vcombine.high %v7550_v34, %v7550_v34  ;;  %v674_v49 = vcombine.high %v672_v40, %v672_v40 }
  0xf1   : > { %v7566_v42 = vcombine.high %v7553_v35, %v7553_v35  ;;  %v1068_v45 = vrot.slane %v7553_v35, %v7546_v29  ;;  %v7586_v53 = vrot.slane %v672_v40, %v7541_v22  ;;  %v7593_v56 = vrot.slane %v624_v50, %v7541_v22 }
  0xf2   : > { %1337 = vrot.lane.b32.xlu0 %v1100_v38, %s7336_s17  ;;  %v1104_v41 = vrot.slane %v7556_v37, %v7546_v29  ;;  %v7583_v52 = vcombine.high %v7556_v37, %v7556_v37  ;;  %v1108_v55 = vrot.slane %v7573_v46, %v7546_v29  ;;  %v7599_v58 = vrot.slane %v674_v49, %v7541_v22 }
  0xf3   : > { %v6489_v43 = vpop.f32.mrb[6].mxu0  ;;  %v1076_v51 = vrot.slane %v7566_v42, %v7546_v29  ;;  %v625_v60 = vcombine.high %v623_v54, %v623_v54  ;;  %v1116_v61 = vrot.slane %v7586_v53, %v7546_v29  ;;  %v763_v0 = vrot.slane %v7601_v59, %v7541_v22 }
  0xf4   : > { %1339 = vrot.lane.b32.xlu1 %v1104_v41, %s7336_s17  ;;  %v7575_v47 = vpop.f32.mrb[7].mxu0  ;;  %v1112_v57 = vrot.slane %v7583_v52, %v7546_v29  ;;  %v1120_v63 = vrot.slane %v7599_v58, %v7546_v29  ;;  %v7614_v1 = vcombine.high %v7593_v56, %v7593_v56  ;;  %v459_v2 = vadd.f32 %v6486_v36, %v7537_v19 }
  0xf5   : > { %v7618_v3 = vrot.slane %v623_v54, %v7541_v22  ;;  %v454_v4 = vadd.f32 %v7537_v19, %v453_v39  ;;  %v1072_v5 = vrot.slane %v7593_v56, %v7546_v29  ;;  %v7625_v6 = vrot.slane %v625_v60, %v7541_v22 }
  0xf6   : > { %1321 = vrot.lane.b32.xlu0 %v1068_v45, %s7336_s17  ;;  %v477_v7 = vmax.f32 %v459_v2, 0.0  ;;  %v771_v11 = vcombine.high %v763_v0, %v763_v0  ;;  %v1080_v12 = vrot.slane %v7614_v1, %v7546_v29  ;;  %v7636_v15 = vrot.slane %v763_v0, %v7541_v22 }
  0xf7   : > { %v476_v10 = vmax.f32 %v454_v4, 0.0  ;;  %v1084_v16 = vrot.slane %v7618_v3, %v7546_v29  ;;  %v1088_v21 = vrot.slane %v7625_v6, %v7546_v29  ;;  %v7646_v23 = vcombine.high %v7586_v53, %v7586_v53 }
  0xf8   : > { %1325 = vrot.lane.b32.xlu1 %v1076_v51, %s7336_s17  ;;  %v854_v13 = vcombine.high %v477_v7, %v477_v7  ;;  %v7633_v14 = vrot.slane %v477_v7, %v7541_v22  ;;  %v469_v30 = vadd.f32 %v6489_v43, %v7537_v19  ;;  %v7659_v31 = vcombine.high %v7599_v58, %v7599_v58 }
  0xf9   : > { %v805_v17 = vcombine.high %v476_v10, %v476_v10  ;;  %v812_v20 = vrot.slane %v476_v10, %v7541_v22  ;;  %v7674_v40 = vrot.slane %v771_v11, %v7541_v22  ;;  %v1124_v41 = vrot.slane %v7646_v23, %v7546_v29 }
  0xfa   : > { %1341 = vrot.lane.b32.xlu0 %v1108_v55, %s7336_s17  ;;  %v868_v24 = vrot.slane %v854_v13, %v7541_v22  ;;  %v869_v25 = vcombine.high %v7633_v14, %v7633_v14  ;;  %v714_v44 = vrot.slane %v7627_v8, %v7541_v22  ;;  %v479_v48 = vmax.f32 %v469_v30, 0.0 }
  0xfb   : > { %v819_v26 = vrot.slane %v805_v17, %v7541_v22  ;;  %v820_v27 = vcombine.high %v812_v20, %v812_v20  ;;  %v7653_v28 = vrot.slane %v812_v20, %v7541_v22  ;;  %v1128_v49 = vrot.slane %v7659_v31, %v7546_v29 }
  0xfc   : > { %1343 = vrot.lane.b32.xlu1 %v1112_v57, %s7336_s17  ;;  %v870_v32 = vcombine.high %v868_v24, %v868_v24  ;;  %v7662_v33 = vrot.slane %v868_v24, %v7541_v22  ;;  %v7665_v36 = vrot.slane %v869_v25, %v7541_v22  ;;  %v1164_v50 = vrot.slane %v7636_v15, %v7546_v29 }
  0xfd   : > { %v7668_v38 = vrot.slane %v819_v26, %v7541_v22  ;;  %v7671_v39 = vrot.slane %v820_v27, %v7541_v22  ;;  %v821_v43 = vcombine.high %v819_v26, %v819_v26  ;;  %v464_v51 = vadd.f32 %v7537_v19, %v7575_v47 }
  0xfe   : > { %1345 = vrot.lane.b32.xlu0 %v1116_v61, %s7336_s17  ;;  %v7682_v45 = vrot.slane %v870_v32, %v7541_v22  ;;  %v7693_v54 = vcombine.high %v7618_v3, %v7618_v3  ;;  %v952_v55 = vcombine.high %v479_v48, %v479_v48  ;;  %v959_v57 = vrot.slane %v479_v48, %v7541_v22 }
  0xff   : > { %v756_v60 = vcombine.high %v7601_v59, %v7601_v59  ;;  %v1168_v61 = vrot.slane %v7674_v40, %v7546_v29  ;;  %v478_v62 = vmax.f32 %v464_v51, 0.0  ;;  %v722_v19 = vcombine.high %v714_v44, %v714_v44 }
 0x100   : > { %1347 = vrot.lane.b32.xlu1 %v1120_v63, %s7336_s17  ;;  %v7702_v63 = vrot.slane %v821_v43, %v7541_v22  ;;  %v966_v47 = vrot.slane %v952_v55, %v7541_v22  ;;  %v967_v0 = vcombine.high %v959_v57, %v959_v57  ;;  %v7706_v2 = vrot.slane %v959_v57, %v7541_v22 }
 0x101   : > { %v7711_v59 = vcombine.high %v7625_v6, %v7625_v6  ;;  %v903_v4 = vcombine.high %v478_v62, %v478_v62  ;;  %v7715_v7 = vrot.slane %v714_v44, %v7541_v22  ;;  %v1092_v10 = vrot.slane %v7693_v54, %v7546_v29 }
 0x102   : > { %1323 = vrot.lane.b32.xlu0 %v1072_v5, %s7336_s17  ;;  %11086 = vst [vmem:[#allocation4_spill] sm:$0xff] %v7706_v2  ;;  %v910_v5 = vrot.slane %v478_v62, %v7541_v22  ;;  %v7720_v11 = vrot.slane %v966_v47, %v7541_v22  ;;  %v968_v13 = vcombine.high %v966_v47, %v966_v47 }
 0x103   : > { %v7732_v24 = vrot.slane %v722_v19, %v7541_v22  ;;  %v1096_v25 = vrot.slane %v7711_v59, %v7546_v29  ;;  %v1132_v32 = vrot.slane %v7715_v7, %v7546_v29  ;;  %v707_v44 = vcombine.high %v7627_v8, %v7627_v8 }
 0x104   : > { %1327 = vrot.lane.b32.xlu1 %v1080_v12, %s7336_s17  ;;  %11087 = vst [vmem:[#allocation5_spill] sm:$0xff] %v7720_v11  ;;  %v7723_v12 = vrot.slane %v967_v0, %v7541_v22  ;;  %v918_v17 = vcombine.high %v910_v5, %v910_v5  ;;  %v7728_v20 = vrot.slane %v910_v5, %v7541_v22 }
 0x105   : > { %v7751_v43 = vrot.slane %v968_v13, %v7541_v22  ;;  %v721_v57 = vrot.slane %v707_v44, %v7541_v22  ;;  %v7783_v19 = vcombine.high %v7715_v7, %v7715_v7 }
 0x106   : > { %1329 = vrot.lane.b32.xlu0 %v1084_v16, %s7336_s17  ;;  %11088 = vst [vmem:[#allocation6_spill] sm:$0xff] %v7723_v12  ;;  %v917_v16 = vrot.slane %v903_v4, %v7541_v22  ;;  %11089 = vst [vmem:[#allocation7_spill] sm:$0xff] %v7728_v20  ;;  %v7741_v30 = vrot.slane %v918_v17, %v7541_v22  ;;  %v7790_v4 = vcombine.high %v7732_v24, %v7732_v24 }
 0x107   : > { %11091 = vst [vmem:[#allocation9_spill] sm:$0xff] %v7751_v43  ;;  %v723_v47 = vcombine.high %v721_v57, %v721_v57  ;;  %v7793_v5 = vrot.slane %v721_v57, %v7541_v22 }
 0x108   : > { %1331 = vrot.lane.b32.xlu1 %v1088_v21, %s7336_s17  ;;  %v770_v21 = vrot.slane %v756_v60, %v7541_v22  ;;  %v919_v26 = vcombine.high %v917_v16, %v917_v16  ;;  %v7738_v27 = vrot.slane %v917_v16, %v7541_v22  ;;  %11090 = vst [vmem:[#allocation8_spill] sm:$0xff] %v7741_v30 }
 0x109   : > { %v1144_v13 = vrot.slane %v7790_v4, %v7546_v29  ;;  %v7802_v16 = vrot.slane %v723_v47, %v7541_v22  ;;  %v1148_v17 = vrot.slane %v7793_v5, %v7546_v29  ;;  %v7966_v9 = vcombine.high %v7741_v30, %v7741_v30 }
 0x10a   : > { %1349 = vrot.lane.b32.xlu0 %v1124_v41, %s7336_s17  ;;  %v7748_v41 = vcombine.high %v7636_v15, %v7636_v15  ;;  %v772_v48 = vcombine.high %v770_v21, %v770_v21  ;;  %v7763_v51 = vrot.slane %v919_v26, %v7541_v22  ;;  %v7766_v55 = vrot.slane %v770_v21, %v7541_v22 }
 0x10b   : > { %v1152_v26 = vrot.slane %v7802_v16, %v7546_v29  ;;  %11101 = vst [vmem:[#allocation19_spill] sm:$0xff] %v7966_v9 }
 0x10c   : > { %1351 = vrot.lane.b32.xlu1 %v1128_v49, %s7336_s17  ;;  %v1136_v49 = vrot.slane %v7732_v24, %v7546_v29  ;;  %11092 = vst [vmem:[#allocation10_spill] sm:$0xff] %v7763_v51  ;;  %v1172_v8 = vrot.slane %v7748_v41, %v7546_v29  ;;  %v1180_v62 = vrot.slane %v7766_v55, %v7546_v29 }
 0x10d   : > { %v7809_v21 = vcombine.high %v7766_v55, %v7766_v55 }
 0x10e   : > { %1369 = vrot.lane.b32.xlu0 %v1164_v50, %s7336_s17  ;;  %v7760_v50 = vcombine.high %v7674_v40, %v7674_v40 }
 0x10f   : > { %v1188_v44 = vrot.slane %v7809_v21, %v7546_v29 }
 0x110   : > { %1371 = vrot.lane.b32.xlu1 %v1168_v61, %s7336_s17  ;;  %v1176_v60 = vrot.slane %v7760_v50, %v7546_v29  ;;  %v7776_v61 = vrot.slane %v772_v48, %v7541_v22  ;;  %v1232_v48 = vrot.slane %v7665_v36, %v7546_v29 }
 0x112   : > { %1333 = vrot.lane.b32.xlu0 %v1092_v10, %s7336_s17  ;;  %v1184_v0 = vrot.slane %v7776_v61, %v7546_v29  ;;  %v1140_v10 = vrot.slane %v7783_v19, %v7546_v29 }
 0x114   : > { %1335 = vrot.lane.b32.xlu1 %v1096_v25, %s7336_s17  ;;  %v7813_v25 = vrot.slane %v7633_v14, %v7541_v22 }
 0x116   : > { %1353 = vrot.lane.b32.xlu0 %v1132_v32, %s7336_s17  ;;  %v7820_v32 = vcombine.high %v7776_v61, %v7776_v61  ;;  %v1228_v14 = vrot.slane %v7813_v25, %v7546_v29  ;;  %v7853_v47 = vcombine.high %v7813_v25, %v7813_v25 }
 0x118   : > { %1355 = vrot.lane.b32.xlu1 %v1136_v49, %s7336_s17  ;;  %v1192_v22 = vrot.slane %v7820_v32, %v7546_v29  ;;  %v7835_v49 = vcombine.high %v7793_v5, %v7793_v5 }
 0x11a   : > { %1373 = vrot.lane.b32.xlu0 %v1172_v8, %s7336_s17  ;;  %v7840_v8 = vcombine.high %v7802_v16, %v7802_v16  ;;  %v1156_v57 = vrot.slane %v7835_v49, %v7546_v29 }
 0x11c   : > { %1375 = vrot.lane.b32.xlu1 %v1176_v60, %s7336_s17  ;;  %v1160_v60 = vrot.slane %v7840_v8, %v7546_v29 }
 0x11e   : > { %1377 = vrot.lane.b32.xlu0 %v1180_v62, %s7336_s17  ;;  %v1196_v62 = vrot.slane %v7653_v28, %v7546_v29 }
 0x120   : > { %1379 = vrot.lane.b32.xlu1 %v1184_v0, %s7336_s17  ;;  %v1200_v0 = vrot.slane %v7671_v39, %v7546_v29 }
 0x122   : > { %1357 = vrot.lane.b32.xlu0 %v1140_v10, %s7336_s17  ;;  %v7860_v10 = vcombine.high %v7665_v36, %v7665_v36 }
 0x124   : > { %1359 = vrot.lane.b32.xlu1 %v1144_v13, %s7336_s17  ;;  %v1236_v13 = vrot.slane %v7853_v47, %v7546_v29 }
 0x126   : > { %1361 = vrot.lane.b32.xlu0 %v1148_v17, %s7336_s17  ;;  %v1240_v17 = vrot.slane %v7860_v10, %v7546_v29 }
 0x128   : > { %1363 = vrot.lane.b32.xlu1 %v1152_v26, %s7336_s17  ;;  %v1244_v26 = vrot.slane %v7662_v33, %v7546_v29 }
 0x12a   : > { %1381 = vrot.lane.b32.xlu0 %v1188_v44, %s7336_s17  ;;  %v7873_v44 = vcombine.high %v7653_v28, %v7653_v28 }
 0x12c   : > { %1383 = vrot.lane.b32.xlu1 %v1192_v22, %s7336_s17  ;;  %v1248_v22 = vrot.slane %v7682_v45, %v7546_v29 }
 0x12e   : > { %1401 = vrot.lane.b32.xlu0 %v1228_v14, %s7336_s17  ;;  %v7880_v14 = vcombine.high %v7671_v39, %v7671_v39 }
 0x130   : > { %1403 = vrot.lane.b32.xlu1 %v1232_v48, %s7336_s17  ;;  %v1204_v48 = vrot.slane %v7873_v44, %v7546_v29 }
 0x132   : > { %1365 = vrot.lane.b32.xlu0 %v1156_v57, %s7336_s17  ;;  %v1208_v57 = vrot.slane %v7880_v14, %v7546_v29 }
 0x134   : > { %1367 = vrot.lane.b32.xlu1 %v1160_v60, %s7336_s17  ;;  %v1212_v60 = vrot.slane %v7668_v38, %v7546_v29 }
 0x136   : > { %1385 = vrot.lane.b32.xlu0 %v1196_v62, %s7336_s17  ;;  %v7893_v62 = vcombine.high %v7662_v33, %v7662_v33 }
 0x138   : > { %1387 = vrot.lane.b32.xlu1 %v1200_v0, %s7336_s17  ;;  %v1216_v0 = vrot.slane %v7702_v63, %v7546_v29 }
 0x13a   : > { %1405 = vrot.lane.b32.xlu0 %v1236_v13, %s7336_s17  ;;  %v7900_v13 = vcombine.high %v7682_v45, %v7682_v45 }
 0x13c   : > { %1407 = vrot.lane.b32.xlu1 %v1240_v17, %s7336_s17  ;;  %v1252_v17 = vrot.slane %v7893_v62, %v7546_v29 }
 0x13e   : > { %1409 = vrot.lane.b32.xlu0 %v1244_v26, %s7336_s17  ;;  %v1256_v26 = vrot.slane %v7900_v13, %v7546_v29 }
 0x140   : > { %1411 = vrot.lane.b32.xlu1 %v1248_v22, %s7336_s17  ;;  %v1292_v22 = vrot.slane %v7706_v2, %v7546_v29 }
 0x142   : > { %1389 = vrot.lane.b32.xlu0 %v1204_v48, %s7336_s17  ;;  %v1296_v48 = vrot.slane %v7723_v12, %v7546_v29 }
 0x144   : > { %1391 = vrot.lane.b32.xlu1 %v1208_v57, %s7336_s17  ;;  %v7915_v57 = vcombine.high %v7668_v38, %v7668_v38 }
 0x146   : > { %1393 = vrot.lane.b32.xlu0 %v1212_v60, %s7336_s17  ;;  %11093 = vst [vmem:[#allocation11_spill] sm:$0xff] %v7915_v57  ;;  %v7920_v60 = vcombine.high %v7702_v63, %v7702_v63 }
 0x148   : > { %1395 = vrot.lane.b32.xlu1 %v1216_v0, %s7336_s17  ;;  %11094 = vst [vmem:[#allocation12_spill] sm:$0xff] %v7920_v60  ;;  %v1220_v0 = vrot.slane %v7915_v57, %v7546_v29  ;;  %v1308_v57 = vrot.slane %v7720_v11, %v7546_v29 }
 0x14a   : > { %1413 = vrot.lane.b32.xlu0 %v1252_v17, %s7336_s17  ;;  %v1224_v17 = vrot.slane %v7920_v60, %v7546_v29 }
 0x14c   : > { %1415 = vrot.lane.b32.xlu1 %v1256_v26, %s7336_s17  ;;  %v1260_v26 = vrot.slane %v7728_v20, %v7546_v29 }
 0x14e   : > { %1433 = vrot.lane.b32.xlu0 %v1292_v22, %s7336_s17  ;;  %v7933_v22 = vcombine.high %v7706_v2, %v7706_v2 }
 0x150   : > { %1435 = vrot.lane.b32.xlu1 %v1296_v48, %s7336_s17  ;;  %11095 = vst [vmem:[#allocation13_spill] sm:$0xff] %v7933_v22  ;;  %v1264_v48 = vrot.slane %v7741_v30, %v7546_v29  ;;  %v7981_v30 = vcombine.high %v7720_v11, %v7720_v11 }
 0x152   : > { %1397 = vrot.lane.b32.xlu0 %v1220_v0, %s7336_s17  ;;  %v7940_v0 = vcombine.high %v7723_v12, %v7723_v12  ;;  %11103 = vst [vmem:[#allocation21_spill] sm:$0xff] %v7981_v30 }
 0x154   : > { %1399 = vrot.lane.b32.xlu1 %v1224_v17, %s7336_s17  ;;  %11096 = vst [vmem:[#allocation14_spill] sm:$0xff] %v7940_v0  ;;  %v1300_v17 = vrot.slane %v7933_v22, %v7546_v29  ;;  %v1304_v60 = vrot.slane %v7940_v0, %v7546_v29  ;;  %v7960_v22 = vpop.permute.xlu0 %2892  ;;  %v1276_v0 = vrot.slane %v7738_v27, %v7546_v29 }
 0x155   : > { %11100 = vst [vmem:[#allocation18_spill] sm:$0xff] %v7960_v22 }
 0x156   : > { %1417 = vrot.lane.b32.xlu0 %v1260_v26, %s7336_s17  ;;  %v7950_v26 = vpop.permute.xlu1 %2766 }
 0x157   : > { %11098 = vst [vmem:[#allocation16_spill] sm:$0xff] %v7950_v26 }
 0x158   : > { %1419 = vrot.lane.b32.xlu1 %v1264_v48, %s7336_s17  ;;  %v7957_v48 = vcombine.high %v7728_v20, %v7728_v20 }
 0x15a   : > { %1437 = vrot.lane.b32.xlu0 %v1300_v17, %s7336_s17  ;;  %11099 = vst [vmem:[#allocation17_spill] sm:$0xff] %v7957_v48  ;;  %v1312_v17 = vrot.slane %v7751_v43, %v7546_v29  ;;  %v7971_v26 = vpop.permute.xlu1 %2894 }
 0x15b   : > { %11102 = vst [vmem:[#allocation20_spill] sm:$0xff] %v7971_v26  ;;  %v7988_v26 = vcombine.high %v7751_v43, %v7751_v43 }
 0x15c   : > { %1439 = vrot.lane.b32.xlu1 %v1304_v60, %s7336_s17  ;;  %v1268_v60 = vrot.slane %v7957_v48, %v7546_v29 }
 0x15d   : > { %11104 = vst [vmem:[#allocation22_spill] sm:$0xff] %v7988_v26 }
 0x15e   : > { %1441 = vrot.lane.b32.xlu0 %v1308_v57, %s7336_s17  ;;  %v1272_v57 = vrot.slane %v7966_v9, %v7546_v29 }
 0x160   : > { %1443 = vrot.lane.b32.xlu1 %v1312_v17, %s7336_s17  ;;  %v7337_v17 = vmov 1983009808  }
 0x161   : > { %v1773_v48 = vunpack.c.l.s4 %v7337_v17  ;;  %v1316_v17 = vrot.slane %v7981_v30, %v7546_v29 }
 0x162   : > { %1421 = vrot.lane.b32.xlu0 %v1268_v60, %s7336_s17  ;;  %v1280_v60 = vrot.slane %v7763_v51, %v7546_v29 }
 0x163   : > { %v1774_v2 = vunpack.c.0.s8 %v1773_v48 }
 0x164   : > { %v1338_v22 = vpop.permute.xlu0 %1337  ;;  %1423 = vrot.lane.b32.xlu1 %v1272_v57, %s7336_s17 }
 0x165   : > { %v1522_v57 = vsel %vm1513_vm2, %v7550_v34, %v1338_v22  ;;  %v1320_v34 = vrot.slane %v7988_v26, %v7546_v29 }
 0x166   : > { %v1340_v20 = vpop.permute.xlu1 %1339  ;;  %1425 = vrot.lane.b32.xlu0 %v1276_v0, %s7336_s17  ;;  %v7999_v0 = vcombine.high %v7738_v27, %v7738_v27 }
 0x167   : > { %v1523_v9 = vsel %vm1513_vm2, %v7556_v37, %v1340_v20  ;;  %v8006_v37 = vcombine.high %v7763_v51, %v7763_v51 }
 0x168   : > { %v1322_v11 = vpop.permute.xlu0 %1321  ;;  %1427 = vrot.lane.b32.xlu1 %v1280_v60, %s7336_s17  ;;  %11105 = vst [vmem:[#allocation23_spill] sm:$0xff] %v7999_v0  ;;  %v1838_v12 = vcombine.low %v1522_v57, %v1523_v9  ;;  %v1284_v22 = vrot.slane %v7999_v0, %v7546_v29  ;;  %v8012_v60 = vsub.s32 %v1774_v2, %v7532_v18 }
 0x16a   : > { %v1326_v43 = vpop.permute.xlu1 %1325  ;;  %1445 = vrot.lane.b32.xlu0 %v1316_v17, %s7336_s17  ;;  %v1288_v17 = vrot.slane %v8006_v37, %v7546_v29  ;;  %v8024_v18 = vrot.slane %v1838_v12, %v8012_v60 }
 0x16c   : > { %v1342_v20 = vpop.permute.xlu0 %1341  ;;  %1447 = vrot.lane.b32.xlu1 %v1320_v34, %s7336_s17 }
 0x16d   : > { %v1524_v26 = vsel %vm1513_vm2, %v7573_v46, %v1342_v20 }
 0x16e   : > { %v1344_v48 = vpop.permute.xlu1 %1343  ;;  %1429 = vrot.lane.b32.xlu0 %v1284_v22, %s7336_s17 }
 0x16f   : > { %v1525_v30 = vsel %vm1513_vm2, %v7583_v52, %v1344_v48  ;;  %v1514_v52 = vsel %vm1513_vm2, %v7553_v35, %v1322_v11 }
 0x170   : > { %v1346_v51 = vpop.permute.xlu0 %1345  ;;  %1431 = vrot.lane.b32.xlu1 %v1288_v17, %s7336_s17  ;;  %v1839_v34 = vcombine.low %v1524_v26, %v1525_v30  ;;  %s7346_s17 = smov 12  }
 0x172   : > { %v1348_v0 = vpop.permute.xlu1 %1347  ;;  %1658 = vrot.lane.b32.xlu0 %v1522_v57, %s7338_s18  ;;  %v8027_v2 = vrot.slane %v1839_v34, %v8012_v60  ;;  %v1516_v57 = vsel %vm1513_vm2, %v7566_v42, %v1326_v43 }
 0x174   : > { %v1324_v29 = vpop.permute.xlu0 %1323  ;;  %1660 = vrot.lane.b32.xlu1 %v1523_v9, %s7338_s18  ;;  %v1854_v46 = vcombine.low %v8024_v18, %v8027_v2 }
 0x175   : > { %v1515_v20 = vsel %vm1513_vm2, %v7593_v56, %v1324_v29  ;;  %v8064_v29 = vsel %vm1513_vm2, %v7586_v53, %v1346_v51 }
 0x176   : > { %v1328_v22 = vpop.permute.xlu1 %1327  ;;  %1642 = vrot.lane.b32.xlu0 %v1514_v52, %s7338_s18  ;;  %v1770_v12 = vcombine.low %v1514_v52, %v1515_v20 }
 0x177   : > { %v1517_v48 = vsel %vm1513_vm2, %v7614_v1, %v1328_v22 }
 0x178   : > { %v1330_v9 = vpop.permute.xlu0 %1329  ;;  %1644 = vrot.lane.b32.xlu1 %v1515_v20, %s7338_s18  ;;  %v1771_v17 = vcombine.low %v1516_v57, %v1517_v48  ;;  %v8043_v34 = vrot.slane %v1770_v12, %v8012_v60 }
 0x179   : > { %v8051_v11 = vsel %vm1513_vm2, %v7618_v3, %v1330_v9 }
 0x17a   : > { %1662 = vrot.lane.b32.xlu0 %v1524_v26, %s7338_s18  ;;  %v1332_v35 = vpop.permute.xlu1 %1331  ;;  %v8047_v56 = vrot.slane %v1771_v17, %v8012_v60 }
 0x17b   : > { %v8055_v42 = vsel %vm1513_vm2, %v7625_v6, %v1332_v35  ;;  %v8070_v6 = vsel %vm1513_vm2, %v7599_v58, %v1348_v0 }
 0x17c   : > { %v1350_v1 = vpop.permute.xlu0 %1349  ;;  %1664 = vrot.lane.b32.xlu1 %v1525_v30, %s7338_s18  ;;  %v1786_v43 = vcombine.low %v8043_v34, %v8047_v56  ;;  %v1787_v26 = vcombine.low %v8051_v11, %v8055_v42  ;;  %v11107_v34 = vld [vmem:[#allocation4_spill] sm:$0xff] }
 0x17d   : > { %v8086_v12 = vsel %vm1513_vm2, %v7646_v23, %v1350_v1 }
 0x17e   : > { %1666 = vrot.lane.b32.xlu0 %v8064_v29, %s7338_s18  ;;  %v1352_v3 = vpop.permute.xlu1 %1351 }
 0x180   : > { %v1370_v52 = vpop.permute.xlu0 %1369  ;;  %1668 = vrot.lane.b32.xlu1 %v8070_v6, %s7338_s18 }
 0x181   : > { %v1538_v20 = vsel %vm1513_vm2, %v7636_v15, %v1370_v52 }
 0x182   : > { %1646 = vrot.lane.b32.xlu0 %v1516_v57, %s7338_s18  ;;  %v1372_v30 = vpop.permute.xlu1 %1371 }
 0x183   : > { %v1539_v53 = vsel %vm1513_vm2, %v7674_v40, %v1372_v30  ;;  %v8092_v40 = vsel %vm1513_vm2, %v7659_v31, %v1352_v3 }
 0x184   : > { %v1334_v51 = vpop.permute.xlu0 %1333  ;;  %1648 = vrot.lane.b32.xlu1 %v1517_v48, %s7338_s18  ;;  %v1974_v22 = vcombine.low %v1538_v20, %v1539_v53 }
 0x186   : > { %1650 = vrot.lane.b32.xlu0 %v8051_v11, %s7338_s18  ;;  %v1336_v58 = vpop.permute.xlu1 %1335  ;;  %v8111_v3 = vrot.slane %v1974_v22, %v8012_v60 }
 0x188   : > { %v1354_v0 = vpop.permute.xlu0 %1353  ;;  %1652 = vrot.lane.b32.xlu1 %v8055_v42, %s7338_s18 }
 0x189   : > { %v1530_v57 = vsel %vm1513_vm2, %v7715_v7, %v1354_v0 }
 0x18a   : > { %1670 = vrot.lane.b32.xlu0 %v8086_v12, %s7338_s18  ;;  %v1356_v15 = vpop.permute.xlu1 %1355 }
 0x18b   : > { %v1531_v48 = vsel %vm1513_vm2, %v7732_v24, %v1356_v15  ;;  %v8108_v24 = vsel %vm1513_vm2, %v7693_v54, %v1334_v51 }
 0x18c   : > { %v1374_v9 = vpop.permute.xlu0 %1373  ;;  %1672 = vrot.lane.b32.xlu1 %v8092_v40, %s7338_s18  ;;  %v1906_v23 = vcombine.low %v1530_v57, %v1531_v48 }
 0x18d   : > { %v1540_v35 = vsel %vm1513_vm2, %v7748_v41, %v1374_v9 }
 0x18e   : > { %1690 = vrot.lane.b32.xlu0 %v1538_v20, %s7338_s18  ;;  %v1376_v17 = vpop.permute.xlu1 %1375  ;;  %v8143_v0 = vrot.slane %v1906_v23, %v8012_v60 }
 0x18f   : > { %v1541_v31 = vsel %vm1513_vm2, %v7760_v50, %v1376_v17  ;;  %v8120_v50 = vsel %vm1513_vm2, %v7711_v59, %v1336_v58 }
 0x190   : > { %v1378_v1 = vpop.permute.xlu0 %1377  ;;  %1692 = vrot.lane.b32.xlu1 %v1539_v53, %s7338_s18  ;;  %v1975_v7 = vcombine.low %v1540_v35, %v1541_v31 }
 0x191   : > { %v8124_v30 = vsel %vm1513_vm2, %v7766_v55, %v1378_v1 }
 0x192   : > { %1654 = vrot.lane.b32.xlu0 %v8108_v24, %s7338_s18  ;;  %v1380_v52 = vpop.permute.xlu1 %1379  ;;  %v8116_v41 = vrot.slane %v1975_v7, %v8012_v60 }
 0x193   : > { %v8128_v54 = vsel %vm1513_vm2, %v7776_v61, %v1380_v52 }
 0x194   : > { %v1358_v20 = vpop.permute.xlu0 %1357  ;;  %1656 = vrot.lane.b32.xlu1 %v8120_v50, %s7338_s18  ;;  %v1990_v53 = vcombine.low %v8111_v3, %v8116_v41  ;;  %v1991_v51 = vcombine.low %v8124_v30, %v8128_v54  ;;  %v11118_v41 = vld [vmem:[#allocation19_spill] sm:$0xff] }
 0x195   : > { %v1532_v55 = vsel %vm1513_vm2, %v7783_v19, %v1358_v20 }
 0x196   : > { %1674 = vrot.lane.b32.xlu0 %v1530_v57, %s7338_s18  ;;  %v1360_v59 = vpop.permute.xlu1 %1359 }
 0x197   : > { %v1533_v61 = vsel %vm1513_vm2, %v7790_v4, %v1360_v59 }
 0x198   : > { %v1362_v22 = vpop.permute.xlu0 %1361  ;;  %1676 = vrot.lane.b32.xlu1 %v1531_v48, %s7338_s18  ;;  %v1907_v58 = vcombine.low %v1532_v55, %v1533_v61 }
 0x199   : > { %v1534_v57 = vsel %vm1513_vm2, %v7793_v5, %v1362_v22 }
 0x19a   : > { %1694 = vrot.lane.b32.xlu0 %v1540_v35, %s7338_s18  ;;  %v1364_v15 = vpop.permute.xlu1 %1363  ;;  %v8147_v9 = vrot.slane %v1907_v58, %v8012_v60 }
 0x19b   : > { %v1535_v19 = vsel %vm1513_vm2, %v7802_v16, %v1364_v15 }
 0x19c   : > { %v1382_v4 = vpop.permute.xlu0 %1381  ;;  %1696 = vrot.lane.b32.xlu1 %v1541_v31, %s7338_s18  ;;  %v1922_v48 = vcombine.low %v8143_v0, %v8147_v9  ;;  %v1923_v23 = vcombine.low %v1534_v57, %v1535_v19  ;;  %v11120_v0 = vld [vmem:[#allocation21_spill] sm:$0xff] }
 0x19e   : > { %1698 = vrot.lane.b32.xlu0 %v8124_v30, %s7338_s18  ;;  %v1384_v17 = vpop.permute.xlu1 %1383 }
 0x1a0   : > { %v1402_v35 = vpop.permute.xlu0 %1401  ;;  %1700 = vrot.lane.b32.xlu1 %v8128_v54, %s7338_s18  ;;  %v11117_v54 = vld [vmem:[#allocation17_spill] sm:$0xff] }
 0x1a1   : > { %v1554_v16 = vsel %vm1513_vm2, %v7813_v25, %v1402_v35 }
 0x1a2   : > { %1678 = vrot.lane.b32.xlu0 %v1532_v55, %s7338_s18  ;;  %v1404_v5 = vpop.permute.xlu1 %1403 }
 0x1a3   : > { %v1555_v31 = vsel %vm1513_vm2, %v7665_v36, %v1404_v5  ;;  %v8174_v36 = vsel %vm1513_vm2, %v7809_v21, %v1382_v4  ;;  %v8194_v21 = vsel %vm1513_vm2, %v7820_v32, %v1384_v17 }
 0x1a4   : > { %v2110_v1 = vcombine.low %v1554_v16, %v1555_v31  ;;  %v1366_v7 = vpop.permute.xlu0 %1365  ;;  %1680 = vrot.lane.b32.xlu1 %v1533_v61, %s7338_s18  ;;  %v8180_v61 = vrot.slane %v1923_v23, %v8012_v60 }
 0x1a5   : > { %v1536_v20 = vsel %vm1513_vm2, %v7835_v49, %v1366_v7  ;;  %v11106_v7 = vmov 0.0  }
 0x1a6   : > { %1682 = vrot.lane.b32.xlu0 %v1534_v57, %s7338_s18  ;;  %v1368_v52 = vpop.permute.xlu1 %1367  ;;  %v8215_v17 = vrot.slane %v2110_v1, %v8012_v60  ;;  %4389 = vst.msk [vmem:[#allocation3] sm:$0xff] %vm568_vm3, %v11106_v7  ;;  %4390 = vst.msk [vmem:[#allocation3 + $0x8] sm:$0xff] %vm568_vm3, %v11106_v7 }
 0x1a7   : > { %v1537_v59 = vsel %vm1513_vm2, %v7840_v8, %v1368_v52  ;;  %4393 = vst.msk [vmem:[#allocation3 + $0x18] sm:$0xff] %vm568_vm3, %v11106_v7  ;;  %4394 = vst.msk [vmem:[#allocation3 + $0x20] sm:$0xff] %vm568_vm3, %v11106_v7 }
 0x1a8   : > { %v1924_v55 = vcombine.low %v1536_v20, %v1537_v59  ;;  %v1386_v22 = vpop.permute.xlu0 %1385  ;;  %1684 = vrot.lane.b32.xlu1 %v1535_v19, %s7338_s18  ;;  %4396 = vst.msk [vmem:[#allocation3 + $0x30] sm:$0xff] %vm568_vm3, %v11106_v7  ;;  %4397 = vst.msk [vmem:[#allocation3 + $0x38] sm:$0xff] %vm568_vm3, %v11106_v7 }
 0x1a9   : > { %v8186_v8 = vsel %vm1513_vm2, %v7653_v28, %v1386_v22  ;;  %4399 = vst.msk [vmem:[#allocation3 + $0x48] sm:$0xff] %vm568_vm3, %v11106_v7  ;;  %4400 = vst.msk [vmem:[#allocation3 + $0x50] sm:$0xff] %vm568_vm3, %v11106_v7 }
 0x1aa   : > { %v8177_v25 = vrot.slane %v1924_v55, %v8012_v60  ;;  %1702 = vrot.lane.b32.xlu0 %v8174_v36, %s7338_s18  ;;  %v1388_v49 = vpop.permute.xlu1 %1387  ;;  %4402 = vst.msk [vmem:[#allocation3 + $0x60] sm:$0xff] %vm568_vm3, %v11106_v7  ;;  %4403 = vst.msk [vmem:[#allocation3 + $0x68] sm:$0xff] %vm568_vm3, %v11106_v7  ;;  %v1855_v55 = vcombine.low %v8064_v29, %v8070_v6  ;;  %v535_v6 = vld [vmem:[%s8212_s22] sm:$0xff] }
 0x1ab   : > { %v8190_v58 = vsel %vm1513_vm2, %v7671_v39, %v1388_v49  ;;  %4405 = vst.msk [vmem:[#allocation3 + $0x78] sm:$0xff] %vm568_vm3, %v11106_v7  ;;  %4406 = vst.msk [vmem:[#allocation3 + $0x80] sm:$0xff] %vm568_vm3, %v11106_v7 }
 0x1ac   : > { %v1939_v15 = vcombine.low %v8180_v61, %v8177_v25  ;;  %v2042_v57 = vcombine.low %v8186_v8, %v8190_v58  ;;  %v1406_v19 = vpop.permute.xlu0 %1405  ;;  %1704 = vrot.lane.b32.xlu1 %v8194_v21, %s7338_s18  ;;  %4408 = vst.msk [vmem:[#allocation3 + $0x90] sm:$0xff] %vm568_vm3, %v11106_v7  ;;  %4409 = vst.msk [vmem:[#allocation3 + $0x98] sm:$0xff] %vm568_vm3, %v11106_v7  ;;  %v11121_v61 = vld [vmem:[#allocation22_spill] sm:$0xff] }
 0x1ad   : > { %v1556_v39 = vsel %vm1513_vm2, %v7853_v47, %v1406_v19  ;;  %4411 = vst.msk [vmem:[#allocation3 + $0xa8] sm:$0xff] %vm568_vm3, %v11106_v7  ;;  %4412 = vst.msk [vmem:[#allocation3 + $0xb0] sm:$0xff] %vm568_vm3, %v11106_v7 }
 0x1ae   : > { %1722 = vrot.lane.b32.xlu0 %v1554_v16, %s7338_s18  ;;  %v1408_v28 = vpop.permute.xlu1 %1407  ;;  %v539_v16 = vld [vmem:[%s8212_s22 + $0x20] sm:$0xff]  ;;  %4414 = vst.msk [vmem:[#allocation3 + $0xc0] sm:$0xff] %vm568_vm3, %v11106_v7  ;;  %4415 = vst.msk [vmem:[#allocation3 + $0xc8] sm:$0xff] %vm568_vm3, %v11106_v7 }
 0x1af   : > { %v1557_v32 = vsel %vm1513_vm2, %v7860_v10, %v1408_v28  ;;  %573 = vst.msk [vmem:[#allocation2 + $0x49] sm:$0xff] %vm568_vm3, %v539_v16  ;;  %4417 = vst.msk [vmem:[#allocation3 + $0xd8] sm:$0xff] %vm568_vm3, %v11106_v7 }
 0x1b0   : > { %v2111_v4 = vcombine.low %v1556_v39, %v1557_v32  ;;  %v1410_v23 = vpop.permute.xlu0 %1409  ;;  %1724 = vrot.lane.b32.xlu1 %v1555_v31, %s7338_s18  ;;  %v540_v31 = vld [vmem:[%s8212_s22 + $0x28] sm:$0xff]  ;;  %4418 = vst.msk [vmem:[#allocation3 + $0xe0] sm:$0xff] %vm568_vm3, %v11106_v7  ;;  %4420 = vst.msk [vmem:[#allocation3 + $0xf0] sm:$0xff] %vm568_vm3, %v11106_v7 }
 0x1b1   : > { %4421 = vst.msk [vmem:[#allocation3 + $0xf8] sm:$0xff] %vm568_vm3, %v11106_v7  ;;  %4423 = vst.msk [vmem:[#allocation3 + $0x108] sm:$0xff] %vm568_vm3, %v11106_v7  ;;  %v8316_v49 = vsel %vm1513_vm2, %v7662_v33, %v1410_v23  ;;  %v1788_v23 = vcombine.low %v8108_v24, %v8120_v50 }
 0x1b2   : > { %v8218_v35 = vrot.slane %v2111_v4, %v8012_v60  ;;  %1686 = vrot.lane.b32.xlu0 %v1536_v20, %s7338_s18  ;;  %v1412_v47 = vpop.permute.xlu1 %1411  ;;  %4424 = vst.msk [vmem:[#allocation3 + $0x110] sm:$0xff] %vm568_vm3, %v11106_v7  ;;  %4426 = vst.msk [vmem:[#allocation3 + $0x120] sm:$0xff] %vm568_vm3, %v11106_v7  ;;  %v1856_v20 = vcombine.low %v8086_v12, %v8092_v40  ;;  %v1863_v40 = vrot.slane %v1855_v55, %v8012_v60  ;;  %v11110_v55 = vld [vmem:[#allocation12_spill] sm:$0xff] }
 0x1b3   : > { %4427 = vst.msk [vmem:[#allocation3 + $0x128] sm:$0xff] %vm568_vm3, %v11106_v7  ;;  %4429 = vst.msk [vmem:[#allocation3 + $0x138] sm:$0xff] %vm568_vm3, %v11106_v7  ;;  %v8323_v12 = vsel %vm1513_vm2, %v7682_v45, %v1412_v47  ;;  %v1802_v47 = vrot.slane %v1788_v23, %v8012_v60  ;;  %v11113_v23 = vld [vmem:[#allocation13_spill] sm:$0xff] }
 0x1b4   : > { %v2126_v10 = vcombine.low %v8215_v17, %v8218_v35  ;;  %v8223_v5 = vpop.permute.xlu0 %1389  ;;  %1688 = vrot.lane.b32.xlu1 %v1537_v59, %s7338_s18  ;;  %4430 = vst.msk [vmem:[#allocation3 + $0x140] sm:$0xff] %vm568_vm3, %v11106_v7  ;;  %4432 = vst.msk [vmem:[#allocation3 + $0x150] sm:$0xff] %vm568_vm3, %v11106_v7  ;;  %v1870_v19 = vrot.slane %v1856_v20, %v8012_v60  ;;  %v542_v35 = vld [vmem:[%s8212_s22 + $0x38] sm:$0xff] }
 0x1b5   : > { %4433 = vst.msk [vmem:[#allocation3 + $0x158] sm:$0xff] %vm568_vm3, %v11106_v7  ;;  %4435 = vst.msk [vmem:[#allocation3 + $0x168] sm:$0xff] %vm568_vm3, %v11106_v7  ;;  %v8340_v4 = vsel %vm1513_vm2, %v7873_v44, %v8223_v5 }
 0x1b6   : > { %1706 = vrot.lane.b32.xlu0 %v8186_v8, %s7338_s18  ;;  %v8230_v1 = vpop.permute.xlu1 %1391  ;;  %4436 = vst.msk [vmem:[#allocation3 + $0x170] sm:$0xff] %vm568_vm3, %v11106_v7  ;;  %4438 = vst.msk [vmem:[#allocation3 + $0x180] sm:$0xff] %vm568_vm3, %v11106_v7  ;;  %v1871_v33 = vcombine.low %v1863_v40, %v1870_v19 }
 0x1b7   : > { %4439 = vst.msk [vmem:[#allocation3 + $0x188] sm:$0xff] %vm568_vm3, %v11106_v7  ;;  %4441 = vst.msk [vmem:[#allocation3 + $0x198] sm:$0xff] %vm568_vm3, %v11106_v7  ;;  %v8349_v2 = vsel %vm1513_vm2, %v7880_v14, %v8230_v1  ;;  %v1795_v14 = vrot.slane %v1787_v26, %v8012_v60 }
 0x1b8   : > { %4442 = vst.msk [vmem:[#allocation3 + $0x1a0] sm:$0xff] %vm568_vm3, %v11106_v7  ;;  %574 = vst.msk [vmem:[#allocation2 + $0x51] sm:$0xff] %vm568_vm3, %v540_v31  ;;  %v1394_v52 = vpop.permute.xlu0 %1393  ;;  %1708 = vrot.lane.b32.xlu1 %v8190_v58, %s7338_s18  ;;  %v2043_v25 = vcombine.low %v8340_v4, %v8349_v2  ;;  %v541_v58 = vld [vmem:[%s8212_s22 + $0x30] sm:$0xff] }
 0x1b9   : > { %569 = vst.msk [vmem:[#allocation2 + $0x19] sm:$0xff] %vm568_vm3, %v535_v6  ;;  %v8355_v44 = vsel %vm1513_vm2, %v7668_v38, %v1394_v52  ;;  %v1803_v38 = vcombine.low %v1795_v14, %v1802_v47  ;;  %v11109_v52 = vld [vmem:[#allocation11_spill] sm:$0xff]  ;;  %v548_v6 = vld [vmem:[%s8212_s22 + $0x68] sm:$0xff]  ;;  %575 = vst.msk [vmem:[#allocation2 + $0x61] sm:$0xff] %vm568_vm3, %v541_v58 }
 0x1ba   : > { %1726 = vrot.lane.b32.xlu0 %v1556_v39, %s7338_s18  ;;  %v1396_v59 = vpop.permute.xlu1 %1395  ;;  %v536_v39 = vld [vmem:[%s8212_s22 + $0x8] sm:$0xff]  ;;  %582 = vst.msk [vmem:[#allocation2 + $0xb1] sm:$0xff] %vm568_vm3, %v548_v6  ;;  %576 = vst.msk [vmem:[#allocation2 + $0x69] sm:$0xff] %vm568_vm3, %v542_v35 }
 0x1bb   : > { %570 = vst.msk [vmem:[#allocation2 + $0x21] sm:$0xff] %vm568_vm3, %v536_v39  ;;  %v8362_v50 = vsel %vm1513_vm2, %v7702_v63, %v1396_v59 }
 0x1bc   : > { %v1414_v22 = vpop.permute.xlu0 %1413  ;;  %1728 = vrot.lane.b32.xlu1 %v1557_v32, %s7338_s18 }
 0x1bd   : > { %v8377_v63 = vsel %vm1513_vm2, %v7893_v62, %v1414_v22 }
 0x1be   : > { %1730 = vrot.lane.b32.xlu0 %v8316_v49, %s7338_s18  ;;  %v1416_v28 = vpop.permute.xlu1 %1415 }
 0x1bf   : > { %v8383_v42 = vsel %vm1513_vm2, %v7900_v13, %v1416_v28  ;;  %v11111_v28 = vld [vmem:[#allocation7_spill] sm:$0xff] }
 0x1c0   : > { %v1434_v29 = vpop.permute.xlu0 %1433  ;;  %1732 = vrot.lane.b32.xlu1 %v8323_v12, %s7338_s18 }
 0x1c1   : > { %v8389_v56 = vsel %vm1513_vm2, %v11107_v34, %v1434_v29  ;;  %v547_v29 = vld [vmem:[%s8212_s22 + $0x60] sm:$0xff] }
 0x1c2   : > { %2322 = vrot.lane.b32.xlu0 %v1854_v46, %s7339_s23  ;;  %v1436_v32 = vpop.permute.xlu1 %1435  ;;  %581 = vst.msk [vmem:[#allocation2 + $0xa9] sm:$0xff] %vm568_vm3, %v547_v29 }
 0x1c4   : > { %v1398_v45 = vpop.permute.xlu0 %1397  ;;  %2324 = vrot.lane.b32.xlu1 %v1871_v33, %s7339_s23  ;;  %v11112_v33 = vld [vmem:[#allocation8_spill] sm:$0xff] }
 0x1c5   : > { %v8401_v20 = vsel %vm1513_vm2, %v11109_v52, %v1398_v45  ;;  %v1999_v52 = vrot.slane %v1991_v51, %v8012_v60 }
 0x1c6   : > { %1710 = vrot.lane.b32.xlu0 %v8340_v4, %s7338_s18  ;;  %v1400_v18 = vpop.permute.xlu1 %1399 }
 0x1c7   : > { %v8407_v22 = vsel %vm1513_vm2, %v11110_v55, %v1400_v18 }
 0x1c8   : > { %v1418_v46 = vpop.permute.xlu0 %1417  ;;  %1712 = vrot.lane.b32.xlu1 %v8349_v2, %s7338_s18  ;;  %v2060_v2 = vcombine.low %v8401_v20, %v8407_v22 }
 0x1c9   : > { %v8413_v40 = vsel %vm1513_vm2, %v11111_v28, %v1418_v46  ;;  %v1992_v46 = vcombine.low %v8174_v36, %v8194_v21  ;;  %v544_v28 = vld [vmem:[%s8212_s22 + $0x48] sm:$0xff] }
 0x1ca   : > { %1714 = vrot.lane.b32.xlu0 %v8355_v44, %s7338_s18  ;;  %v1420_v24 = vpop.permute.xlu1 %1419  ;;  %578 = vst.msk [vmem:[#allocation2 + $0x81] sm:$0xff] %vm568_vm3, %v544_v28  ;;  %v564_v28 = vld [vmem:[%s8212_s22 + $0xe8] sm:$0xff] }
 0x1cb   : > { %v2006_v36 = vrot.slane %v1992_v46, %v8012_v60  ;;  %598 = vst.msk [vmem:[#allocation2 + $0x171] sm:$0xff] %vm568_vm3, %v564_v28  ;;  %v545_v28 = vld [vmem:[%s8212_s22 + $0x50] sm:$0xff] }
 0x1cc   : > { %v1438_v5 = vpop.permute.xlu0 %1437  ;;  %1716 = vrot.lane.b32.xlu1 %v8362_v50, %s7338_s18  ;;  %579 = vst.msk [vmem:[#allocation2 + $0x91] sm:$0xff] %vm568_vm3, %v545_v28 }
 0x1cd   : > { %v8429_v18 = vsel %vm1513_vm2, %v11113_v23, %v1438_v5  ;;  %v11115_v5 = vld [vmem:[#allocation5_spill] sm:$0xff]  ;;  %v2007_v29 = vcombine.low %v1999_v52, %v2006_v36  ;;  %v11119_v23 = vld [vmem:[#allocation10_spill] sm:$0xff]  ;;  %v563_v52 = vld [vmem:[%s8212_s22 + $0xe0] sm:$0xff] }
 0x1ce   : > { %2314 = vrot.lane.b32.xlu0 %v1786_v43, %s7339_s23  ;;  %v1440_v16 = vpop.permute.xlu1 %1439  ;;  %v11108_v43 = vld [vmem:[#allocation6_spill] sm:$0xff]  ;;  %597 = vst.msk [vmem:[#allocation2 + $0x169] sm:$0xff] %vm568_vm3, %v563_v52 }
 0x1cf   : > { %v8395_v1 = vsel %vm1513_vm2, %v11108_v43, %v1436_v32  ;;  %v8423_v32 = vsel %vm1513_vm2, %v11112_v33, %v1420_v24  ;;  %v11114_v24 = vld [vmem:[#allocation14_spill] sm:$0xff]  ;;  %v11116_v43 = vld [vmem:[#allocation9_spill] sm:$0xff] }
 0x1d0   : > { %v1442_v31 = vpop.permute.xlu0 %1441  ;;  %2316 = vrot.lane.b32.xlu1 %v1803_v38, %s7339_s23  ;;  %v8439_v14 = vsel %vm1513_vm2, %v11114_v24, %v1440_v16  ;;  %v556_v24 = vld [vmem:[%s8212_s22 + $0xa8] sm:$0xff]  ;;  %v549_v52 = vld [vmem:[%s8212_s22 + $0x70] sm:$0xff] }
 0x1d1   : > { %v8447_v34 = vsel %vm1513_vm2, %v11115_v5, %v1442_v31  ;;  %v543_v31 = vld [vmem:[%s8212_s22 + $0x40] sm:$0xff]  ;;  %590 = vst.msk [vmem:[#allocation2 + $0x111] sm:$0xff] %vm568_vm3, %v556_v24  ;;  %v2178_v24 = vcombine.low %v8413_v40, %v8423_v32  ;;  %583 = vst.msk [vmem:[#allocation2 + $0xc1] sm:$0xff] %vm568_vm3, %v549_v52 }
 0x1d2   : > { %1734 = vrot.lane.b32.xlu0 %v8377_v63, %s7338_s18  ;;  %v1444_v11 = vpop.permute.xlu1 %1443  ;;  %577 = vst.msk [vmem:[#allocation2 + $0x79] sm:$0xff] %vm568_vm3, %v543_v31  ;;  %v551_v5 = vld [vmem:[%s8212_s22 + $0x80] sm:$0xff] }
 0x1d3   : > { %v8456_v16 = vsel %vm1513_vm2, %v11116_v43, %v1444_v11  ;;  %585 = vst.msk [vmem:[#allocation2 + $0xd9] sm:$0xff] %vm568_vm3, %v551_v5 }
 0x1d4   : > { %v1422_v26 = vpop.permute.xlu0 %1421  ;;  %1736 = vrot.lane.b32.xlu1 %v8383_v42, %s7338_s18 }
 0x1d5   : > { %v8481_v51 = vsel %vm1513_vm2, %v11117_v54, %v1422_v26  ;;  %v2059_v54 = vcombine.low %v8355_v44, %v8362_v50  ;;  %v2074_v44 = vrot.slane %v2060_v2, %v8012_v60 }
 0x1d6   : > { %1754 = vrot.lane.b32.xlu0 %v8389_v56, %s7338_s18  ;;  %v1424_v62 = vpop.permute.xlu1 %1423 }
 0x1d8   : > { %v1426_v13 = vpop.permute.xlu0 %1425  ;;  %1756 = vrot.lane.b32.xlu1 %v8395_v1, %s7338_s18 }
 0x1d9   : > { %v8497_v33 = vsel %vm1513_vm2, %v7738_v27, %v1426_v13  ;;  %v555_v13 = vld [vmem:[%s8212_s22 + $0xa0] sm:$0xff] }
 0x1da   : > { %1718 = vrot.lane.b32.xlu0 %v8401_v20, %s7338_s18  ;;  %v1428_v59 = vpop.permute.xlu1 %1427  ;;  %589 = vst.msk [vmem:[#allocation2 + $0x109] sm:$0xff] %vm568_vm3, %v555_v13  ;;  %v2247_v20 = vcombine.low %v8429_v18, %v8439_v14 }
 0x1db   : > { %v8505_v46 = vsel %vm1513_vm2, %v11119_v23, %v1428_v59  ;;  %v2128_v59 = vcombine.low %v8377_v63, %v8383_v42  ;;  %v11122_v63 = vld [vmem:[#allocation23_spill] sm:$0xff] }
 0x1dc   : > { %v1446_v19 = vpop.permute.xlu0 %1445  ;;  %1720 = vrot.lane.b32.xlu1 %v8407_v22, %s7338_s18 }
 0x1dd   : > { %v1576_v9 = vsel %vm1513_vm2, %v11120_v0, %v1446_v19  ;;  %v2127_v19 = vcombine.low %v8316_v49, %v8323_v12  ;;  %v2142_v4 = vrot.slane %v2128_v59, %v8012_v60  ;;  %v2057_v49 = vrot.slane %v2043_v25, %v8012_v60  ;;  %v538_v25 = vld [vmem:[%s8212_s22 + $0x18] sm:$0xff] }
 0x1de   : > { %1738 = vrot.lane.b32.xlu0 %v8413_v40, %s7338_s18  ;;  %v1448_v39 = vpop.permute.xlu1 %1447  ;;  %v2195_v40 = vcombine.low %v8497_v33, %v8505_v46  ;;  %572 = vst.msk [vmem:[#allocation2 + $0x39] sm:$0xff] %vm568_vm3, %v538_v25 }
 0x1e0   : > { %v1430_v45 = vpop.permute.xlu0 %1429  ;;  %1740 = vrot.lane.b32.xlu1 %v8423_v32, %s7338_s18 }
 0x1e1   : > { %v1568_v42 = vsel %vm1513_vm2, %v11122_v63, %v1430_v45  ;;  %v559_v45 = vld [vmem:[%s8212_s22 + $0xc0] sm:$0xff] }
 0x1e2   : > { %1758 = vrot.lane.b32.xlu0 %v8429_v18, %s7338_s18  ;;  %v8435_v47 = vpop.permute.xlu1 %1431  ;;  %593 = vst.msk [vmem:[#allocation2 + $0x139] sm:$0xff] %vm568_vm3, %v559_v45 }
 0x1e3   : > { %v1569_v12 = vsel %vm1513_vm2, %v8006_v37, %v8435_v47  ;;  %v2050_v37 = vrot.slane %v2042_v57, %v8012_v60  ;;  %v2246_v47 = vcombine.low %v8389_v56, %v8395_v1  ;;  %v2067_v57 = vrot.slane %v2059_v54, %v8012_v60 }
 0x1e4   : > { %v8441_v38 = vpop.permute.xlu0 %1658  ;;  %1760 = vrot.lane.b32.xlu1 %v8439_v14, %s7338_s18  ;;  %v2261_v56 = vrot.slane %v2247_v20, %v8012_v60  ;;  %v2263_v1 = vcombine.low %v8447_v34, %v8456_v16  ;;  %v2196_v0 = vcombine.low %v1568_v42, %v1569_v12 }
 0x1e5   : > { %v2058_v8 = vcombine.low %v2050_v37, %v2057_v49  ;;  %v2254_v17 = vrot.slane %v2246_v47, %v8012_v60 }
 0x1e6   : > { %1762 = vrot.lane.b32.xlu0 %v8447_v34, %s7338_s18  ;;  %v8452_v21 = vpop.permute.xlu1 %1660 }
 0x1e7   : > { %v1872_v59 = vcombine.low %v8441_v38, %v8452_v21  ;;  %v2203_v38 = vrot.slane %v2195_v40, %v8012_v60  ;;  %v557_v40 = vld [vmem:[%s8212_s22 + $0xb0] sm:$0xff] }
 0x1e8   : > { %v8462_v55 = vpop.permute.xlu0 %1642  ;;  %1764 = vrot.lane.b32.xlu1 %v8456_v16, %s7338_s18  ;;  %591 = vst.msk [vmem:[#allocation2 + $0x121] sm:$0xff] %vm568_vm3, %v557_v40 }
 0x1ea   : > { %2338 = vrot.lane.b32.xlu0 %v1990_v53, %s7339_s23  ;;  %v8472_v11 = vpop.permute.xlu1 %1644  ;;  %v8489_v53 = vsel %vm1513_vm2, %v11118_v41, %v1424_v62  ;;  %v560_v41 = vld [vmem:[%s8212_s22 + $0xc8] sm:$0xff] }
 0x1eb   : > { %594 = vst.msk [vmem:[#allocation2 + $0x141] sm:$0xff] %vm568_vm3, %v560_v41  ;;  %v2179_v14 = vcombine.low %v8481_v51, %v8489_v53  ;;  %v1804_v2 = vcombine.low %v8462_v55, %v8472_v11 }
 0x1ec   : > { %v8476_v30 = vpop.permute.xlu0 %1662  ;;  %2340 = vrot.lane.b32.xlu1 %v2007_v29, %s7339_s23  ;;  %v2135_v29 = vrot.slane %v2127_v19, %v8012_v60 }
 0x1ed   : > { %v1812_v55 = vrot.slane %v1804_v2, %v8012_v60 }
 0x1ee   : > { %1742 = vrot.lane.b32.xlu0 %v8481_v51, %s7338_s18  ;;  %v8485_v3 = vpop.permute.xlu1 %1664  ;;  %v2143_v23 = vcombine.low %v2135_v29, %v2142_v4  ;;  %v537_v51 = vld [vmem:[%s8212_s22 + $0x10] sm:$0xff] }
 0x1ef   : > { %v1873_v16 = vcombine.low %v8476_v30, %v8485_v3  ;;  %571 = vst.msk [vmem:[#allocation2 + $0x31] sm:$0xff] %vm568_vm3, %v537_v51  ;;  %v2186_v30 = vrot.slane %v2178_v24, %v8012_v60 }
 0x1f0   : > { %v8491_v6 = vpop.permute.xlu0 %1666  ;;  %1744 = vrot.lane.b32.xlu1 %v8489_v53, %s7338_s18  ;;  %v2262_v53 = vcombine.low %v2254_v17, %v2261_v56 }
 0x1f2   : > { %1746 = vrot.lane.b32.xlu0 %v8497_v33, %s7338_s18  ;;  %v8501_v26 = vpop.permute.xlu1 %1668 }
 0x1f3   : > { %v1889_v21 = vcombine.low %v8491_v6, %v8501_v26 }
 0x1f4   : > { %v8507_v62 = vpop.permute.xlu0 %1646  ;;  %1748 = vrot.lane.b32.xlu1 %v8505_v46, %s7338_s18  ;;  %v1887_v46 = vrot.slane %v1873_v16, %v8012_v60 }
 0x1f6   : > { %2330 = vrot.lane.b32.xlu0 %v1922_v48, %s7339_s23  ;;  %v8515_v27 = vpop.permute.xlu1 %1648  ;;  %v552_v48 = vld [vmem:[%s8212_s22 + $0x88] sm:$0xff] }
 0x1f7   : > { %586 = vst.msk [vmem:[#allocation2 + $0xe1] sm:$0xff] %vm568_vm3, %v552_v48  ;;  %v2193_v48 = vrot.slane %v2179_v14, %v8012_v60  ;;  %v1805_v63 = vcombine.low %v8507_v62, %v8515_v27  ;;  %v1897_v62 = vrot.slane %v1889_v21, %v8012_v60 }
 0x1f8   : > { %v8520_v36 = vpop.permute.xlu0 %1650  ;;  %2332 = vrot.lane.b32.xlu1 %v1939_v15, %s7339_s23  ;;  %v1577_v15 = vsel %vm1513_vm2, %v11121_v61, %v1448_v39  ;;  %v2210_v61 = vrot.slane %v2196_v0, %v8012_v60  ;;  %vm6056_vm2 = vcmask 293888  }
 0x1f9   : > { %v2264_v50 = vcombine.low %v1576_v9, %v1577_v15  ;;  %v2194_v19 = vcombine.low %v2186_v30, %v2193_v48  ;;  %v1819_v27 = vrot.slane %v1805_v63, %v8012_v60 }
 0x1fa   : > { %1766 = vrot.lane.b32.xlu0 %v1576_v9, %s7338_s18  ;;  %v8535_v43 = vpop.permute.xlu1 %1652  ;;  %v2271_v9 = vrot.slane %v2263_v1, %v8012_v60  ;;  %v2211_v4 = vcombine.low %v2203_v38, %v2210_v61 }
 0x1fb   : > { %v2278_v5 = vrot.slane %v2264_v50, %v8012_v60  ;;  %v1820_v47 = vcombine.low %v1812_v55, %v1819_v27 }
 0x1fc   : > { %v8545_v31 = vpop.permute.xlu0 %1670  ;;  %1768 = vrot.lane.b32.xlu1 %v1577_v15, %s7338_s18 }
 0x1fd   : > { %v2279_v3 = vcombine.low %v2271_v9, %v2278_v5 }
 0x1fe   : > { %1750 = vrot.lane.b32.xlu0 %v1568_v42, %s7338_s18  ;;  %v8556_v39 = vpop.permute.xlu1 %1672 }
 0x1ff   : > { %v1890_v15 = vcombine.low %v8545_v31, %v8556_v39  ;;  %v1880_v31 = vrot.slane %v1872_v59, %v8012_v60 }
 0x200   : > { %v8569_v22 = vpop.permute.xlu0 %1690  ;;  %1752 = vrot.lane.b32.xlu1 %v1569_v12, %s7338_s18  ;;  %v1821_v12 = vcombine.low %v8520_v36, %v8535_v43  ;;  %s7344_s18 = smov 56  }
 0x201   : > { %v1904_v39 = vrot.slane %v1890_v15, %v8012_v60  ;;  %v1888_v26 = vcombine.low %v1880_v31, %v1887_v46 }
 0x202   : > { %2354 = vrot.lane.b32.xlu0 %v2126_v10, %s7339_s23  ;;  %v8585_v18 = vpop.permute.xlu1 %1692  ;;  %v2075_v10 = vcombine.low %v2067_v57, %v2074_v44  ;;  %v1829_v41 = vrot.slane %v1821_v12, %v8012_v60  ;;  %v550_v44 = vld [vmem:[%s8212_s22 + $0x78] sm:$0xff] }
 0x203   : > { %v1905_v11 = vcombine.low %v1897_v62, %v1904_v39  ;;  %v2008_v54 = vcombine.low %v8569_v22, %v8585_v18  ;;  %584 = vst.msk [vmem:[#allocation2 + $0xc9] sm:$0xff] %vm568_vm3, %v550_v44  ;;  %v553_v39 = vld [vmem:[%s8212_s22 + $0x90] sm:$0xff] }
 0x204   : > { %v1655_v13 = vpop.permute.xlu0 %1654  ;;  %2356 = vrot.lane.b32.xlu1 %v2143_v23, %s7339_s23  ;;  %587 = vst.msk [vmem:[#allocation2 + $0xf1] sm:$0xff] %vm568_vm3, %v553_v39 }
 0x205   : > { %v2016_v50 = vrot.slane %v2008_v54, %v8012_v60 }
 0x206   : > { %2346 = vrot.lane.b32.xlu0 %v2058_v8, %s7339_s23  ;;  %v1657_v34 = vpop.permute.xlu1 %1656 }
 0x207   : > { %v1822_v49 = vcombine.low %v1655_v13, %v1657_v34 }
 0x208   : > { %v1675_v32 = vpop.permute.xlu0 %1674  ;;  %2348 = vrot.lane.b32.xlu1 %v2075_v10, %s7339_s23  ;;  %v546_v10 = vld [vmem:[%s8212_s22 + $0x58] sm:$0xff] }
 0x209   : > { %v1836_v20 = vrot.slane %v1822_v49, %v8012_v60  ;;  %580 = vst.msk [vmem:[#allocation2 + $0x99] sm:$0xff] %vm568_vm3, %v546_v10 }
 0x20a   : > { %2370 = vrot.lane.b32.xlu0 %v2262_v53, %s7339_s23  ;;  %v1677_v33 = vpop.permute.xlu1 %1676 }
 0x20b   : > { %v1940_v23 = vcombine.low %v1675_v32, %v1677_v33  ;;  %v1837_v8 = vcombine.low %v1829_v41, %v1836_v20 }
 0x20c   : > { %v1695_v42 = vpop.permute.xlu0 %1694  ;;  %2372 = vrot.lane.b32.xlu1 %v2279_v3, %s7339_s23 }
 0x20d   : > { %v1948_v56 = vrot.slane %v1940_v23, %v8012_v60 }
 0x20e   : > { %2362 = vrot.lane.b32.xlu0 %v2194_v19, %s7339_s23  ;;  %v1697_v6 = vpop.permute.xlu1 %1696 }
 0x20f   : > { %v2009_v45 = vcombine.low %v1695_v42, %v1697_v6 }
 0x210   : > { %v1699_v29 = vpop.permute.xlu0 %1698  ;;  %2364 = vrot.lane.b32.xlu1 %v2211_v4, %s7339_s23 }
 0x211   : > { %v2023_v36 = vrot.slane %v2009_v45, %v8012_v60 }
 0x212   : > { %2326 = vrot.lane.b32.xlu0 %v1888_v26, %s7339_s23  ;;  %v1701_v37 = vpop.permute.xlu1 %1700 }
 0x213   : > { %v2024_v58 = vcombine.low %v2016_v50, %v2023_v36  ;;  %v2025_v35 = vcombine.low %v1699_v29, %v1701_v37  ;;  %v558_v29 = vld [vmem:[%s8212_s22 + $0xb8] sm:$0xff] }
 0x214   : > { %v1679_v43 = vpop.permute.xlu0 %1678  ;;  %2328 = vrot.lane.b32.xlu1 %v1905_v11, %s7339_s23  ;;  %592 = vst.msk [vmem:[#allocation2 + $0x129] sm:$0xff] %vm568_vm3, %v558_v29 }
 0x215   : > { %v2033_v34 = vrot.slane %v2025_v35, %v8012_v60 }
 0x216   : > { %2318 = vrot.lane.b32.xlu0 %v1820_v47, %s7339_s23  ;;  %v1681_v22 = vpop.permute.xlu1 %1680 }
 0x217   : > { %v1941_v18 = vcombine.low %v1679_v43, %v1681_v22 }
 0x218   : > { %v1683_v57 = vpop.permute.xlu0 %1682  ;;  %2320 = vrot.lane.b32.xlu1 %v1837_v8, %s7339_s23 }
 0x219   : > { %v1955_v1 = vrot.slane %v1941_v18, %v8012_v60 }
 0x21a   : > { %2342 = vrot.lane.b32.xlu0 %v2024_v58, %s7339_s23  ;;  %v1685_v14 = vpop.permute.xlu1 %1684 }
 0x21b   : > { %v1956_v13 = vcombine.low %v1948_v56, %v1955_v1  ;;  %v1957_v48 = vcombine.low %v1683_v57, %v1685_v14 }
 0x21c   : > { %v1703_v17 = vpop.permute.xlu0 %1702 }
 0x21d   : > { %v1965_v30 = vrot.slane %v1957_v48, %v8012_v60 }
 0x21e   : > { %2334 = vrot.lane.b32.xlu0 %v1956_v13, %s7339_s23  ;;  %v1705_v24 = vpop.permute.xlu1 %1704 }
 0x21f   : > { %v2026_v5 = vcombine.low %v1703_v17, %v1705_v24 }
 0x220   : > { %v1723_v0 = vpop.permute.xlu0 %1722 }
 0x221   : > { %v2040_v16 = vrot.slane %v2026_v5, %v8012_v60 }
 0x222   : > { %v1725_v51 = vpop.permute.xlu1 %1724 }
 0x223   : > { %v2041_v53 = vcombine.low %v2033_v34, %v2040_v16  ;;  %v2144_v46 = vcombine.low %v1723_v0, %v1725_v51  ;;  %v554_v34 = vld [vmem:[%s8212_s22 + $0x98] sm:$0xff]  ;;  %v565_v16 = vld [vmem:[%s8212_s22 + $0xf0] sm:$0xff] }
 0x224   : > { %v1687_v9 = vpop.permute.xlu0 %1686  ;;  %588 = vst.msk [vmem:[#allocation2 + $0xf9] sm:$0xff] %vm568_vm3, %v554_v34  ;;  %599 = vst.msk [vmem:[#allocation2 + $0x181] sm:$0xff] %vm568_vm3, %v565_v16 }
 0x225   : > { %2344 = vrot.lane.b32.xlu1 %v2041_v53, %s7339_s23  ;;  %v2152_v21 = vrot.slane %v2144_v46, %v8012_v60 }
 0x226   : > { %v1689_v32 = vpop.permute.xlu1 %1688 }
 0x227   : > { %v1958_v59 = vcombine.low %v1687_v9, %v1689_v32 }
 0x228   : > { %v1707_v25 = vpop.permute.xlu0 %1706 }
 0x229   : > { %v1972_v3 = vrot.slane %v1958_v59, %v8012_v60 }
 0x22a   : > { %v1709_v61 = vpop.permute.xlu1 %1708 }
 0x22b   : > { %v1973_v15 = vcombine.low %v1965_v30, %v1972_v3  ;;  %v2076_v55 = vcombine.low %v1707_v25, %v1709_v61 }
 0x22c   : > { %v1727_v33 = vpop.permute.xlu0 %1726 }
 0x22d   : > { %2336 = vrot.lane.b32.xlu1 %v1973_v15, %s7339_s23  ;;  %v2084_v37 = vrot.slane %v2076_v55, %v8012_v60 }
 0x22e   : > { %v1729_v52 = vpop.permute.xlu1 %1728 }
 0x22f   : > { %v2145_v19 = vcombine.low %v1727_v33, %v1729_v52 }
 0x230   : > { %v1731_v38 = vpop.permute.xlu0 %1730 }
 0x231   : > { %v2159_v63 = vrot.slane %v2145_v19, %v8012_v60 }
 0x232   : > { %v1733_v42 = vpop.permute.xlu1 %1732 }
 0x233   : > { %v2160_v31 = vcombine.low %v2152_v21, %v2159_v63  ;;  %v2161_v47 = vcombine.low %v1731_v38, %v1733_v42 }
 0x234   : > { %v2323_v28 = vpop.permute.xlu0 %2322 }
 0x235   : > { %2415 = vst.msk [vmem:[#allocation2 + $0x49] sm:$0xff] %vm2410_vm4, %v2323_v28  ;;  %2358 = vrot.lane.b32.xlu0 %v2160_v31, %s7339_s23  ;;  %v2169_v44 = vrot.slane %v2161_v47, %v8012_v60  ;;  %v561_v31 = vld [vmem:[%s8212_s22 + $0xd0] sm:$0xff] }
 0x236   : > { %v2325_v4 = vpop.permute.xlu1 %2324  ;;  %595 = vst.msk [vmem:[#allocation2 + $0x151] sm:$0xff] %vm568_vm3, %v561_v31 }
 0x237   : > { %2416 = vst.msk [vmem:[#allocation2 + $0x51] sm:$0xff] %vm2410_vm4, %v2325_v4 }
 0x238   : > { %v1711_v2 = vpop.permute.xlu0 %1710 }
 0x23a   : > { %v1713_v49 = vpop.permute.xlu1 %1712 }
 0x23b   : > { %v2077_v27 = vcombine.low %v1711_v2, %v1713_v49 }
 0x23c   : > { %v8677_v6 = vpop.permute.xlu0 %1714  ;;  %v2481_v26 = vld [vmem:[#allocation2 + $0x49] sm:$0xff] }
 0x23d   : > { %2776 = vrot.lane.b32.xlu0 %v2481_v26, %s7333_s13  ;;  %v2543_v45 = vld [vmem:[#allocation2 + $0x48] sm:$0xff]  ;;  %v2091_v54 = vrot.slane %v2077_v27, %v8012_v60 }
 0x23e   : > { %v8680_v62 = vpop.permute.xlu1 %1716  ;;  %v2482_v14 = vld [vmem:[#allocation2 + $0x51] sm:$0xff] }
 0x23f   : > { %v2092_v36 = vcombine.low %v2084_v37, %v2091_v54  ;;  %v2514_v35 = vld [vmem:[#allocation2 + $0x52] sm:$0xff]  ;;  %v2513_v5 = vld [vmem:[#allocation2 + $0x4a] sm:$0xff]  ;;  %v2093_v48 = vcombine.low %v8677_v6, %v8680_v62 }
 0x240   : > { %v2315_v12 = vpop.permute.xlu0 %2314  ;;  %v2544_v0 = vld [vmem:[#allocation2 + $0x50] sm:$0xff] }
 0x241   : > { %2411 = vst.msk [vmem:[#allocation2 + $0x19] sm:$0xff] %vm2410_vm4, %v2315_v12  ;;  %3028 = vrot.lane.b32.xlu0 %v2543_v45, %s7340_s24  ;;  %v2101_v3 = vrot.slane %v2093_v48, %v8012_v60  ;;  %v566_v12 = vld [vmem:[%s8212_s22 + $0xf8] sm:$0xff] }
 0x242   : > { %v2317_v11 = vpop.permute.xlu1 %2316  ;;  %600 = vst.msk [vmem:[#allocation2 + $0x189] sm:$0xff] %vm568_vm3, %v566_v12 }
 0x243   : > { %2412 = vst.msk [vmem:[#allocation2 + $0x21] sm:$0xff] %vm2410_vm4, %v2317_v11 }
 0x244   : > { %v1735_v20 = vpop.permute.xlu0 %1734 }
 0x245   : > { %3156 = vrot.lane.b32.xlu0 %v2481_v26, %s7341_s25 }
 0x246   : > { %v1737_v41 = vpop.permute.xlu1 %1736 }
 0x247   : > { %v2162_v43 = vcombine.low %v1735_v20, %v1737_v41 }
 0x248   : > { %v1755_v23 = vpop.permute.xlu0 %1754  ;;  %v2477_v58 = vld [vmem:[#allocation2 + $0x19] sm:$0xff] }
 0x249   : > { %v2176_v50 = vrot.slane %v2162_v43, %v8012_v60  ;;  %2350 = vrot.lane.b32.xlu0 %v2092_v36, %s7339_s23  ;;  %v2539_v1 = vld [vmem:[#allocation2 + $0x18] sm:$0xff] }
 0x24a   : > { %v1757_v8 = vpop.permute.xlu1 %1756  ;;  %v2509_v30 = vld [vmem:[#allocation2 + $0x1a] sm:$0xff]  ;;  %v2510_v2 = vld [vmem:[#allocation2 + $0x22] sm:$0xff] }
 0x24b   : > { %v2177_v22 = vcombine.low %v2169_v44, %v2176_v50  ;;  %v2280_v61 = vcombine.low %v1755_v23, %v1757_v8  ;;  %v2478_v42 = vld [vmem:[#allocation2 + $0x21] sm:$0xff] }
 0x24c   : > { %v1719_v18 = vpop.permute.xlu0 %1718  ;;  %v2540_v62 = vld [vmem:[#allocation2 + $0x20] sm:$0xff] }
 0x24d   : > { %2768 = vrot.lane.b32.xlu0 %v2477_v58, %s7333_s13  ;;  %2360 = vrot.lane.b32.xlu1 %v2177_v22, %s7339_s23  ;;  %v2288_v19 = vrot.slane %v2280_v61, %v8012_v60 }
 0x24e   : > { %v1721_v57 = vpop.permute.xlu1 %1720 }
 0x24f   : > { %v2094_v53 = vcombine.low %v1719_v18, %v1721_v57 }
 0x250   : > { %v8695_v56 = vpop.permute.xlu0 %1738 }
 0x251   : > { %3020 = vrot.lane.b32.xlu0 %v2539_v1, %s7340_s24  ;;  %2778 = vrot.lane.b32.xlu1 %v2482_v14, %s7333_s13  ;;  %v2108_v32 = vrot.slane %v2094_v53, %v8012_v60 }
 0x252   : > { %v8699_v13 = vpop.permute.xlu1 %1740 }
 0x253   : > { %v2109_v33 = vcombine.low %v2101_v3, %v2108_v32  ;;  %v2212_v45 = vcombine.low %v8695_v56, %v8699_v13 }
 0x254   : > { %v1759_v17 = vpop.permute.xlu0 %1758 }
 0x255   : > { %3148 = vrot.lane.b32.xlu0 %v2477_v58, %s7341_s25  ;;  %2906 = vrot.lane.b32.xlu1 %v2514_v35, %s7334_s14  ;;  %v2220_v20 = vrot.slane %v2212_v45, %v8012_v60 }
 0x256   : > { %v1761_v10 = vpop.permute.xlu1 %1760 }
 0x257   : > { %v2281_v59 = vcombine.low %v1759_v17, %v1761_v10 }
 0x258   : > { %v8703_v24 = vpop.permute.xlu0 %1762 }
 0x259   : > { %2904 = vrot.lane.b32.xlu0 %v2513_v5, %s7334_s14  ;;  %3030 = vrot.lane.b32.xlu1 %v2544_v0, %s7340_s24  ;;  %v2295_v46 = vrot.slane %v2281_v59, %v8012_v60 }
 0x25a   : > { %v8710_v51 = vpop.permute.xlu1 %1764 }
 0x25b   : > { %v2296_v21 = vcombine.low %v2288_v19, %v2295_v46  ;;  %v2297_v37 = vcombine.low %v8703_v24, %v8710_v51 }
 0x25c   : > { %v2339_v9 = vpop.permute.xlu0 %2338 }
 0x25d   : > { %2423 = vst.msk [vmem:[#allocation2 + $0xa9] sm:$0xff] %vm2410_vm4, %v2339_v9  ;;  %3284 = vrot.lane.b32.xlu0 %v2513_v5, %s7342_s26  ;;  %3158 = vrot.lane.b32.xlu1 %v2482_v14, %s7341_s25  ;;  %v2305_v23 = vrot.slane %v2297_v37, %v8012_v60 }
 0x25e   : > { %v2341_v40 = vpop.permute.xlu1 %2340 }
 0x25f   : > { %2424 = vst.msk [vmem:[#allocation2 + $0xb1] sm:$0xff] %vm2410_vm4, %v2341_v40 }
 0x260   : > { %v1743_v25 = vpop.permute.xlu0 %1742 }
 0x261   : > { %2896 = vrot.lane.b32.xlu0 %v2509_v30, %s7334_s14  ;;  %3286 = vrot.lane.b32.xlu1 %v2514_v35, %s7342_s26  ;;  %v562_v35 = vld [vmem:[%s8212_s22 + $0xd8] sm:$0xff] }
 0x262   : > { %v1745_v15 = vpop.permute.xlu1 %1744  ;;  %596 = vst.msk [vmem:[#allocation2 + $0x159] sm:$0xff] %vm568_vm3, %v562_v35 }
 0x263   : > { %v2213_v6 = vcombine.low %v1743_v25, %v1745_v15 }
 0x264   : > { %v8724_v52 = vpop.permute.xlu0 %1746  ;;  %v2489_v39 = vld [vmem:[#allocation2 + $0xa9] sm:$0xff] }
 0x265   : > { %3276 = vrot.lane.b32.xlu0 %v2509_v30, %s7342_s26  ;;  %2352 = vrot.lane.b32.xlu1 %v2109_v33, %s7339_s23  ;;  %v2551_v27 = vld [vmem:[#allocation2 + $0xa8] sm:$0xff]  ;;  %v2227_v55 = vrot.slane %v2213_v6, %v8012_v60 }
 0x266   : > { %v8729_v38 = vpop.permute.xlu1 %1748  ;;  %v2490_v56 = vld [vmem:[#allocation2 + $0xb1] sm:$0xff] }
 0x267   : > { %v2228_v41 = vcombine.low %v2220_v20, %v2227_v55  ;;  %v2522_v13 = vld [vmem:[#allocation2 + $0xb2] sm:$0xff]  ;;  %v2521_v24 = vld [vmem:[#allocation2 + $0xaa] sm:$0xff]  ;;  %v2229_v51 = vcombine.low %v8724_v52, %v8729_v38 }
 0x268   : > { %v2331_v63 = vpop.permute.xlu0 %2330  ;;  %v2552_v5 = vld [vmem:[#allocation2 + $0xb0] sm:$0xff] }
 0x269   : > { %2419 = vst.msk [vmem:[#allocation2 + $0x79] sm:$0xff] %vm2410_vm4, %v2331_v63  ;;  %2770 = vrot.lane.b32.xlu1 %v2478_v42, %s7333_s13  ;;  %2374 = vrot.lane.b32.xlu0 %v2296_v21, %s7339_s23  ;;  %v2237_v40 = vrot.slane %v2229_v51, %v8012_v60 }
 0x26a   : > { %v2333_v28 = vpop.permute.xlu1 %2332 }
 0x26b   : > { %2420 = vst.msk [vmem:[#allocation2 + $0x81] sm:$0xff] %vm2410_vm4, %v2333_v28 }
 0x26c   : > { %v1767_v4 = vpop.permute.xlu0 %1766 }
 0x26d   : > { %2898 = vrot.lane.b32.xlu1 %v2510_v2, %s7334_s14  ;;  %2792 = vrot.lane.b32.xlu0 %v2489_v39, %s7333_s13 }
 0x26e   : > { %v1769_v49 = vpop.permute.xlu1 %1768 }
 0x26f   : > { %v2298_v11 = vcombine.low %v1767_v4, %v1769_v49 }
 0x270   : > { %v8739_v26 = vpop.permute.xlu0 %1750  ;;  %v2485_v22 = vld [vmem:[#allocation2 + $0x79] sm:$0xff] }
 0x271   : > { %3022 = vrot.lane.b32.xlu1 %v2540_v62, %s7340_s24  ;;  %3044 = vrot.lane.b32.xlu0 %v2551_v27, %s7340_s24  ;;  %v2312_v36 = vrot.slane %v2298_v11, %v8012_v60  ;;  %v2547_v57 = vld [vmem:[#allocation2 + $0x78] sm:$0xff] }
 0x272   : > { %v1753_v29 = vpop.permute.xlu1 %1752  ;;  %v2517_v48 = vld [vmem:[#allocation2 + $0x7a] sm:$0xff]  ;;  %v2518_v3 = vld [vmem:[#allocation2 + $0x82] sm:$0xff] }
 0x273   : > { %v2313_v50 = vcombine.low %v2305_v23, %v2312_v36  ;;  %v2230_v34 = vcombine.low %v8739_v26, %v1753_v29  ;;  %v2486_v30 = vld [vmem:[#allocation2 + $0x81] sm:$0xff] }
 0x274   : > { %v2355_v54 = vpop.permute.xlu0 %2354  ;;  %v8798_v15 = vld [vmem:[#allocation2 + $0x80] sm:$0xff] }
 0x275   : > { %2431 = vst.msk [vmem:[#allocation2 + $0x109] sm:$0xff] %vm2410_vm4, %v2355_v54  ;;  %3150 = vrot.lane.b32.xlu1 %v2478_v42, %s7341_s25  ;;  %3172 = vrot.lane.b32.xlu0 %v2489_v39, %s7341_s25  ;;  %v2244_v53 = vrot.slane %v2230_v34, %v8012_v60 }
 0x276   : > { %v2357_v47 = vpop.permute.xlu1 %2356 }
 0x277   : > { %2432 = vst.msk [vmem:[#allocation2 + $0x111] sm:$0xff] %vm2410_vm4, %v2357_v47  ;;  %v2245_v32 = vcombine.low %v2237_v40, %v2244_v53 }
 0x278   : > { %v2347_v43 = vpop.permute.xlu0 %2346 }
 0x279   : > { %2427 = vst.msk [vmem:[#allocation2 + $0xd9] sm:$0xff] %vm2410_vm4, %v2347_v43  ;;  %3278 = vrot.lane.b32.xlu1 %v2510_v2, %s7342_s26  ;;  %2366 = vrot.lane.b32.xlu0 %v2228_v41, %s7339_s23 }
 0x27a   : > { %v2349_v44 = vpop.permute.xlu1 %2348 }
 0x27b   : > { %2428 = vst.msk [vmem:[#allocation2 + $0xe1] sm:$0xff] %vm2410_vm4, %v2349_v44 }
 0x27c   : > { %v2371_v8 = vpop.permute.xlu0 %2370  ;;  %v2497_v25 = vld [vmem:[#allocation2 + $0x109] sm:$0xff] }
 0x27d   : > { %2439 = vst.msk [vmem:[#allocation2 + $0x169] sm:$0xff] %vm2410_vm4, %v2371_v8  ;;  %2784 = vrot.lane.b32.xlu0 %v2485_v22, %s7333_s13  ;;  %2376 = vrot.lane.b32.xlu1 %v2313_v50, %s7339_s23  ;;  %v2559_v60 = vld [vmem:[#allocation2 + $0x108] sm:$0xff] }
 0x27e   : > { %v2373_v18 = vpop.permute.xlu1 %2372  ;;  %v2498_v19 = vld [vmem:[#allocation2 + $0x111] sm:$0xff] }
 0x27f   : > { %2440 = vst.msk [vmem:[#allocation2 + $0x171] sm:$0xff] %vm2410_vm4, %v2373_v18  ;;  %v8815_v21 = vld [vmem:[#allocation2 + $0x10a] sm:$0xff]  ;;  %v8817_v63 = vld [vmem:[#allocation2 + $0x112] sm:$0xff] }
 0x280   : > { %v2363_v58 = vpop.permute.xlu0 %2362  ;;  %v2493_v33 = vld [vmem:[#allocation2 + $0xd9] sm:$0xff]  ;;  %v2560_v31 = vld [vmem:[#allocation2 + $0x110] sm:$0xff] }
 0x281   : > { %2435 = vst.msk [vmem:[#allocation2 + $0x139] sm:$0xff] %vm2410_vm4, %v2363_v58  ;;  %3036 = vrot.lane.b32.xlu0 %v2547_v57, %s7340_s24  ;;  %2794 = vrot.lane.b32.xlu1 %v2490_v56, %s7333_s13  ;;  %v8806_v52 = vld [vmem:[#allocation2 + $0xd8] sm:$0xff] }
 0x282   : > { %v2365_v1 = vpop.permute.xlu1 %2364  ;;  %v2525_v28 = vld [vmem:[#allocation2 + $0xda] sm:$0xff]  ;;  %v2526_v27 = vld [vmem:[#allocation2 + $0xe2] sm:$0xff] }
 0x283   : > { %2436 = vst.msk [vmem:[#allocation2 + $0x141] sm:$0xff] %vm2410_vm4, %v2365_v1  ;;  %v2494_v49 = vld [vmem:[#allocation2 + $0xe1] sm:$0xff] }
 0x284   : > { %v2327_v14 = vpop.permute.xlu0 %2326  ;;  %v2505_v39 = vld [vmem:[#allocation2 + $0x169] sm:$0xff]  ;;  %v8843_v29 = vld [vmem:[#allocation2 + $0xe0] sm:$0xff] }
 0x285   : > { %2417 = vst.msk [vmem:[#allocation2 + $0x61] sm:$0xff] %vm2410_vm4, %v2327_v14  ;;  %3164 = vrot.lane.b32.xlu0 %v2485_v22, %s7341_s25  ;;  %2922 = vrot.lane.b32.xlu1 %v2522_v13, %s7334_s14  ;;  %v2567_v62 = vld [vmem:[#allocation2 + $0x168] sm:$0xff] }
 0x286   : > { %v2329_v17 = vpop.permute.xlu1 %2328  ;;  %v2506_v43 = vld [vmem:[#allocation2 + $0x171] sm:$0xff] }
 0x287   : > { %2418 = vst.msk [vmem:[#allocation2 + $0x69] sm:$0xff] %vm2410_vm4, %v2329_v17  ;;  %v8870_v50 = vld [vmem:[#allocation2 + $0x16a] sm:$0xff]  ;;  %v8872_v8 = vld [vmem:[#allocation2 + $0x172] sm:$0xff] }
 0x288   : > { %v2319_v10 = vpop.permute.xlu0 %2318  ;;  %v2501_v54 = vld [vmem:[#allocation2 + $0x139] sm:$0xff]  ;;  %v2568_v58 = vld [vmem:[#allocation2 + $0x170] sm:$0xff] }
 0x289   : > { %2413 = vst.msk [vmem:[#allocation2 + $0x31] sm:$0xff] %vm2410_vm4, %v2319_v10  ;;  %2920 = vrot.lane.b32.xlu0 %v2521_v24, %s7334_s14  ;;  %3046 = vrot.lane.b32.xlu1 %v2552_v5, %s7340_s24  ;;  %v2563_v47 = vld [vmem:[#allocation2 + $0x138] sm:$0xff] }
 0x28a   : > { %v2321_v0 = vpop.permute.xlu1 %2320  ;;  %v8881_v57 = vld [vmem:[#allocation2 + $0x13a] sm:$0xff] }
 0x28b   : > { %2414 = vst.msk [vmem:[#allocation2 + $0x39] sm:$0xff] %vm2410_vm4, %v2321_v0  ;;  %v2502_v10 = vld [vmem:[#allocation2 + $0x141] sm:$0xff] }
 0x28c   : > { %v2343_v16 = vpop.permute.xlu0 %2342  ;;  %v8889_v14 = vld [vmem:[#allocation2 + $0x61] sm:$0xff] }
 0x28d   : > { %2425 = vst.msk [vmem:[#allocation2 + $0xc1] sm:$0xff] %vm2410_vm4, %v2343_v16  ;;  %3300 = vrot.lane.b32.xlu0 %v2521_v24, %s7342_s26  ;;  %3174 = vrot.lane.b32.xlu1 %v2490_v56, %s7341_s25  ;;  %v8898_v35 = vld [vmem:[#allocation2 + $0x60] sm:$0xff] }
 0x28e   : > { %v8907_v0 = vld [vmem:[#allocation2 + $0x142] sm:$0xff] }
 0x28f   : > { %v2564_v53 = vld [vmem:[#allocation2 + $0x140] sm:$0xff] }
 0x290   : > { %v2335_v9 = vpop.permute.xlu0 %2334  ;;  %v8917_v51 = vld [vmem:[#allocation2 + $0x31] sm:$0xff] }
 0x291   : > { %2421 = vst.msk [vmem:[#allocation2 + $0x91] sm:$0xff] %vm2410_vm4, %v2335_v9  ;;  %2912 = vrot.lane.b32.xlu0 %v2517_v48, %s7334_s14  ;;  %3302 = vrot.lane.b32.xlu1 %v2522_v13, %s7342_s26  ;;  %v8925_v40 = vld [vmem:[#allocation2 + $0x30] sm:$0xff] }
 0x295   : > { %3292 = vrot.lane.b32.xlu0 %v2517_v48, %s7342_s26  ;;  %2368 = vrot.lane.b32.xlu1 %v2245_v32, %s7339_s23 }
 0x297   : > { %v2345_v59 = vpop.permute.xlu1 %2344 }
 0x298   : > { %2426 = vst.msk [vmem:[#allocation2 + $0xc9] sm:$0xff] %vm2410_vm4, %v2345_v59 }
 0x299   : > { %2808 = vrot.lane.b32.xlu0 %v2497_v25, %s7333_s13  ;;  %2786 = vrot.lane.b32.xlu1 %v2486_v30, %s7333_s13 }
 0x29d   : > { %3060 = vrot.lane.b32.xlu0 %v2559_v60, %s7340_s24  ;;  %2914 = vrot.lane.b32.xlu1 %v2518_v3, %s7334_s14 }
 0x29f   : > { %v2337_v61 = vpop.permute.xlu1 %2336 }
 0x2a0   : > { %2422 = vst.msk [vmem:[#allocation2 + $0x99] sm:$0xff] %vm2410_vm4, %v2337_v61  ;;  %v8945_v61 = vld [vmem:[#allocation2 + $0x6a] sm:$0xff] }
 0x2a1   : > { %3188 = vrot.lane.b32.xlu0 %v2497_v25, %s7341_s25  ;;  %3038 = vrot.lane.b32.xlu1 %v8798_v15, %s7340_s24  ;;  %v8933_v25 = vld [vmem:[#allocation2 + $0x69] sm:$0xff] }
 0x2a5   : > { %2800 = vrot.lane.b32.xlu0 %v2493_v33, %s7333_s13  ;;  %3166 = vrot.lane.b32.xlu1 %v2486_v30, %s7341_s25 }
 0x2a7   : > { %v2359_v46 = vpop.permute.xlu0 %2358 }
 0x2a8   : > { %2433 = vst.msk [vmem:[#allocation2 + $0x121] sm:$0xff] %vm2410_vm4, %v2359_v46 }
 0x2a9   : > { %3052 = vrot.lane.b32.xlu0 %v8806_v52, %s7340_s24  ;;  %3294 = vrot.lane.b32.xlu1 %v2518_v3, %s7342_s26  ;;  %v8943_v3 = vld [vmem:[#allocation2 + $0x62] sm:$0xff] }
 0x2ad   : > { %3180 = vrot.lane.b32.xlu0 %v2493_v33, %s7341_s25  ;;  %2810 = vrot.lane.b32.xlu1 %v2498_v19, %s7333_s13 }
 0x2af   : > { %v8813_v38 = vpop.permute.xlu0 %2776 }
 0x2b0   : > { %11123 = vst [vmem:[#allocation4_spill] sm:$0xff] %v8813_v38 }
 0x2b1   : > { %2936 = vrot.lane.b32.xlu0 %v8815_v21, %s7334_s14  ;;  %2938 = vrot.lane.b32.xlu1 %v8817_v63, %s7334_s14 }
 0x2b3   : > { %v8823_v42 = vpop.permute.xlu0 %3028 }
 0x2b4   : > { %11124 = vst [vmem:[#allocation6_spill] sm:$0xff] %v8823_v42 }
 0x2b5   : > { %3062 = vrot.lane.b32.xlu1 %v2560_v31, %s7340_s24  ;;  %2928 = vrot.lane.b32.xlu0 %v2525_v28, %s7334_s14 }
 0x2b7   : > { %v8827_v4 = vpop.permute.xlu0 %3156 }
 0x2b8   : > { %11125 = vst [vmem:[#allocation11_spill] sm:$0xff] %v8827_v4 }
 0x2b9   : > { %3190 = vrot.lane.b32.xlu1 %v2498_v19, %s7341_s25  ;;  %3308 = vrot.lane.b32.xlu0 %v2525_v28, %s7342_s26  ;;  %v8955_v19 = vld [vmem:[#allocation2 + $0x68] sm:$0xff] }
 0x2bb   : > { %v2351_v2 = vpop.permute.xlu0 %2350 }
 0x2bc   : > { %2429 = vst.msk [vmem:[#allocation2 + $0xf1] sm:$0xff] %vm2410_vm4, %v2351_v2  ;;  %v8965_v2 = vld [vmem:[#allocation2 + $0x32] sm:$0xff] }
 0x2bd   : > { %2824 = vrot.lane.b32.xlu0 %v2505_v39, %s7333_s13  ;;  %2802 = vrot.lane.b32.xlu1 %v2494_v49, %s7333_s13 }
 0x2bf   : > { %v8834_v6 = vpop.permute.xlu0 %2768  ;;  %v2361_v26 = vpop.permute.xlu1 %2360 }
 0x2c0   : > { %2434 = vst.msk [vmem:[#allocation2 + $0x129] sm:$0xff] %vm2410_vm4, %v2361_v26 }
 0x2c1   : > { %3076 = vrot.lane.b32.xlu0 %v2567_v62, %s7340_s24  ;;  %2930 = vrot.lane.b32.xlu1 %v2526_v27, %s7334_s14 }
 0x2c3   : > { %v8839_v12 = vpop.permute.xlu0 %3020  ;;  %v8841_v45 = vpop.permute.xlu1 %2778 }
 0x2c4   : > { %11126 = vst [vmem:[#allocation12_spill] sm:$0xff] %v8841_v45 }
 0x2c5   : > { %3204 = vrot.lane.b32.xlu0 %v2505_v39, %s7341_s25  ;;  %3054 = vrot.lane.b32.xlu1 %v8843_v29, %s7340_s24 }
 0x2c7   : > { %v8848_v55 = vpop.permute.xlu0 %3148  ;;  %v8850_v11 = vpop.permute.xlu1 %2906 }
 0x2c8   : > { %11127 = vst [vmem:[#allocation7_spill] sm:$0xff] %v8850_v11  ;;  %v9152_v11 = vld [vmem:[#allocation2 + $0x12a] sm:$0xff] }
 0x2c9   : > { %2816 = vrot.lane.b32.xlu0 %v2501_v54, %s7333_s13  ;;  %3182 = vrot.lane.b32.xlu1 %v2494_v49, %s7341_s25 }
 0x2cb   : > { %v8854_v20 = vpop.permute.xlu0 %2904  ;;  %v8856_v37 = vpop.permute.xlu1 %3030 }
 0x2cc   : > { %11128 = vst [vmem:[#allocation8_spill] sm:$0xff] %v8854_v20  ;;  %11129 = vst [vmem:[#allocation13_spill] sm:$0xff] %v8856_v37 }
 0x2cd   : > { %3068 = vrot.lane.b32.xlu0 %v2563_v47, %s7340_s24  ;;  %3310 = vrot.lane.b32.xlu1 %v2526_v27, %s7342_s26  ;;  %v8983_v27 = vld [vmem:[#allocation2 + $0xc1] sm:$0xff] }
 0x2cf   : > { %v8860_v41 = vpop.permute.xlu0 %3284  ;;  %v8862_v36 = vpop.permute.xlu1 %3158 }
 0x2d0   : > { %11130 = vst [vmem:[#allocation14_spill] sm:$0xff] %v8860_v41  ;;  %11131 = vst [vmem:[#allocation5_spill] sm:$0xff] %v8862_v36 }
 0x2d1   : > { %3196 = vrot.lane.b32.xlu0 %v2501_v54, %s7341_s25  ;;  %2826 = vrot.lane.b32.xlu1 %v2506_v43, %s7333_s13  ;;  %v8985_v54 = vld [vmem:[#allocation2 + $0x39] sm:$0xff] }
 0x2d3   : > { %v8866_v23 = vpop.permute.xlu0 %2896  ;;  %v8868_v44 = vpop.permute.xlu1 %3286 }
 0x2d4   : > { %11132 = vst [vmem:[#allocation9_spill] sm:$0xff] %v8868_v44 }
 0x2d5   : > { %2952 = vrot.lane.b32.xlu0 %v8870_v50, %s7334_s14  ;;  %2954 = vrot.lane.b32.xlu1 %v8872_v8, %s7334_s14 }
 0x2d7   : > { %v8878_v22 = vpop.permute.xlu0 %3276  ;;  %v2353_v18 = vpop.permute.xlu1 %2352 }
 0x2d8   : > { %2430 = vst.msk [vmem:[#allocation2 + $0xf9] sm:$0xff] %vm2410_vm4, %v2353_v18  ;;  %v8994_v18 = vld [vmem:[#allocation2 + $0xc0] sm:$0xff] }
 0x2d9   : > { %3078 = vrot.lane.b32.xlu1 %v2568_v58, %s7340_s24  ;;  %2944 = vrot.lane.b32.xlu0 %v8881_v57, %s7334_s14  ;;  %v8996_v58 = vld [vmem:[#allocation2 + $0x3a] sm:$0xff] }
 0x2db   : > { %v2375_v56 = vpop.permute.xlu0 %2374  ;;  %v8886_v1 = vpop.permute.xlu1 %2770 }
 0x2dc   : > { %11133 = vst [vmem:[#allocation17_spill] sm:$0xff] %v8886_v1  ;;  %2441 = vst.msk [vmem:[#allocation2 + $0x181] sm:$0xff] %vm2410_vm4, %v2375_v56 }
 0x2dd   : > { %3206 = vrot.lane.b32.xlu1 %v2506_v43, %s7341_s25  ;;  %2780 = vrot.lane.b32.xlu0 %v8889_v14, %s7333_s13 }
 0x2df   : > { %v8894_v13 = vpop.permute.xlu0 %2792  ;;  %v8896_v17 = vpop.permute.xlu1 %2898  ;;  %v9162_v45 = vld [vmem:[#allocation2 + $0xf2] sm:$0xff]  ;;  %v9198_v37 = vld [vmem:[#allocation2 + $0xfa] sm:$0xff] }
 0x2e0   : > { %11134 = vst [vmem:[#allocation19_spill] sm:$0xff] %v8894_v13  ;;  %11135 = vst [vmem:[#allocation10_spill] sm:$0xff] %v8896_v17  ;;  %v9048_v13 = vld [vmem:[#allocation2 + $0xca] sm:$0xff]  ;;  %v9186_v36 = vld [vmem:[#allocation2 + $0xf9] sm:$0xff] }
 0x2e1   : > { %3032 = vrot.lane.b32.xlu0 %v8898_v35, %s7340_s24  ;;  %2818 = vrot.lane.b32.xlu1 %v2502_v10, %s7333_s13  ;;  %v9210_v4 = vld [vmem:[#allocation2 + $0xf8] sm:$0xff] }
 0x2e3   : > { %v8903_v24 = vpop.permute.xlu0 %3044  ;;  %v8905_v5 = vpop.permute.xlu1 %3022  ;;  %v9174_v44 = vld [vmem:[#allocation2 + $0x180] sm:$0xff] }
 0x2e4   : > { %11136 = vst [vmem:[#allocation21_spill] sm:$0xff] %v8903_v24  ;;  %v9088_v24 = vld [vmem:[#allocation2 + $0x99] sm:$0xff]  ;;  %v9184_v20 = vld [vmem:[#allocation2 + $0x181] sm:$0xff] }
 0x2e5   : > { %3160 = vrot.lane.b32.xlu0 %v8889_v14, %s7341_s25  ;;  %2946 = vrot.lane.b32.xlu1 %v8907_v0, %s7334_s14 }
 0x2e7   : > { %v8913_v34 = vpop.permute.xlu0 %3172  ;;  %v8915_v16 = vpop.permute.xlu1 %3150 }
 0x2e8   : > { %11137 = vst [vmem:[#allocation22_spill] sm:$0xff] %v8913_v34 }
 0x2e9   : > { %2772 = vrot.lane.b32.xlu0 %v8917_v51, %s7333_s13  ;;  %3070 = vrot.lane.b32.xlu1 %v2564_v53, %s7340_s24  ;;  %v9006_v53 = vld [vmem:[#allocation2 + $0x38] sm:$0xff] }
 0x2eb   : > { %v2367_v9 = vpop.permute.xlu0 %2366  ;;  %v8922_v48 = vpop.permute.xlu1 %3278 }
 0x2ec   : > { %11138 = vst [vmem:[#allocation23_spill] sm:$0xff] %v8922_v48  ;;  %2437 = vst.msk [vmem:[#allocation2 + $0x151] sm:$0xff] %vm2410_vm4, %v2367_v9 }
 0x2ed   : > { %3024 = vrot.lane.b32.xlu0 %v8925_v40, %s7340_s24  ;;  %3198 = vrot.lane.b32.xlu1 %v2502_v10, %s7341_s25 }
 0x2ef   : > { %v8930_v32 = vpop.permute.xlu0 %2784  ;;  %v2377_v59 = vpop.permute.xlu1 %2376 }
 0x2f0   : > { %11139 = vst [vmem:[#allocation24_spill] sm:$0xff] %v8930_v32  ;;  %2442 = vst.msk [vmem:[#allocation2 + $0x189] sm:$0xff] %vm2410_vm4, %v2377_v59  ;;  %v9120_v32 = vld [vmem:[#allocation2 + $0xf1] sm:$0xff] }
 0x2f1   : > { %3152 = vrot.lane.b32.xlu0 %v8917_v51, %s7341_s25  ;;  %2782 = vrot.lane.b32.xlu1 %v8933_v25, %s7333_s13 }
 0x2f3   : > { %v8939_v30 = vpop.permute.xlu0 %3036  ;;  %v8941_v60 = vpop.permute.xlu1 %2794  ;;  %v9196_v38 = vld [vmem:[#allocation2 + $0x151] sm:$0xff] }
 0x2f4   : > { %11140 = vst [vmem:[#allocation25_spill] sm:$0xff] %v8939_v30  ;;  %11141 = vst [vmem:[#allocation26_spill] sm:$0xff] %v8941_v60  ;;  %v9164_v30 = vld [vmem:[#allocation2 + $0x128] sm:$0xff]  ;;  %v9208_v41 = vld [vmem:[#allocation2 + $0x150] sm:$0xff] }
 0x2f5   : > { %2908 = vrot.lane.b32.xlu0 %v8943_v3, %s7334_s14  ;;  %2910 = vrot.lane.b32.xlu1 %v8945_v61, %s7334_s14 }
 0x2f7   : > { %v8951_v33 = vpop.permute.xlu0 %3164  ;;  %v8953_v46 = vpop.permute.xlu1 %2922  ;;  %v2570_v1 = vld [vmem:[#allocation2 + $0x188] sm:$0xff] }
 0x2f8   : > { %11142 = vst [vmem:[#allocation27_spill] sm:$0xff] %v8951_v33  ;;  %11143 = vst [vmem:[#allocation28_spill] sm:$0xff] %v8953_v46  ;;  %v9026_v46 = vld [vmem:[#allocation2 + $0x90] sm:$0xff]  ;;  %v9150_v33 = vld [vmem:[#allocation2 + $0x122] sm:$0xff] }
 0x2f9   : > { %3288 = vrot.lane.b32.xlu0 %v8943_v3, %s7342_s26  ;;  %3034 = vrot.lane.b32.xlu1 %v8955_v19, %s7340_s24  ;;  %v2602_v48 = vld [vmem:[#allocation2 + $0x189] sm:$0xff] }
 0x2fb   : > { %v8961_v31 = vpop.permute.xlu0 %2920  ;;  %v8963_v28 = vpop.permute.xlu1 %3046 }
 0x2fc   : > { %11144 = vst [vmem:[#allocation29_spill] sm:$0xff] %v8961_v31  ;;  %11145 = vst [vmem:[#allocation30_spill] sm:$0xff] %v8963_v28 }
 0x2fd   : > { %3162 = vrot.lane.b32.xlu1 %v8933_v25, %s7341_s25  ;;  %2900 = vrot.lane.b32.xlu0 %v8965_v2, %s7334_s14 }
 0x2ff   : > { %v8971_v39 = vpop.permute.xlu0 %3300  ;;  %v8973_v49 = vpop.permute.xlu1 %3174 }
 0x300   : > { %11146 = vst [vmem:[#allocation31_spill] sm:$0xff] %v8971_v39  ;;  %11147 = vst [vmem:[#allocation32_spill] sm:$0xff] %v8973_v49  ;;  %v9046_v49 = vld [vmem:[#allocation2 + $0xc2] sm:$0xff] }
 0x301   : > { %3290 = vrot.lane.b32.xlu1 %v8945_v61, %s7342_s26  ;;  %3280 = vrot.lane.b32.xlu0 %v8965_v2, %s7342_s26  ;;  %v9058_v39 = vld [vmem:[#allocation2 + $0xc8] sm:$0xff] }
 0x303   : > { %v8979_v26 = vpop.permute.xlu0 %2912  ;;  %v8981_v62 = vpop.permute.xlu1 %3302 }
 0x304   : > { %11148 = vst [vmem:[#allocation33_spill] sm:$0xff] %v8979_v26  ;;  %11149 = vst [vmem:[#allocation34_spill] sm:$0xff] %v8981_v62  ;;  %v9036_v62 = vld [vmem:[#allocation2 + $0xc9] sm:$0xff]  ;;  %v9100_v26 = vld [vmem:[#allocation2 + $0x9a] sm:$0xff] }
 0x305   : > { %2796 = vrot.lane.b32.xlu0 %v8983_v27, %s7333_s13  ;;  %2774 = vrot.lane.b32.xlu1 %v8985_v54, %s7333_s13 }
 0x307   : > { %v8991_v47 = vpop.permute.xlu0 %3292  ;;  %v2369_v43 = vpop.permute.xlu1 %2368 }
 0x308   : > { %11150 = vst [vmem:[#allocation35_spill] sm:$0xff] %v8991_v47  ;;  %2438 = vst.msk [vmem:[#allocation2 + $0x159] sm:$0xff] %vm2410_vm4, %v2369_v43  ;;  %v9016_v43 = vld [vmem:[#allocation2 + $0x91] sm:$0xff]  ;;  %v9140_v47 = vld [vmem:[#allocation2 + $0x129] sm:$0xff] }
 0x309   : > { %3048 = vrot.lane.b32.xlu0 %v8994_v18, %s7340_s24  ;;  %2902 = vrot.lane.b32.xlu1 %v8996_v58, %s7334_s14  ;;  %vm10630_vm4 = vmpackc.low %vm6056_vm2, %vm6056_vm2 }
 0x30b   : > { %v9002_v56 = vpop.permute.xlu0 %2808  ;;  %v9004_v10 = vpop.permute.xlu1 %2786 }
 0x30c   : > { %11151 = vst [vmem:[#allocation36_spill] sm:$0xff] %v9002_v56  ;;  %11152 = vst [vmem:[#allocation37_spill] sm:$0xff] %v9004_v10  ;;  %v9086_v10 = vld [vmem:[#allocation2 + $0x121] sm:$0xff] }
 0x30d   : > { %3176 = vrot.lane.b32.xlu0 %v8983_v27, %s7341_s25  ;;  %3026 = vrot.lane.b32.xlu1 %v9006_v53, %s7340_s24 }
 0x30f   : > { %v9012_v9 = vpop.permute.xlu0 %3060  ;;  %v9014_v59 = vpop.permute.xlu1 %2914  ;;  %v9228_v17 = vld [vmem:[#allocation2 + $0x152] sm:$0xff] }
 0x310   : > { %11153 = vst [vmem:[#allocation38_spill] sm:$0xff] %v9012_v9  ;;  %11154 = vst [vmem:[#allocation39_spill] sm:$0xff] %v9014_v59  ;;  %v9068_v59 = vld [vmem:[#allocation2 + $0x92] sm:$0xff] }
 0x311   : > { %2788 = vrot.lane.b32.xlu0 %v9016_v43, %s7333_s13  ;;  %3154 = vrot.lane.b32.xlu1 %v8985_v54, %s7341_s25 }
 0x313   : > { %v9022_v7 = vpop.permute.xlu0 %3188  ;;  %v9024_v56 = vpop.permute.xlu1 %3038 }
 0x314   : > { %11155 = vst [vmem:[#allocation40_spill] sm:$0xff] %v9022_v7  ;;  %11156 = vst [vmem:[#allocation41_spill] sm:$0xff] %v9024_v56  ;;  %v9130_v56 = vld [vmem:[#allocation2 + $0xf0] sm:$0xff] }
 0x315   : > { %3040 = vrot.lane.b32.xlu0 %v9026_v46, %s7340_s24  ;;  %3282 = vrot.lane.b32.xlu1 %v8996_v58, %s7342_s26 }
 0x317   : > { %v9032_v9 = vpop.permute.xlu0 %2800  ;;  %v9034_v60 = vpop.permute.xlu1 %3166 }
 0x318   : > { %11157 = vst [vmem:[#allocation42_spill] sm:$0xff] %v9032_v9  ;;  %11158 = vst [vmem:[#allocation43_spill] sm:$0xff] %v9034_v60  ;;  %v9110_v60 = vld [vmem:[#allocation2 + $0x98] sm:$0xff] }
 0x319   : > { %3168 = vrot.lane.b32.xlu0 %v9016_v43, %s7341_s25  ;;  %2798 = vrot.lane.b32.xlu1 %v9036_v62, %s7333_s13 }
 0x31b   : > { %v9042_v7 = vpop.permute.xlu0 %3052  ;;  %v9044_v31 = vpop.permute.xlu1 %3294 }
 0x31c   : > { %11159 = vst [vmem:[#allocation44_spill] sm:$0xff] %v9042_v7  ;;  %11160 = vst [vmem:[#allocation45_spill] sm:$0xff] %v9044_v31  ;;  %v9098_v31 = vld [vmem:[#allocation2 + $0x120] sm:$0xff] }
 0x31d   : > { %2924 = vrot.lane.b32.xlu0 %v9046_v49, %s7334_s14  ;;  %2926 = vrot.lane.b32.xlu1 %v9048_v13, %s7334_s14 }
 0x31f   : > { %v9054_v9 = vpop.permute.xlu0 %3180  ;;  %v9056_v28 = vpop.permute.xlu1 %2810 }
 0x320   : > { %11161 = vst [vmem:[#allocation46_spill] sm:$0xff] %v9054_v9  ;;  %11162 = vst [vmem:[#allocation47_spill] sm:$0xff] %v9056_v28 }
 0x321   : > { %3304 = vrot.lane.b32.xlu0 %v9046_v49, %s7342_s26  ;;  %3050 = vrot.lane.b32.xlu1 %v9058_v39, %s7340_s24 }
 0x323   : > { %v9064_v7 = vpop.permute.xlu0 %2936  ;;  %v9066_v34 = vpop.permute.xlu1 %2938 }
 0x324   : > { %11163 = vst [vmem:[#allocation48_spill] sm:$0xff] %v9064_v7  ;;  %11164 = vst [vmem:[#allocation49_spill] sm:$0xff] %v9066_v34 }
 0x325   : > { %2916 = vrot.lane.b32.xlu0 %v9068_v59, %s7334_s14  ;;  %3178 = vrot.lane.b32.xlu1 %v9036_v62, %s7341_s25 }
 0x327   : > { %v9074_v28 = vpop.permute.xlu0 %2928  ;;  %v9076_v9 = vpop.permute.xlu1 %3062 }
 0x328   : > { %11165 = vst [vmem:[#allocation50_spill] sm:$0xff] %v9074_v28  ;;  %11166 = vst [vmem:[#allocation51_spill] sm:$0xff] %v9076_v9 }
 0x329   : > { %3296 = vrot.lane.b32.xlu0 %v9068_v59, %s7342_s26  ;;  %3306 = vrot.lane.b32.xlu1 %v9048_v13, %s7342_s26 }
 0x32b   : > { %v9082_v7 = vpop.permute.xlu0 %3308  ;;  %v9084_v34 = vpop.permute.xlu1 %3190 }
 0x32c   : > { %11167 = vst [vmem:[#allocation52_spill] sm:$0xff] %v9082_v7  ;;  %11168 = vst [vmem:[#allocation53_spill] sm:$0xff] %v9084_v34 }
 0x32d   : > { %2812 = vrot.lane.b32.xlu0 %v9086_v10, %s7333_s13  ;;  %2790 = vrot.lane.b32.xlu1 %v9088_v24, %s7333_s13 }
 0x32f   : > { %v9094_v9 = vpop.permute.xlu0 %2824  ;;  %v9096_v28 = vpop.permute.xlu1 %2802 }
 0x330   : > { %11169 = vst [vmem:[#allocation54_spill] sm:$0xff] %v9094_v9  ;;  %11170 = vst [vmem:[#allocation55_spill] sm:$0xff] %v9096_v28 }
 0x331   : > { %3064 = vrot.lane.b32.xlu0 %v9098_v31, %s7340_s24  ;;  %2918 = vrot.lane.b32.xlu1 %v9100_v26, %s7334_s14 }
 0x333   : > { %v9106_v34 = vpop.permute.xlu0 %3076  ;;  %v9108_v7 = vpop.permute.xlu1 %2930 }
 0x334   : > { %11171 = vst [vmem:[#allocation56_spill] sm:$0xff] %v9106_v34  ;;  %11172 = vst [vmem:[#allocation57_spill] sm:$0xff] %v9108_v7 }
 0x335   : > { %3192 = vrot.lane.b32.xlu0 %v9086_v10, %s7341_s25  ;;  %3042 = vrot.lane.b32.xlu1 %v9110_v60, %s7340_s24 }
 0x337   : > { %v9116_v9 = vpop.permute.xlu0 %3204  ;;  %v9118_v28 = vpop.permute.xlu1 %3054 }
 0x338   : > { %11173 = vst [vmem:[#allocation58_spill] sm:$0xff] %v9116_v9  ;;  %11174 = vst [vmem:[#allocation59_spill] sm:$0xff] %v9118_v28 }
 0x339   : > { %2804 = vrot.lane.b32.xlu0 %v9120_v32, %s7333_s13  ;;  %3170 = vrot.lane.b32.xlu1 %v9088_v24, %s7341_s25 }
 0x33b   : > { %v9126_v34 = vpop.permute.xlu0 %2816  ;;  %v9128_v7 = vpop.permute.xlu1 %3182 }
 0x33c   : > { %11175 = vst [vmem:[#allocation60_spill] sm:$0xff] %v9126_v34  ;;  %11176 = vst [vmem:[#allocation61_spill] sm:$0xff] %v9128_v7 }
 0x33d   : > { %3056 = vrot.lane.b32.xlu0 %v9130_v56, %s7340_s24  ;;  %3298 = vrot.lane.b32.xlu1 %v9100_v26, %s7342_s26 }
 0x33f   : > { %v9136_v9 = vpop.permute.xlu0 %3068  ;;  %v9138_v28 = vpop.permute.xlu1 %3310 }
 0x340   : > { %11177 = vst [vmem:[#allocation62_spill] sm:$0xff] %v9136_v9  ;;  %11178 = vst [vmem:[#allocation63_spill] sm:$0xff] %v9138_v28 }
 0x341   : > { %3184 = vrot.lane.b32.xlu0 %v9120_v32, %s7341_s25  ;;  %2814 = vrot.lane.b32.xlu1 %v9140_v47, %s7333_s13 }
 0x343   : > { %v9146_v34 = vpop.permute.xlu0 %3196  ;;  %v9148_v7 = vpop.permute.xlu1 %2826 }
 0x344   : > { %11179 = vst [vmem:[#allocation64_spill] sm:$0xff] %v9146_v34  ;;  %11180 = vst [vmem:[#allocation65_spill] sm:$0xff] %v9148_v7 }
 0x345   : > { %2940 = vrot.lane.b32.xlu0 %v9150_v33, %s7334_s14  ;;  %2942 = vrot.lane.b32.xlu1 %v9152_v11, %s7334_s14 }
 0x347   : > { %v9158_v9 = vpop.permute.xlu0 %2952  ;;  %v9160_v28 = vpop.permute.xlu1 %2954 }
 0x348   : > { %11181 = vst [vmem:[#allocation66_spill] sm:$0xff] %v9158_v9  ;;  %11182 = vst [vmem:[#allocation67_spill] sm:$0xff] %v9160_v28 }
 0x349   : > { %2932 = vrot.lane.b32.xlu0 %v9162_v45, %s7334_s14  ;;  %3066 = vrot.lane.b32.xlu1 %v9164_v30, %s7340_s24 }
 0x34b   : > { %v9170_v7 = vpop.permute.xlu0 %2944  ;;  %v9172_v34 = vpop.permute.xlu1 %3078 }
 0x34c   : > { %11183 = vst [vmem:[#allocation68_spill] sm:$0xff] %v9170_v7  ;;  %11184 = vst [vmem:[#allocation69_spill] sm:$0xff] %v9172_v34 }
 0x34d   : > { %3080 = vrot.lane.b32.xlu0 %v9174_v44, %s7340_s24  ;;  %3194 = vrot.lane.b32.xlu1 %v9140_v47, %s7341_s25 }
 0x34f   : > { %v9180_v28 = vpop.permute.xlu0 %2780  ;;  %v9182_v9 = vpop.permute.xlu1 %3206 }
 0x350   : > { %11185 = vst [vmem:[#allocation70_spill] sm:$0xff] %v9180_v28  ;;  %11186 = vst [vmem:[#allocation71_spill] sm:$0xff] %v9182_v9 }
 0x351   : > { %3208 = vrot.lane.b32.xlu0 %v9184_v20, %s7341_s25  ;;  %2806 = vrot.lane.b32.xlu1 %v9186_v36, %s7333_s13 }
 0x353   : > { %v9192_v34 = vpop.permute.xlu0 %3032  ;;  %v9194_v7 = vpop.permute.xlu1 %2818 }
 0x354   : > { %11187 = vst [vmem:[#allocation72_spill] sm:$0xff] %v9192_v34  ;;  %11188 = vst [vmem:[#allocation73_spill] sm:$0xff] %v9194_v7 }
 0x355   : > { %2820 = vrot.lane.b32.xlu0 %v9196_v38, %s7333_s13  ;;  %2934 = vrot.lane.b32.xlu1 %v9198_v37, %s7334_s14 }
 0x357   : > { %v9204_v9 = vpop.permute.xlu0 %3160  ;;  %v9206_v28 = vpop.permute.xlu1 %2946 }
 0x358   : > { %11189 = vst [vmem:[#allocation74_spill] sm:$0xff] %v9204_v9  ;;  %11190 = vst [vmem:[#allocation75_spill] sm:$0xff] %v9206_v28 }
 0x359   : > { %3072 = vrot.lane.b32.xlu0 %v9208_v41, %s7340_s24  ;;  %3058 = vrot.lane.b32.xlu1 %v9210_v4, %s7340_s24 }
 0x35b   : > { %v9216_v7 = vpop.permute.xlu0 %2772  ;;  %v9218_v34 = vpop.permute.xlu1 %3070 }
 0x35c   : > { %11191 = vst [vmem:[#allocation76_spill] sm:$0xff] %v9216_v7  ;;  %11192 = vst [vmem:[#allocation77_spill] sm:$0xff] %v9218_v34  ;;  %v9244_v7 = vld [vmem:[#allocation2 + $0x159] sm:$0xff] }
 0x35d   : > { %3200 = vrot.lane.b32.xlu0 %v9196_v38, %s7341_s25  ;;  %3186 = vrot.lane.b32.xlu1 %v9186_v36, %s7341_s25 }
 0x35f   : > { %v9224_v28 = vpop.permute.xlu0 %3024  ;;  %v9226_v9 = vpop.permute.xlu1 %3198 }
 0x360   : > { %11193 = vst [vmem:[#allocation78_spill] sm:$0xff] %v9224_v28  ;;  %11194 = vst [vmem:[#allocation79_spill] sm:$0xff] %v9226_v9 }
 0x361   : > { %2948 = vrot.lane.b32.xlu0 %v9228_v17, %s7334_s14  ;;  %3082 = vrot.lane.b32.xlu1 %v2570_v1, %s7340_s24 }
 0x363   : > { %v9233_v42 = vpop.permute.xlu0 %3152  ;;  %v9235_v34 = vpop.permute.xlu1 %2782 }
 0x364   : > { %11195 = vst [vmem:[#allocation80_spill] sm:$0xff] %v9233_v42  ;;  %11196 = vst [vmem:[#allocation81_spill] sm:$0xff] %v9235_v34  ;;  %v9254_v42 = vld [vmem:[#allocation2 + $0x15a] sm:$0xff] }
 0x365   : > { %3312 = vrot.lane.b32.xlu0 %v9162_v45, %s7342_s26  ;;  %3210 = vrot.lane.b32.xlu1 %v2602_v48, %s7341_s25 }
 0x367   : > { %v9240_v28 = vpop.permute.xlu0 %2908  ;;  %v9242_v9 = vpop.permute.xlu1 %2910 }
 0x368   : > { %11197 = vst [vmem:[#allocation82_spill] sm:$0xff] %v9240_v28  ;;  %11198 = vst [vmem:[#allocation83_spill] sm:$0xff] %v9242_v9 }
 0x369   : > { %3316 = vrot.lane.b32.xlu0 %v8815_v21, %s7342_s26  ;;  %2822 = vrot.lane.b32.xlu1 %v9244_v7, %s7333_s13  ;;  %v9264_v21 = vld [vmem:[#allocation2 + $0x158] sm:$0xff] }
 0x36b   : > { %v9250_v1 = vpop.permute.xlu0 %3288  ;;  %v9252_v34 = vpop.permute.xlu1 %3034 }
 0x36c   : > { %11199 = vst [vmem:[#allocation84_spill] sm:$0xff] %v9250_v1  ;;  %11200 = vst [vmem:[#allocation85_spill] sm:$0xff] %v9252_v34 }
 0x36d   : > { %3320 = vrot.lane.b32.xlu0 %v9150_v33, %s7342_s26  ;;  %2950 = vrot.lane.b32.xlu1 %v9254_v42, %s7334_s14 }
 0x36f   : > { %v9260_v48 = vpop.permute.xlu0 %2900  ;;  %v9262_v9 = vpop.permute.xlu1 %3162 }
 0x370   : > { %11201 = vst [vmem:[#allocation86_spill] sm:$0xff] %v9262_v9 }
 0x371   : > { %3324 = vrot.lane.b32.xlu0 %v8881_v57, %s7342_s26  ;;  %3074 = vrot.lane.b32.xlu1 %v9264_v21, %s7340_s24 }
 0x373   : > { %v9270_v34 = vpop.permute.xlu0 %3280  ;;  %v9272_v1 = vpop.permute.xlu1 %3290 }
 0x374   : > { %11202 = vst [vmem:[#allocation87_spill] sm:$0xff] %v9270_v34  ;;  %11203 = vst [vmem:[#allocation88_spill] sm:$0xff] %v9272_v1  ;;  %v9290_v1 = vld [vmem:[#allocation2 + $0x182] sm:$0xff] }
 0x375   : > { %3328 = vrot.lane.b32.xlu0 %v9228_v17, %s7342_s26  ;;  %3202 = vrot.lane.b32.xlu1 %v9244_v7, %s7341_s25 }
 0x377   : > { %v9278_v28 = vpop.permute.xlu0 %2796  ;;  %v9280_v9 = vpop.permute.xlu1 %2774 }
 0x378   : > { %11204 = vst [vmem:[#allocation89_spill] sm:$0xff] %v9278_v28  ;;  %11205 = vst [vmem:[#allocation90_spill] sm:$0xff] %v9280_v9 }
 0x379   : > { %3332 = vrot.lane.b32.xlu0 %v8870_v50, %s7342_s26  ;;  %3314 = vrot.lane.b32.xlu1 %v9198_v37, %s7342_s26 }
 0x37b   : > { %v9286_v57 = vpop.permute.xlu0 %3048  ;;  %v9288_v34 = vpop.permute.xlu1 %2902 }
 0x37c   : > { %11206 = vst [vmem:[#allocation91_spill] sm:$0xff] %v9286_v57  ;;  %11207 = vst [vmem:[#allocation92_spill] sm:$0xff] %v9288_v34  ;;  %v2638_v34 = vld [vmem:[#allocation2 + $0x48] sm:$0xff] }
 0x37d   : > { %3336 = vrot.lane.b32.xlu0 %v9290_v1, %s7342_s26  ;;  %3318 = vrot.lane.b32.xlu1 %v8817_v63, %s7342_s26 }
 0x37f   : > { %v9296_v28 = vpop.permute.xlu0 %3176  ;;  %v9298_v9 = vpop.permute.xlu1 %3026 }
 0x380   : > { %11208 = vst [vmem:[#allocation93_spill] sm:$0xff] %v9296_v28  ;;  %11209 = vst [vmem:[#allocation94_spill] sm:$0xff] %v9298_v9 }
 0x381   : > { %3404 = vrot.lane.b32.xlu0 %v8925_v40, %s7343_s29  ;;  %3322 = vrot.lane.b32.xlu1 %v9152_v11, %s7342_s26 }
 0x383   : > { %v9304_v50 = vpop.permute.xlu0 %2788  ;;  %v9306_v57 = vpop.permute.xlu1 %3154 }
 0x384   : > { %11210 = vst [vmem:[#allocation95_spill] sm:$0xff] %v9304_v50  ;;  %11211 = vst [vmem:[#allocation96_spill] sm:$0xff] %v9306_v57  ;;  %v2642_v57 = vld [vmem:[#allocation2 + $0x78] sm:$0xff] }
 0x385   : > { %3408 = vrot.lane.b32.xlu0 %v2638_v34, %s7343_s29  ;;  %3326 = vrot.lane.b32.xlu1 %v8907_v0, %s7342_s26 }
 0x387   : > { %v9311_v63 = vpop.permute.xlu0 %3040  ;;  %v9313_v28 = vpop.permute.xlu1 %3282 }
 0x388   : > { %11212 = vst [vmem:[#allocation97_spill] sm:$0xff] %v9311_v63  ;;  %v9330_v63 = vld [vmem:[#allocation2 + $0x18a] sm:$0xff] }
 0x389   : > { %3412 = vrot.lane.b32.xlu0 %v8898_v35, %s7343_s29  ;;  %3330 = vrot.lane.b32.xlu1 %v9254_v42, %s7342_s26 }
 0x38b   : > { %v9319_v9 = vpop.permute.xlu0 %3168  ;;  %v9321_v50 = vpop.permute.xlu1 %2798 }
 0x38c   : > { %11213 = vst [vmem:[#allocation98_spill] sm:$0xff] %v9321_v50 }
 0x38d   : > { %3416 = vrot.lane.b32.xlu0 %v2642_v57, %s7343_s29  ;;  %3334 = vrot.lane.b32.xlu1 %v8872_v8, %s7342_s26  ;;  %v2646_v57 = vld [vmem:[#allocation2 + $0xa8] sm:$0xff] }
 0x38f   : > { %v9326_v0 = vpop.permute.xlu0 %2924  ;;  %v9328_v34 = vpop.permute.xlu1 %2926 }
 0x390   : > { %11214 = vst [vmem:[#allocation99_spill] sm:$0xff] %v9326_v0  ;;  %11215 = vst [vmem:[#allocation100_spill] sm:$0xff] %v9328_v34  ;;  %v2639_v0 = vld [vmem:[#allocation2 + $0x50] sm:$0xff] }
 0x391   : > { %3420 = vrot.lane.b32.xlu0 %v9026_v46, %s7343_s29  ;;  %3338 = vrot.lane.b32.xlu1 %v9330_v63, %s7342_s26  ;;  %s7345_s26 = smov 64  }
 0x393   : > { %v9336_v35 = vpop.permute.xlu0 %3304  ;;  %v9338_v50 = vpop.permute.xlu1 %3050 }
 0x394   : > { %11216 = vst [vmem:[#allocation101_spill] sm:$0xff] %v9336_v35  ;;  %11217 = vst [vmem:[#allocation102_spill] sm:$0xff] %v9338_v50 }
 0x395   : > { %3424 = vrot.lane.b32.xlu0 %v2646_v57, %s7343_s29  ;;  %3406 = vrot.lane.b32.xlu1 %v9006_v53, %s7343_s29 }
 0x397   : > { %v9343_v8 = vpop.permute.xlu0 %2916  ;;  %v9345_v34 = vpop.permute.xlu1 %3178 }
 0x398   : > { %11218 = vst [vmem:[#allocation103_spill] sm:$0xff] %v9345_v34 }
 0x399   : > { %3428 = vrot.lane.b32.xlu0 %v8994_v18, %s7343_s29  ;;  %3410 = vrot.lane.b32.xlu1 %v2639_v0, %s7343_s29  ;;  %v4019_v18 = vld [vmem:[%s11057_s4] sm:$0xff] }
 0x39b   : > { %v9350_v46 = vpop.permute.xlu0 %3296  ;;  %v9352_v35 = vpop.permute.xlu1 %3306 }
 0x39c   : > { %11219 = vst [vmem:[#allocation104_spill] sm:$0xff] %v9352_v35  ;;  %v2654_v35 = vld [vmem:[#allocation2 + $0x108] sm:$0xff] }
 0x39d   : > { %3432 = vrot.lane.b32.xlu0 %v8806_v52, %s7343_s29  ;;  %3414 = vrot.lane.b32.xlu1 %v8955_v19, %s7343_s29  ;;  %v4020_v52 = vld [vmem:[%s11057_s4 + $0x8] sm:$0xff] }
 0x39f   : > { %v9358_v57 = vpop.permute.xlu0 %2812  ;;  %v9360_v50 = vpop.permute.xlu1 %2790 }
 0x3a0   : > { %11220 = vst [vmem:[#allocation105_spill] sm:$0xff] %v9358_v57  ;;  %v6556_v57 = vpack.c.bf16 %v4020_v52, %v4019_v18  ;;  %v2647_v52 = vld [vmem:[#allocation2 + $0xb0] sm:$0xff] }
 0x3a1   : > { %3436 = vrot.lane.b32.xlu0 %v9130_v56, %s7343_s29  ;;  %3418 = vrot.lane.b32.xlu1 %v8798_v15, %s7343_s29  ;;  %v4021_v15 = vld [vmem:[%s11057_s4 + $0x10] sm:$0xff]  ;;  %v4022_v56 = vld [vmem:[%s11057_s4 + $0x18] sm:$0xff] }
 0x3a2   : > { %6557 = vmatprep.subr.bf16.mxu1 %v6556_v57  ;;  %v6560_v18 = vpack.c.bf16 %v4022_v56, %v4021_v15  ;;  %v4026_v56 = vld [vmem:[%s11057_s4 + $0x38] sm:$0xff] }
 0x3a3   : > { %v9372_v0 = vpop.permute.xlu0 %3064  ;;  %v9374_v19 = vpop.permute.xlu1 %2918  ;;  %6559 = vmatpush3.bf16.msra.mxu1 %v6556_v57 }
 0x3a4   : > { %11221 = vst [vmem:[#allocation106_spill] sm:$0xff] %v9372_v0  ;;  %11222 = vst [vmem:[#allocation107_spill] sm:$0xff] %v9374_v19  ;;  %6561 = vmatprep.subr.bf16.mxu1 %v6560_v18 }
 0x3a5   : > { %3440 = vrot.lane.b32.xlu0 %v2654_v35, %s7343_s29  ;;  %3422 = vrot.lane.b32.xlu1 %v9110_v60, %s7343_s29  ;;  %v4023_v35 = vld [vmem:[%s11057_s4 + $0x20] sm:$0xff] }
 0x3a7   : > { %v9385_v34 = vpop.permute.xlu0 %3192  ;;  %v9387_v0 = vpop.permute.xlu1 %3042  ;;  %6563 = vmatpush3.bf16.msra.mxu1 %v6560_v18 }
 0x3a8   : > { %11223 = vst [vmem:[#allocation108_spill] sm:$0xff] %v9385_v34  ;;  %v4024_v34 = vld [vmem:[%s11057_s4 + $0x28] sm:$0xff] }
 0x3a9   : > { %3532 = vrot.lane.b32.xlu0 %v8917_v51, %s7344_s18  ;;  %3426 = vrot.lane.b32.xlu1 %v2647_v52, %s7343_s29  ;;  %v6564_v15 = vpack.c.bf16 %v4024_v34, %v4023_v35  ;;  %v4025_v51 = vld [vmem:[%s11057_s4 + $0x30] sm:$0xff] }
 0x3aa   : > { %v6568_v34 = vpack.c.bf16 %v4026_v56, %v4025_v51  ;;  %v2670_v35 = vld [vmem:[#allocation2 + $0x49] sm:$0xff] }
 0x3ab   : > { %v9398_v19 = vpop.permute.xlu0 %2804  ;;  %v9400_v57 = vpop.permute.xlu1 %3170  ;;  %6565 = vmatprep.subr.bf16.mxu1 %v6564_v15  ;;  %v2655_v51 = vld [vmem:[#allocation2 + $0x110] sm:$0xff] }
 0x3ac   : > { %11224 = vst [vmem:[#allocation109_spill] sm:$0xff] %v9398_v19  ;;  %6567 = vmatpush3.bf16.msra.mxu1 %v6564_v15 }
 0x3ad   : > { %3660 = vrot.lane.b32.xlu0 %v8965_v2, %s7345_s26  ;;  %3430 = vrot.lane.b32.xlu1 %v9058_v39, %s7343_s29  ;;  %v4027_v2 = vld [vmem:[%s11057_s4 + $0x40] sm:$0xff] }
 0x3ae   : > { %6569 = vmatprep.subr.bf16.mxu1 %v6568_v34 }
 0x3af   : > { %v9412_v52 = vpop.permute.xlu0 %3056  ;;  %v9414_v18 = vpop.permute.xlu1 %3298 }
 0x3b0   : > { %11225 = vst [vmem:[#allocation110_spill] sm:$0xff] %v9412_v52  ;;  %6571 = vmatpush3.bf16.msra.mxu1 %v6568_v34  ;;  %v2702_v52 = vld [vmem:[#allocation2 + $0x4a] sm:$0xff] }
 0x3b1   : > { %3536 = vrot.lane.b32.xlu0 %v2670_v35, %s7344_s18  ;;  %3434 = vrot.lane.b32.xlu1 %v8843_v29, %s7343_s29  ;;  %v2674_v35 = vld [vmem:[#allocation2 + $0x79] sm:$0xff] }
 0x3b2   : > { %6506 = vmatprep.subr.mxu1 %v4027_v2 }
 0x3b3   : > { %v9422_v39 = vpop.permute.xlu0 %3184  ;;  %v9424_v19 = vpop.permute.xlu1 %2814 }
 0x3b4   : > { %11226 = vst [vmem:[#allocation111_spill] sm:$0xff] %v9424_v19  ;;  %6507 = vmatpush3.msra.mxu1 %v4027_v2 }
 0x3b5   : > { %3664 = vrot.lane.b32.xlu0 %v2702_v52, %s7345_s26  ;;  %3438 = vrot.lane.b32.xlu1 %v9210_v4, %s7343_s29 }
 0x3b7   : > { %v9429_v15 = vpop.permute.xlu0 %2940  ;;  %v9431_v29 = vpop.permute.xlu1 %2942 }
 0x3b8   : > { %11227 = vst [vmem:[#allocation112_spill] sm:$0xff] %v9429_v15  ;;  %11228 = vst [vmem:[#allocation113_spill] sm:$0xff] %v9431_v29  ;;  %v2671_v29 = vld [vmem:[#allocation2 + $0x51] sm:$0xff]  ;;  %v11259_v15 = vld [vmem:[#allocation80_spill] sm:$0xff] }
 0x3b9   : > { %3540 = vrot.lane.b32.xlu0 %v8889_v14, %s7344_s18  ;;  %3442 = vrot.lane.b32.xlu1 %v2655_v51, %s7343_s29  ;;  %v2706_v51 = vld [vmem:[#allocation2 + $0x7a] sm:$0xff] }
 0x3bb   : > { %v9436_v56 = vpop.permute.xlu0 %2932  ;;  %v9438_v34 = vpop.permute.xlu1 %3066 }
 0x3bc   : > { %11229 = vst [vmem:[#allocation114_spill] sm:$0xff] %v9438_v34  ;;  %v2691_v34 = vld [vmem:[#allocation2 + $0x141] sm:$0xff] }
 0x3bd   : > { %3668 = vrot.lane.b32.xlu0 %v8943_v3, %s7345_s26  ;;  %3534 = vrot.lane.b32.xlu1 %v8985_v54, %s7344_s18 }
 0x3bf   : > { %v9444_v4 = vpop.permute.xlu0 %3080  ;;  %v9446_v52 = vpop.permute.xlu1 %3194 }
 0x3c0   : > { %11230 = vst [vmem:[#allocation115_spill] sm:$0xff] %v9444_v4  ;;  %11231 = vst [vmem:[#allocation116_spill] sm:$0xff] %v9446_v52  ;;  %v2703_v4 = vld [vmem:[#allocation2 + $0x52] sm:$0xff]  ;;  %v2662_v52 = vld [vmem:[#allocation2 + $0x168] sm:$0xff] }
 0x3c1   : > { %3544 = vrot.lane.b32.xlu0 %v2674_v35, %s7344_s18  ;;  %3662 = vrot.lane.b32.xlu1 %v8996_v58, %s7345_s26 }
 0x3c3   : > { %v9451_v14 = vpop.permute.xlu0 %3208  ;;  %v9453_v2 = vpop.permute.xlu1 %2806 }
 0x3c4   : > { %11232 = vst [vmem:[#allocation117_spill] sm:$0xff] %v9451_v14  ;;  %v2678_v14 = vld [vmem:[#allocation2 + $0xa9] sm:$0xff] }
 0x3c5   : > { %3672 = vrot.lane.b32.xlu0 %v2706_v51, %s7345_s26  ;;  %3538 = vrot.lane.b32.xlu1 %v2671_v29, %s7344_s18 }
 0x3c7   : > { %v9457_v3 = vpop.permute.xlu0 %2820  ;;  %v9459_v54 = vpop.permute.xlu1 %2934 }
 0x3c8   : > { %11233 = vst [vmem:[#allocation118_spill] sm:$0xff] %v9457_v3  ;;  %v2710_v3 = vld [vmem:[#allocation2 + $0xaa] sm:$0xff] }
 0x3c9   : > { %3548 = vrot.lane.b32.xlu0 %v9016_v43, %s7344_s18  ;;  %3666 = vrot.lane.b32.xlu1 %v2703_v4, %s7345_s26 }
 0x3cb   : > { %v9464_v58 = vpop.permute.xlu0 %3072  ;;  %v9466_v35 = vpop.permute.xlu1 %3058 }
 0x3cc   : > { %11234 = vst [vmem:[#allocation119_spill] sm:$0xff] %v9464_v58  ;;  %v2675_v58 = vld [vmem:[#allocation2 + $0x81] sm:$0xff] }
 0x3cd   : > { %3676 = vrot.lane.b32.xlu0 %v9068_v59, %s7345_s26  ;;  %3542 = vrot.lane.b32.xlu1 %v8933_v25, %s7344_s18 }
 0x3cf   : > { %v9472_v29 = vpop.permute.xlu0 %3200  ;;  %v9474_v51 = vpop.permute.xlu1 %3186 }
 0x3d0   : > { %11235 = vst [vmem:[#allocation120_spill] sm:$0xff] %v9472_v29  ;;  %v2707_v29 = vld [vmem:[#allocation2 + $0x82] sm:$0xff] }
 0x3d1   : > { %3552 = vrot.lane.b32.xlu0 %v2678_v14, %s7344_s18  ;;  %3670 = vrot.lane.b32.xlu1 %v8945_v61, %s7345_s26 }
 0x3d3   : > { %v9479_v43 = vpop.permute.xlu0 %2948  ;;  %v9481_v4 = vpop.permute.xlu1 %3082 }
 0x3d4   : > { %11236 = vst [vmem:[#allocation121_spill] sm:$0xff] %v9479_v43  ;;  %11237 = vst [vmem:[#allocation122_spill] sm:$0xff] %v9481_v4  ;;  %v2714_v4 = vld [vmem:[#allocation2 + $0xda] sm:$0xff]  ;;  %v2687_v43 = vld [vmem:[#allocation2 + $0x111] sm:$0xff] }
 0x3d5   : > { %3680 = vrot.lane.b32.xlu0 %v2710_v3, %s7345_s26  ;;  %3546 = vrot.lane.b32.xlu1 %v2675_v58, %s7344_s18 }
 0x3d7   : > { %v9485_v25 = vpop.permute.xlu0 %3312  ;;  %v9487_v59 = vpop.permute.xlu1 %3210 }
 0x3d8   : > { %11238 = vst [vmem:[#allocation123_spill] sm:$0xff] %v9487_v59  ;;  %v2682_v59 = vld [vmem:[#allocation2 + $0xd9] sm:$0xff] }
 0x3d9   : > { %3556 = vrot.lane.b32.xlu0 %v8983_v27, %s7344_s18  ;;  %3674 = vrot.lane.b32.xlu1 %v2707_v29, %s7345_s26 }
 0x3db   : > { %v9492_v61 = vpop.permute.xlu0 %3316  ;;  %v9494_v14 = vpop.permute.xlu1 %2822 }
 0x3dc   : > { %11239 = vst [vmem:[#allocation124_spill] sm:$0xff] %v9494_v14  ;;  %v2679_v14 = vld [vmem:[#allocation2 + $0xb1] sm:$0xff] }
 0x3dd   : > { %3684 = vrot.lane.b32.xlu0 %v9046_v49, %s7345_s26  ;;  %3550 = vrot.lane.b32.xlu1 %v9088_v24, %s7344_s18 }
 0x3df   : > { %v9500_v3 = vpop.permute.xlu0 %3320  ;;  %v9502_v58 = vpop.permute.xlu1 %2950 }
 0x3e0   : > { %11240 = vst [vmem:[#allocation125_spill] sm:$0xff] %v9502_v58  ;;  %v2711_v58 = vld [vmem:[#allocation2 + $0xb2] sm:$0xff] }
 0x3e1   : > { %3560 = vrot.lane.b32.xlu0 %v2682_v59, %s7344_s18  ;;  %3678 = vrot.lane.b32.xlu1 %v9100_v26, %s7345_s26 }
 0x3e3   : > { %v9507_v27 = vpop.permute.xlu0 %3324  ;;  %v9509_v29 = vpop.permute.xlu1 %3074 }
 0x3e4   : > { %11241 = vst [vmem:[#allocation126_spill] sm:$0xff] %v9507_v27  ;;  %11242 = vst [vmem:[#allocation127_spill] sm:$0xff] %v9509_v29  ;;  %v2683_v29 = vld [vmem:[#allocation2 + $0xe1] sm:$0xff] }
 0x3e5   : > { %3688 = vrot.lane.b32.xlu0 %v2714_v4, %s7345_s26  ;;  %3554 = vrot.lane.b32.xlu1 %v2679_v14, %s7344_s18 }
 0x3e7   : > { %v9513_v24 = vpop.permute.xlu0 %3328  ;;  %v9515_v49 = vpop.permute.xlu1 %3202 }
 0x3e8   : > { %11243 = vst [vmem:[#allocation128_spill] sm:$0xff] %v9513_v24  ;;  %11244 = vst [vmem:[#allocation129_spill] sm:$0xff] %v9515_v49  ;;  %v2686_v49 = vld [vmem:[#allocation2 + $0x109] sm:$0xff]  ;;  %v2719_v24 = vld [vmem:[#allocation2 + $0x112] sm:$0xff] }
 0x3e9   : > { %3564 = vrot.lane.b32.xlu0 %v9120_v32, %s7344_s18  ;;  %3682 = vrot.lane.b32.xlu1 %v2711_v58, %s7345_s26 }
 0x3eb   : > { %v9520_v26 = vpop.permute.xlu0 %3332  ;;  %v9522_v59 = vpop.permute.xlu1 %3314 }
 0x3ec   : > { %11245 = vst [vmem:[#allocation130_spill] sm:$0xff] %v9520_v26  ;;  %v2718_v26 = vld [vmem:[#allocation2 + $0x10a] sm:$0xff] }
 0x3ed   : > { %3692 = vrot.lane.b32.xlu0 %v9162_v45, %s7345_s26  ;;  %3558 = vrot.lane.b32.xlu1 %v9036_v62, %s7344_s18 }
 0x3ef   : > { %v9528_v4 = vpop.permute.xlu0 %3336  ;;  %v9530_v14 = vpop.permute.xlu1 %3318 }
 0x3f0   : > { %11246 = vst [vmem:[#allocation131_spill] sm:$0xff] %v9528_v4  ;;  %v2715_v4 = vld [vmem:[#allocation2 + $0xe2] sm:$0xff] }
 0x3f1   : > { %3568 = vrot.lane.b32.xlu0 %v2686_v49, %s7344_s18  ;;  %3686 = vrot.lane.b32.xlu1 %v9048_v13, %s7345_s26 }
 0x3f3   : > { %v9535_v32 = vpop.permute.xlu0 %3404  ;;  %v9537_v58 = vpop.permute.xlu1 %3322 }
 0x3f4   : > { %11247 = vst [vmem:[#allocation132_spill] sm:$0xff] %v9537_v58 }
 0x3f5   : > { %3696 = vrot.lane.b32.xlu0 %v2718_v26, %s7345_s26  ;;  %3562 = vrot.lane.b32.xlu1 %v2683_v29, %s7344_s18 }
 0x3f7   : > { %v9541_v45 = vpop.permute.xlu0 %3408  ;;  %v9543_v62 = vpop.permute.xlu1 %3326 }
 0x3f8   : > { %11248 = vst [vmem:[#allocation133_spill] sm:$0xff] %v9543_v62  ;;  %v2443_v62 = vld [vmem:[#allocation2] sm:$0xff] }
 0x3f9   : > { %3444 = vrot.lane.b32.xlu0 %v9098_v31, %s7343_s29  ;;  %3690 = vrot.lane.b32.xlu1 %v2715_v4, %s7345_s26 }
 0x3fb   : > { %v9548_v13 = vpop.permute.xlu0 %3412  ;;  %v9550_v49 = vpop.permute.xlu1 %3330 }
 0x3fc   : > { %11249 = vst [vmem:[#allocation134_spill] sm:$0xff] %v9550_v49  ;;  %v2658_v49 = vld [vmem:[#allocation2 + $0x138] sm:$0xff] }
 0x3fd   : > { %3572 = vrot.lane.b32.xlu0 %v9086_v10, %s7344_s18  ;;  %3566 = vrot.lane.b32.xlu1 %v9186_v36, %s7344_s18 }
 0x3ff   : > { %v9556_v29 = vpop.permute.xlu0 %3416  ;;  %v9558_v26 = vpop.permute.xlu1 %3334 }
 0x400   : > { %11250 = vst [vmem:[#allocation135_spill] sm:$0xff] %v9558_v26  ;;  %v2690_v26 = vld [vmem:[#allocation2 + $0x139] sm:$0xff] }
 0x401   : > { %3700 = vrot.lane.b32.xlu0 %v9150_v33, %s7345_s26  ;;  %3694 = vrot.lane.b32.xlu1 %v9198_v37, %s7345_s26 }
 0x403   : > { %v9564_v31 = vpop.permute.xlu0 %3420  ;;  %v9566_v4 = vpop.permute.xlu1 %3338 }
 0x404   : > { %11251 = vst [vmem:[#allocation136_spill] sm:$0xff] %v9566_v4  ;;  %v2722_v4 = vld [vmem:[#allocation2 + $0x13a] sm:$0xff] }
 0x405   : > { %3448 = vrot.lane.b32.xlu0 %v2658_v49, %s7343_s29  ;;  %3570 = vrot.lane.b32.xlu1 %v2687_v43, %s7344_s18 }
 0x407   : > { %v9570_v36 = vpop.permute.xlu0 %3424  ;;  %v9572_v10 = vpop.permute.xlu1 %3406 }
 0x409   : > { %3576 = vrot.lane.b32.xlu0 %v2690_v26, %s7344_s18  ;;  %3698 = vrot.lane.b32.xlu1 %v2719_v24, %s7345_s26 }
 0x40b   : > { %v9576_v37 = vpop.permute.xlu0 %3428  ;;  %v9578_v33 = vpop.permute.xlu1 %3410 }
 0x40d   : > { %3704 = vrot.lane.b32.xlu0 %v2722_v4, %s7345_s26  ;;  %3446 = vrot.lane.b32.xlu1 %v9164_v30, %s7343_s29  ;;  %v11252_v30 = vld [vmem:[#allocation15_spill] sm:$0xff] }
 0x40e   : > { %v3756_v4 = vsel %vm342_vm0, %v2443_v62, %v11252_v30 }
 0x40f   : > { %v9583_v43 = vpop.permute.xlu0 %3432  ;;  %v9585_v49 = vpop.permute.xlu1 %3414 }
 0x411   : > { %3452 = vrot.lane.b32.xlu0 %v9208_v41, %s7343_s29  ;;  %3574 = vrot.lane.b32.xlu1 %v9140_v47, %s7344_s18  ;;  %v2659_v47 = vld [vmem:[#allocation2 + $0x140] sm:$0xff] }
 0x413   : > { %v9591_v24 = vpop.permute.xlu0 %3436  ;;  %v9593_v26 = vpop.permute.xlu1 %3418 }
 0x415   : > { %3580 = vrot.lane.b32.xlu0 %v9196_v38, %s7344_s18  ;;  %3702 = vrot.lane.b32.xlu1 %v9152_v11, %s7345_s26  ;;  %v11253_v38 = vld [vmem:[#allocation18_spill] sm:$0xff] }
 0x416   : > { %v3789_v27 = vsel %vm3788_vm5, %v3756_v4, %v11253_v38 }
 0x417   : > { %v9601_v19 = vpop.permute.xlu0 %3440  ;;  %v9603_v41 = vpop.permute.xlu1 %3422  ;;  %v3822_v11 = vsel %vm3821_vm6, %v3789_v27, %v8839_v12 }
 0x418   : > { %v3855_v58 = vsel %vm3854_vm7, %v3822_v11, %v8848_v55  ;;  %v2694_v55 = vld [vmem:[#allocation2 + $0x169] sm:$0xff] }
 0x419   : > { %3708 = vrot.lane.b32.xlu0 %v9228_v17, %s7345_s26  ;;  %3450 = vrot.lane.b32.xlu1 %v2659_v47, %s7343_s29  ;;  %v3888_v17 = vsel %vm3887_vm8, %v3855_v58, %v8878_v22  ;;  %v2723_v22 = vld [vmem:[#allocation2 + $0x142] sm:$0xff] }
 0x41a   : > { %v3921_v12 = vsel %vm3920_vm9, %v3888_v17, %v9535_v32  ;;  %v2726_v32 = vld [vmem:[#allocation2 + $0x16a] sm:$0xff]  ;;  %v11254_v17 = vld [vmem:[#allocation16_spill] sm:$0xff] }
 0x41b   : > { %v3533_v62 = vpop.permute.xlu0 %3532  ;;  %v9612_v30 = vpop.permute.xlu1 %3426 }
 0x41c   : > { %v3954_v27 = vsel %vm3953_vm10, %v3921_v12, %v3533_v62  ;;  %v2444_v62 = vld [vmem:[#allocation2 + $0x8] sm:$0xff] }
 0x41d   : > { %3456 = vrot.lane.b32.xlu0 %v2662_v52, %s7343_s29  ;;  %3578 = vrot.lane.b32.xlu1 %v2691_v34, %s7344_s18  ;;  %v3757_v12 = vsel %vm342_vm0, %v2444_v62, %v11254_v17  ;;  %v11256_v17 = vld [vmem:[#allocation76_spill] sm:$0xff] }
 0x41f   : > { %v3661_v4 = vpop.permute.xlu0 %3660  ;;  %v9623_v47 = vpop.permute.xlu1 %3430 }
 0x420   : > { %v3987_v38 = vsel %vm3986_vm11, %v3954_v27, %v3661_v4 }
 0x421   : > { %3584 = vrot.lane.b32.xlu0 %v2694_v55, %s7344_s18  ;;  %6508 = vmatprep.mubr.msk.f32.mxu1 %vm4035_vm12, %v3987_v38  ;;  %v7287_v38 = vld [vmem:[#allocation2 + $0x18] sm:$0xff] }
 0x422   : > { %3706 = vrot.lane.b32.xlu1 %v2723_v22, %s7345_s26  ;;  %v3758_v22 = vsel %vm342_vm0, %v7287_v38, %v8834_v6  ;;  %v11258_v38 = vld [vmem:[#allocation23_spill] sm:$0xff] }
 0x423   : > { %v3537_v34 = vpop.permute.xlu0 %3536  ;;  %v9629_v52 = vpop.permute.xlu1 %3434 }
 0x425   : > { %3712 = vrot.lane.b32.xlu0 %v2726_v32, %s7345_s26 }
 0x426   : > { %3454 = vrot.lane.b32.xlu1 %v9264_v21, %s7343_s29  ;;  %v11255_v21 = vld [vmem:[#allocation20_spill] sm:$0xff] }
 0x427   : > { %v3665_v58 = vpop.permute.xlu0 %3664  ;;  %v9634_v11 = vpop.permute.xlu1 %3438  ;;  %v3790_v55 = vsel %vm3788_vm5, %v3757_v12, %v11255_v21  ;;  %v3760_v12 = vsel %vm342_vm0, %v8925_v40, %v11256_v17  ;;  %v11257_v21 = vld [vmem:[#allocation78_spill] sm:$0xff] }
 0x428   : > { %v11261_v17 = vld [vmem:[#allocation6_spill] sm:$0xff] }
 0x429   : > { %3460 = vrot.lane.b32.xlu0 %v9174_v44, %s7343_s29  ;;  %v3823_v44 = vsel %vm3821_vm6, %v3790_v55, %v8905_v5  ;;  %v3793_v5 = vsel %vm3788_vm5, %v3760_v12, %v9260_v48  ;;  %v11260_v55 = vld [vmem:[#allocation87_spill] sm:$0xff] }
 0x42a   : > { %3582 = vrot.lane.b32.xlu1 %v9244_v7, %s7344_s18  ;;  %v3791_v7 = vsel %vm3788_vm5, %v3758_v22, %v8866_v23 }
 0x42b   : > { %v3541_v27 = vpop.permute.xlu0 %3540  ;;  %v9642_v4 = vpop.permute.xlu1 %3442  ;;  %v3824_v6 = vsel %vm3821_vm6, %v3791_v7, %v11257_v21  ;;  %v2666_v7 = vld [vmem:[#allocation2 + $0x198] sm:$0xff] }
 0x42c   : > { %v3857_v23 = vsel %vm3854_vm7, %v3824_v6, %v11259_v15  ;;  %v7288_v6 = vld [vmem:[#allocation2 + $0x20] sm:$0xff] }
 0x42d   : > { %3588 = vrot.lane.b32.xlu0 %v9184_v20, %s7344_s18  ;;  %v3856_v20 = vsel %vm3854_vm7, %v3823_v44, %v8915_v16  ;;  %v2663_v16 = vld [vmem:[#allocation2 + $0x170] sm:$0xff]  ;;  %v3890_v22 = vsel %vm3887_vm8, %v3857_v23, %v11260_v55 }
 0x42e   : > { %3710 = vrot.lane.b32.xlu1 %v9254_v42, %s7345_s26  ;;  %v3889_v42 = vsel %vm3887_vm8, %v3856_v20, %v11258_v38  ;;  %v3923_v44 = vsel %vm3920_vm9, %v3890_v22, %v9541_v45  ;;  %v2695_v45 = vld [vmem:[#allocation2 + $0x171] sm:$0xff] }
 0x42f   : > { %v3669_v32 = vpop.permute.xlu0 %3668  ;;  %v3535_v62 = vpop.permute.xlu1 %3534  ;;  %v3922_v40 = vsel %vm3920_vm9, %v3889_v42, %v9572_v10  ;;  %v3956_v12 = vsel %vm3953_vm10, %v3923_v44, %v3537_v34  ;;  %v11262_v10 = vld [vmem:[#allocation17_spill] sm:$0xff]  ;;  %v2698_v34 = vld [vmem:[#allocation2 + $0x199] sm:$0xff]  ;;  %v11265_v55 = vld [vmem:[#allocation94_spill] sm:$0xff] }
 0x430   : > { %v3955_v15 = vsel %vm3953_vm10, %v3922_v40, %v3535_v62  ;;  %v3759_v38 = vsel %vm342_vm0, %v7288_v6, %v11262_v10  ;;  %v3989_v42 = vsel %vm3986_vm11, %v3956_v12, %v3665_v58  ;;  %v11263_v62 = vld [vmem:[#allocation10_spill] sm:$0xff]  ;;  %v11266_v22 = vld [vmem:[#allocation11_spill] sm:$0xff] }
 0x431   : > { %3716 = vrot.lane.b32.xlu0 %v9290_v1, %s7345_s26  ;;  %v3826_v1 = vsel %vm3821_vm6, %v3793_v5, %v11261_v17  ;;  %v3792_v23 = vsel %vm3788_vm5, %v3759_v38, %v11263_v62  ;;  %v11264_v5 = vld [vmem:[#allocation90_spill] sm:$0xff]  ;;  %v11268_v17 = vld [vmem:[#allocation96_spill] sm:$0xff] }
 0x432   : > { %3458 = vrot.lane.b32.xlu1 %v2663_v16, %s7343_s29  ;;  %v3761_v16 = vsel %vm342_vm0, %v9006_v53, %v11264_v5  ;;  %v3825_v58 = vsel %vm3821_vm6, %v3792_v23, %v11265_v55  ;;  %v3859_v40 = vsel %vm3854_vm7, %v3826_v1, %v11266_v22  ;;  %v2727_v53 = vld [vmem:[#allocation2 + $0x172] sm:$0xff]  ;;  %v2730_v38 = vld [vmem:[#allocation2 + $0x19a] sm:$0xff] }
 0x433   : > { %v9679_v20 = vpop.permute.xlu0 %3544  ;;  %v3663_v48 = vpop.permute.xlu1 %3662  ;;  %v3858_v12 = vsel %vm3854_vm7, %v3825_v58, %v11268_v17  ;;  %v11269_v6 = vld [vmem:[#allocation14_spill] sm:$0xff]  ;;  %v7289_v58 = vld [vmem:[#allocation2 + $0x48] sm:$0xff]  ;;  %v11271_v22 = vld [vmem:[#allocation4_spill] sm:$0xff] }
 0x434   : > { %v3988_v21 = vsel %vm3986_vm11, %v3955_v15, %v3663_v48  ;;  %v11267_v15 = vld [vmem:[#allocation92_spill] sm:$0xff]  ;;  %v3892_v10 = vsel %vm3887_vm8, %v3859_v40, %v11269_v6  ;;  %v3762_v40 = vsel %vm342_vm0, %v7289_v58, %v11271_v22 }
 0x435   : > { %3464 = vrot.lane.b32.xlu0 %v2666_v7, %s7343_s29  ;;  %6509 = vmatmul.mubr.msk.f32.vlgmr.msra.gmra.mrb[0].mxu1 %vm4035_vm12, %v3988_v21  ;;  %v3794_v48 = vsel %vm3788_vm5, %v3761_v16, %v11267_v15  ;;  %v3891_v21 = vsel %vm3887_vm8, %v3858_v12, %v9313_v28  ;;  %v3925_v62 = vsel %vm3920_vm9, %v3892_v10, %v9548_v13  ;;  %v11272_v13 = vld [vmem:[#allocation5_spill] sm:$0xff]  ;;  %v7290_v17 = vld [vmem:[#allocation2 + $0x60] sm:$0xff]  ;;  %v11274_v12 = vld [vmem:[#allocation70_spill] sm:$0xff] }
 0x436   : > { %3586 = vrot.lane.b32.xlu1 %v2695_v45, %s7344_s18  ;;  %6511 = vmatprep.mubr.msk.f32.mxu1 %vm4035_vm12, %v3989_v42  ;;  %v3924_v1 = vsel %vm3920_vm9, %v3891_v21, %v9578_v33  ;;  %v11270_v42 = vld [vmem:[#allocation13_spill] sm:$0xff]  ;;  %v3958_v5 = vsel %vm3953_vm10, %v3925_v62, %v3541_v27  ;;  %v11273_v27 = vld [vmem:[#allocation8_spill] sm:$0xff]  ;;  %v3764_v21 = vsel %vm342_vm0, %v7290_v17, %v11274_v12  ;;  %v11276_v10 = vld [vmem:[#allocation74_spill] sm:$0xff] }
 0x437   : > { %v3673_v7 = vpop.permute.xlu0 %3672  ;;  %v3539_v44 = vpop.permute.xlu1 %3538  ;;  %v3827_v45 = vsel %vm3821_vm6, %v3794_v48, %v11270_v42  ;;  %v3991_v55 = vsel %vm3986_vm11, %v3958_v5, %v3669_v32  ;;  %v2665_v33 = vld [vmem:[#allocation2 + $0x188] sm:$0xff]  ;;  %v3795_v15 = vsel %vm3788_vm5, %v3762_v40, %v11273_v27  ;;  %v11281_v17 = vld [vmem:[#allocation12_spill] sm:$0xff] }
 0x438   : > { %v3957_v28 = vsel %vm3953_vm10, %v3924_v1, %v3539_v44  ;;  %v3860_v44 = vsel %vm3854_vm7, %v3827_v45, %v11272_v13  ;;  %v11278_v45 = vld [vmem:[#allocation9_spill] sm:$0xff] }
 0x439   : > { %3592 = vrot.lane.b32.xlu0 %v2698_v34, %s7344_s18  ;;  %v3893_v62 = vsel %vm3887_vm8, %v3860_v44, %v11278_v45  ;;  %v11280_v40 = vld [vmem:[#allocation25_spill] sm:$0xff]  ;;  %v2667_v45 = vld [vmem:[#allocation2 + $0x1a0] sm:$0xff] }
 0x43a   : > { %3714 = vrot.lane.b32.xlu1 %v2727_v53, %s7345_s26  ;;  %v11275_v53 = vld [vmem:[#allocation72_spill] sm:$0xff] }
 0x43b   : > { %v3549_v23 = vpop.permute.xlu0 %3548  ;;  %v3667_v34 = vpop.permute.xlu1 %3666  ;;  %v3828_v6 = vsel %vm3821_vm6, %v3795_v15, %v11275_v53  ;;  %v7291_v15 = vld [vmem:[#allocation2 + $0x50] sm:$0xff] }
 0x43c   : > { %v3990_v16 = vsel %vm3986_vm11, %v3957_v28, %v3667_v34  ;;  %v3861_v1 = vsel %vm3854_vm7, %v3828_v6, %v11276_v10  ;;  %v2697_v28 = vld [vmem:[#allocation2 + $0x189] sm:$0xff]  ;;  %v11279_v34 = vld [vmem:[#allocation84_spill] sm:$0xff] }
 0x43d   : > { %3720 = vrot.lane.b32.xlu0 %v2730_v38, %s7345_s26  ;;  %6512 = vmatmul.mubr.msk.f32.gmra.mrb[2].mxu1 %vm4035_vm12, %v3990_v16  ;;  %v11277_v38 = vld [vmem:[#allocation82_spill] sm:$0xff]  ;;  %v3894_v5 = vsel %vm3887_vm8, %v3861_v1, %v11279_v34  ;;  %v3926_v16 = vsel %vm3920_vm9, %v3893_v62, %v9585_v49  ;;  %v3763_v49 = vsel %vm342_vm0, %v7291_v15, %v11281_v17  ;;  %v11284_v6 = vld [vmem:[#allocation85_spill] sm:$0xff]  ;;  %v11285_v1 = vld [vmem:[#allocation27_spill] sm:$0xff] }
 0x43e   : > { %3462 = vrot.lane.b32.xlu1 %v2665_v33, %s7343_s29  ;;  %6514 = vmatprep.mubr.msk.f32.mxu1 %vm4035_vm12, %v3991_v55  ;;  %v3797_v42 = vsel %vm3788_vm5, %v3764_v21, %v11277_v38  ;;  %v3927_v55 = vsel %vm3920_vm9, %v3894_v5, %v9556_v29  ;;  %v11282_v29 = vld [vmem:[#allocation7_spill] sm:$0xff]  ;;  %v7292_v21 = vld [vmem:[#allocation2 + $0x68] sm:$0xff]  ;;  %v11287_v34 = vld [vmem:[#allocation86_spill] sm:$0xff] }
 0x43f   : > { %v3677_v32 = vpop.permute.xlu0 %3676  ;;  %v3543_v48 = vpop.permute.xlu1 %3542  ;;  %v3830_v13 = vsel %vm3821_vm6, %v3797_v42, %v11280_v40  ;;  %v3960_v44 = vsel %vm3953_vm10, %v3927_v55, %v9679_v20  ;;  %v11283_v20 = vld [vmem:[#allocation81_spill] sm:$0xff]  ;;  %v11286_v62 = vld [vmem:[#allocation83_spill] sm:$0xff]  ;;  %v11288_v5 = vld [vmem:[#allocation88_spill] sm:$0xff] }
 0x440   : > { %v3959_v33 = vsel %vm3953_vm10, %v3926_v16, %v3543_v48  ;;  %v3993_v12 = vsel %vm3986_vm11, %v3960_v44, %v3673_v7  ;;  %v3796_v48 = vsel %vm3788_vm5, %v3763_v49, %v11282_v29  ;;  %v3765_v53 = vsel %vm342_vm0, %v7292_v21, %v11283_v20  ;;  %v11289_v55 = vld [vmem:[#allocation35_spill] sm:$0xff]  ;;  %v11290_v40 = vld [vmem:[#allocation41_spill] sm:$0xff]  ;;  %v11291_v21 = vld [vmem:[#allocation24_spill] sm:$0xff] }
 0x441   : > { %v3829_v10 = vsel %vm3821_vm6, %v3796_v48, %v11284_v6  ;;  %v3863_v7 = vsel %vm3854_vm7, %v3830_v13, %v11285_v1  ;;  %v2699_v49 = vld [vmem:[#allocation2 + $0x1a1] sm:$0xff] }
 0x442   : > { %3590 = vrot.lane.b32.xlu1 %v2697_v28, %s7344_s18  ;;  %v3798_v28 = vsel %vm3788_vm5, %v3765_v53, %v11286_v62  ;;  %v11292_v53 = vld [vmem:[#allocation43_spill] sm:$0xff]  ;;  %v11293_v6 = vld [vmem:[#allocation33_spill] sm:$0xff] }
 0x443   : > { %v3553_v58 = vpop.permute.xlu0 %3552  ;;  %v3671_v22 = vpop.permute.xlu1 %3670  ;;  %v3831_v13 = vsel %vm3821_vm6, %v3798_v28, %v11290_v40  ;;  %v11295_v62 = vld [vmem:[#allocation97_spill] sm:$0xff] }
 0x444   : > { %v3992_v27 = vsel %vm3986_vm11, %v3959_v33, %v3671_v22  ;;  %v3896_v33 = vsel %vm3887_vm8, %v3863_v7, %v11289_v55  ;;  %v2731_v7 = vld [vmem:[#allocation2 + $0x1a2] sm:$0xff] }
 0x445   : > { %6515 = vmatmul.mubr.msk.f32.gmra.mrb[4].mxu1 %vm4035_vm12, %v3992_v27  ;;  %v3929_v44 = vsel %vm3920_vm9, %v3896_v33, %v9564_v31  ;;  %v3864_v31 = vsel %vm3854_vm7, %v3831_v13, %v11292_v53 }
 0x446   : > { %3718 = vrot.lane.b32.xlu1 %v9330_v63, %s7345_s26  ;;  %6517 = vmatprep.mubr.msk.f32.mxu1 %vm4035_vm12, %v3993_v12  ;;  %v3862_v63 = vsel %vm3854_vm7, %v3829_v10, %v11287_v34  ;;  %v3962_v12 = vsel %vm3953_vm10, %v3929_v44, %v3549_v23  ;;  %v11297_v44 = vld [vmem:[#allocation21_spill] sm:$0xff] }
 0x447   : > { %v3681_v38 = vpop.permute.xlu0 %3680  ;;  %v3547_v42 = vpop.permute.xlu1 %3546  ;;  %v3895_v16 = vsel %vm3887_vm8, %v3862_v63, %v11288_v5  ;;  %v3995_v48 = vsel %vm3986_vm11, %v3962_v12, %v3677_v32  ;;  %v7294_v32 = vld [vmem:[#allocation2 + $0x90] sm:$0xff]  ;;  %v11296_v5 = vld [vmem:[#allocation45_spill] sm:$0xff] }
 0x448   : > { %v3928_v22 = vsel %vm3920_vm9, %v3895_v16, %v9593_v26  ;;  %v7293_v26 = vld [vmem:[#allocation2 + $0x78] sm:$0xff]  ;;  %v3897_v16 = vsel %vm3887_vm8, %v3864_v31, %v11296_v5  ;;  %v11305_v5 = vld [vmem:[#allocation32_spill] sm:$0xff] }
 0x449   : > { %v3961_v27 = vsel %vm3953_vm10, %v3928_v22, %v3547_v42  ;;  %v3766_v20 = vsel %vm342_vm0, %v7293_v26, %v11291_v21  ;;  %v11294_v42 = vld [vmem:[#allocation95_spill] sm:$0xff]  ;;  %v3930_v33 = vsel %vm3920_vm9, %v3897_v16, %v9603_v41  ;;  %v11300_v26 = vld [vmem:[#allocation22_spill] sm:$0xff] }
 0x44a   : > { %3466 = vrot.lane.b32.xlu1 %v2667_v45, %s7343_s29  ;;  %v3799_v23 = vsel %vm3788_vm5, %v3766_v20, %v11293_v6  ;;  %v3768_v45 = vsel %vm342_vm0, %v7294_v32, %v11294_v42 }
 0x44b   : > { %v3557_v15 = vpop.permute.xlu0 %3556  ;;  %v3675_v17 = vpop.permute.xlu1 %3674  ;;  %v3832_v28 = vsel %vm3821_vm6, %v3799_v23, %v11295_v62  ;;  %v3801_v63 = vsel %vm3788_vm5, %v3768_v45, %v9343_v8 }
 0x44c   : > { %v3994_v29 = vsel %vm3986_vm11, %v3961_v27, %v3675_v17  ;;  %v3865_v34 = vsel %vm3854_vm7, %v3832_v28, %v9319_v9  ;;  %v3834_v8 = vsel %vm3821_vm6, %v3801_v63, %v11297_v44 }
 0x44d   : > { %6518 = vmatmul.mubr.msk.f32.gmra.mrb[6].mxu1 %vm4035_vm12, %v3994_v29  ;;  %v3898_v55 = vsel %vm3887_vm8, %v3865_v34, %v9350_v46  ;;  %v7295_v46 = vld [vmem:[#allocation2 + $0x80] sm:$0xff]  ;;  %v3867_v21 = vsel %vm3854_vm7, %v3834_v8, %v11300_v26  ;;  %v7296_v34 = vld [vmem:[#allocation2 + $0xa8] sm:$0xff] }
 0x44e   : > { %3594 = vrot.lane.b32.xlu1 %v2699_v49, %s7344_s18  ;;  %6520 = vmatprep.mubr.msk.f32.mxu1 %vm4035_vm12, %v3995_v48  ;;  %v3931_v22 = vsel %vm3920_vm9, %v3898_v55, %v9570_v36  ;;  %v11298_v49 = vld [vmem:[#allocation37_spill] sm:$0xff]  ;;  %v11299_v36 = vld [vmem:[#allocation39_spill] sm:$0xff]  ;;  %v3769_v48 = vsel %vm342_vm0, %v9110_v60, %v9360_v50  ;;  %s7347_s18 = smov 20  }
 0x44f   : > { %v3685_v10 = vpop.permute.xlu0 %3684  ;;  %v3551_v1 = vpop.permute.xlu1 %3550  ;;  %v3964_v27 = vsel %vm3953_vm10, %v3931_v22, %v3553_v58  ;;  %v3767_v41 = vsel %vm342_vm0, %v7295_v46, %v11298_v49  ;;  %v7297_v22 = vld [vmem:[#allocation2 + $0xc0] sm:$0xff]  ;;  %v11309_v8 = vld [vmem:[#allocation93_spill] sm:$0xff]  ;;  %v11311_v49 = vld [vmem:[#allocation34_spill] sm:$0xff] }
 0x450   : > { %v3963_v40 = vsel %vm3953_vm10, %v3930_v33, %v3551_v1  ;;  %v3997_v12 = vsel %vm3986_vm11, %v3964_v27, %v3681_v38  ;;  %v3800_v29 = vsel %vm3788_vm5, %v3767_v41, %v11299_v36  ;;  %v11301_v38 = vld [vmem:[#allocation107_spill] sm:$0xff] }
 0x451   : > { %v3833_v58 = vsel %vm3821_vm6, %v3800_v29, %v9387_v0  ;;  %v3802_v31 = vsel %vm3788_vm5, %v3769_v48, %v11301_v38  ;;  %v11302_v1 = vld [vmem:[#allocation31_spill] sm:$0xff]  ;;  %v11303_v0 = vld [vmem:[#allocation30_spill] sm:$0xff] }
 0x452   : > { %3722 = vrot.lane.b32.xlu1 %v2731_v7, %s7345_s26  ;;  %v3866_v6 = vsel %vm3854_vm7, %v3833_v58, %v9400_v57  ;;  %v3900_v60 = vsel %vm3887_vm8, %v3867_v21, %v11302_v1  ;;  %v3835_v7 = vsel %vm3821_vm6, %v3802_v31, %v11303_v0  ;;  %v11314_v1 = vld [vmem:[#allocation26_spill] sm:$0xff]  ;;  %v7299_v0 = vld [vmem:[#allocation2 + $0xc8] sm:$0xff] }
 0x453   : > { %v3561_v9 = vpop.permute.xlu0 %3560  ;;  %v3679_v13 = vpop.permute.xlu1 %3678  ;;  %v3899_v23 = vsel %vm3887_vm8, %v3866_v6, %v9414_v18  ;;  %v3933_v32 = vsel %vm3920_vm9, %v3900_v60, %v9576_v37  ;;  %v3868_v16 = vsel %vm3854_vm7, %v3835_v7, %v11305_v5  ;;  %v11306_v37 = vld [vmem:[#allocation29_spill] sm:$0xff]  ;;  %v11316_v7 = vld [vmem:[#allocation98_spill] sm:$0xff]  ;;  %v11321_v5 = vld [vmem:[#allocation104_spill] sm:$0xff] }
 0x454   : > { %v3996_v17 = vsel %vm3986_vm11, %v3963_v40, %v3679_v13  ;;  %v3932_v50 = vsel %vm3920_vm9, %v3899_v23, %v9612_v30  ;;  %v3966_v57 = vsel %vm3953_vm10, %v3933_v32, %v3557_v15  ;;  %v11304_v30 = vld [vmem:[#allocation19_spill] sm:$0xff]  ;;  %v11307_v40 = vld [vmem:[#allocation89_spill] sm:$0xff]  ;;  %v3901_v41 = vsel %vm3887_vm8, %v3868_v16, %v11311_v49  ;;  %v7298_v23 = vld [vmem:[#allocation2 + $0xb0] sm:$0xff] }
 0x455   : > { %6521 = vmatmul.mubr.msk.f32.gmra.mrb[8].mxu1 %vm4035_vm12, %v3996_v17  ;;  %v3999_v28 = vsel %vm3986_vm11, %v3966_v57, %v3685_v10  ;;  %v3770_v63 = vsel %vm342_vm0, %v7296_v34, %v11304_v30  ;;  %v3772_v10 = vsel %vm342_vm0, %v7297_v22, %v11307_v40  ;;  %v11308_v13 = vld [vmem:[#allocation91_spill] sm:$0xff]  ;;  %v3934_v29 = vsel %vm3920_vm9, %v3901_v41, %v9623_v47 }
 0x456   : > { %6523 = vmatprep.mubr.msk.f32.mxu1 %vm4035_vm12, %v3997_v12  ;;  %v3803_v55 = vsel %vm3788_vm5, %v3770_v63, %v11306_v37  ;;  %v11310_v17 = vld [vmem:[#allocation99_spill] sm:$0xff]  ;;  %v11312_v12 = vld [vmem:[#allocation101_spill] sm:$0xff]  ;;  %v3771_v60 = vsel %vm342_vm0, %v7298_v23, %v11314_v1  ;;  %v3773_v32 = vsel %vm342_vm0, %v7299_v0, %v11316_v7  ;;  %v11322_v37 = vld [vmem:[#allocation52_spill] sm:$0xff] }
 0x457   : > { %v3689_v20 = vpop.permute.xlu0 %3688  ;;  %v3555_v53 = vpop.permute.xlu1 %3554  ;;  %v3836_v44 = vsel %vm3821_vm6, %v3803_v55, %v11308_v13  ;;  %v3805_v46 = vsel %vm3788_vm5, %v3772_v10, %v11310_v17  ;;  %v11320_v30 = vld [vmem:[#allocation103_spill] sm:$0xff] }
 0x458   : > { %v3965_v42 = vsel %vm3953_vm10, %v3932_v50, %v3555_v53  ;;  %v3869_v27 = vsel %vm3854_vm7, %v3836_v44, %v11309_v8  ;;  %v11313_v53 = vld [vmem:[#allocation44_spill] sm:$0xff]  ;;  %v11323_v22 = vld [vmem:[#allocation59_spill] sm:$0xff] }
 0x459   : > { %v3902_v36 = vsel %vm3887_vm8, %v3869_v27, %v11312_v12  ;;  %v3838_v38 = vsel %vm3821_vm6, %v3805_v46, %v11313_v53  ;;  %v7300_v49 = vld [vmem:[#allocation2 + $0xd8] sm:$0xff]  ;;  %v11325_v12 = vld [vmem:[#allocation61_spill] sm:$0xff] }
 0x45a   : > { %v3935_v48 = vsel %vm3920_vm9, %v3902_v36, %v9583_v43  ;;  %v11315_v43 = vld [vmem:[#allocation28_spill] sm:$0xff]  ;;  %v11328_v53 = vld [vmem:[#allocation63_spill] sm:$0xff] }
 0x45b   : > { %v3565_v45 = vpop.permute.xlu0 %3564  ;;  %v3683_v62 = vpop.permute.xlu1 %3682  ;;  %v3968_v31 = vsel %vm3953_vm10, %v3935_v48, %v3561_v9  ;;  %v3804_v50 = vsel %vm3788_vm5, %v3771_v60, %v11315_v43  ;;  %v11317_v9 = vld [vmem:[#allocation102_spill] sm:$0xff] }
 0x45c   : > { %v3998_v18 = vsel %vm3986_vm11, %v3965_v42, %v3683_v62  ;;  %v4001_v47 = vsel %vm3986_vm11, %v3968_v31, %v3689_v20  ;;  %v3837_v42 = vsel %vm3821_vm6, %v3804_v50, %v11317_v9  ;;  %v11318_v62 = vld [vmem:[#allocation46_spill] sm:$0xff]  ;;  %v11319_v20 = vld [vmem:[#allocation100_spill] sm:$0xff] }
 0x45d   : > { %6524 = vmatmul.mubr.msk.f32.gmra.mrb[10].mxu1 %vm4035_vm12, %v3998_v18  ;;  %v3871_v57 = vsel %vm3854_vm7, %v3838_v38, %v11318_v62  ;;  %v3806_v34 = vsel %vm3788_vm5, %v3773_v32, %v11319_v20  ;;  %v3870_v63 = vsel %vm3854_vm7, %v3837_v42, %v11320_v30  ;;  %v7301_v31 = vld [vmem:[#allocation2 + $0xf0] sm:$0xff]  ;;  %v7302_v9 = vld [vmem:[#allocation2 + $0xe0] sm:$0xff]  ;;  %v11330_v42 = vld [vmem:[#allocation55_spill] sm:$0xff] }
 0x45e   : > { %6526 = vmatprep.mubr.msk.f32.mxu1 %vm4035_vm12, %v3999_v28  ;;  %v3903_v16 = vsel %vm3887_vm8, %v3870_v63, %v11321_v5  ;;  %v3904_v55 = vsel %vm3887_vm8, %v3871_v57, %v11322_v37  ;;  %v3839_v40 = vsel %vm3821_vm6, %v3806_v34, %v11323_v22  ;;  %v11333_v30 = vld [vmem:[#allocation40_spill] sm:$0xff] }
 0x45f   : > { %v3693_v33 = vpop.permute.xlu0 %3692  ;;  %v3559_v15 = vpop.permute.xlu1 %3558  ;;  %v3937_v10 = vsel %vm3920_vm9, %v3904_v55, %v9591_v24  ;;  %v3872_v36 = vsel %vm3854_vm7, %v3839_v40, %v11325_v12  ;;  %v11326_v24 = vld [vmem:[#allocation50_spill] sm:$0xff]  ;;  %v7303_v40 = vld [vmem:[#allocation2 + $0xf8] sm:$0xff] }
 0x460   : > { %v3967_v58 = vsel %vm3953_vm10, %v3934_v29, %v3559_v15  ;;  %v3936_v15 = vsel %vm3920_vm9, %v3903_v16, %v9629_v52  ;;  %v3970_v27 = vsel %vm3953_vm10, %v3937_v10, %v3565_v45  ;;  %v11324_v52 = vld [vmem:[#allocation42_spill] sm:$0xff]  ;;  %v3905_v38 = vsel %vm3887_vm8, %v3872_v36, %v11328_v53 }
 0x461   : > { %v4003_v46 = vsel %vm3986_vm11, %v3970_v27, %v3693_v33  ;;  %v3774_v41 = vsel %vm342_vm0, %v7300_v49, %v11324_v52  ;;  %v3938_v60 = vsel %vm3920_vm9, %v3905_v38, %v9634_v11  ;;  %v7304_v27 = vld [vmem:[#allocation2 + $0x108] sm:$0xff]  ;;  %v11336_v49 = vld [vmem:[#allocation48_spill] sm:$0xff]  ;;  %v11337_v12 = vld [vmem:[#allocation106_spill] sm:$0xff] }
 0x462   : > { %v3807_v29 = vsel %vm3788_vm5, %v3774_v41, %v11326_v24 }
 0x463   : > { %v3569_v26 = vpop.permute.xlu0 %3568  ;;  %v3687_v21 = vpop.permute.xlu1 %3686 }
 0x464   : > { %v4000_v6 = vsel %vm3986_vm11, %v3967_v58, %v3687_v21  ;;  %v11327_v58 = vld [vmem:[#allocation110_spill] sm:$0xff] }
 0x465   : > { %6527 = vmatmul.mubr.msk.f32.gmra.mrb[12].mxu1 %vm4035_vm12, %v4000_v6  ;;  %v3840_v21 = vsel %vm3821_vm6, %v3807_v29, %v11327_v58  ;;  %v11329_v6 = vld [vmem:[#allocation109_spill] sm:$0xff]  ;;  %v11339_v29 = vld [vmem:[#allocation108_spill] sm:$0xff] }
 0x466   : > { %6529 = vmatprep.mubr.msk.f32.mxu1 %vm4035_vm12, %v4001_v47  ;;  %v3873_v33 = vsel %vm3854_vm7, %v3840_v21, %v9422_v39  ;;  %v3776_v23 = vsel %vm342_vm0, %v7301_v31, %v11329_v6 }
 0x467   : > { %v3697_v18 = vpop.permute.xlu0 %3696  ;;  %v3563_v28 = vpop.permute.xlu1 %3562  ;;  %v3906_v1 = vsel %vm3887_vm8, %v3873_v33, %v9485_v25  ;;  %v3809_v47 = vsel %vm3788_vm5, %v3776_v23, %v9436_v56  ;;  %v3775_v25 = vsel %vm342_vm0, %v7302_v9, %v11330_v42  ;;  %v11331_v56 = vld [vmem:[#allocation57_spill] sm:$0xff] }
 0x468   : > { %v3969_v13 = vsel %vm3953_vm10, %v3936_v15, %v3563_v28  ;;  %v3939_v43 = vsel %vm3920_vm9, %v3906_v1, %v9601_v19  ;;  %v3808_v62 = vsel %vm3788_vm5, %v3775_v25, %v11331_v56  ;;  %v11332_v19 = vld [vmem:[#allocation38_spill] sm:$0xff]  ;;  %v11344_v42 = vld [vmem:[#allocation49_spill] sm:$0xff] }
 0x469   : > { %v3972_v7 = vsel %vm3953_vm10, %v3939_v43, %v3569_v26  ;;  %v3842_v57 = vsel %vm3821_vm6, %v3809_v47, %v11332_v19  ;;  %v3841_v26 = vsel %vm3821_vm6, %v3808_v62, %v9466_v35 }
 0x46a   : > { %v4005_v11 = vsel %vm3986_vm11, %v3972_v7, %v3697_v18  ;;  %v3874_v34 = vsel %vm3854_vm7, %v3841_v26, %v9474_v51  ;;  %v3875_v18 = vsel %vm3854_vm7, %v3842_v57, %v11333_v30  ;;  %v7306_v7 = vld [vmem:[#allocation2 + $0x110] sm:$0xff]  ;;  %v11348_v30 = vld [vmem:[#allocation64_spill] sm:$0xff] }
 0x46b   : > { %v3445_v44 = vpop.permute.xlu0 %3444  ;;  %v3691_v8 = vpop.permute.xlu1 %3690  ;;  %v3907_v63 = vsel %vm3887_vm8, %v3874_v34, %v9522_v59  ;;  %v3908_v5 = vsel %vm3887_vm8, %v3875_v18, %v9492_v61  ;;  %v3777_v59 = vsel %vm342_vm0, %v7303_v40, %v9453_v2  ;;  %v11346_v57 = vld [vmem:[#allocation114_spill] sm:$0xff] }
 0x46c   : > { %v4002_v17 = vsel %vm3986_vm11, %v3969_v13, %v3691_v8  ;;  %v3940_v16 = vsel %vm3920_vm9, %v3907_v63, %v9642_v4  ;;  %v3941_v37 = vsel %vm3920_vm9, %v3908_v5, %v3445_v44  ;;  %v3810_v61 = vsel %vm3788_vm5, %v3777_v59, %v9459_v54  ;;  %v11334_v44 = vld [vmem:[#allocation51_spill] sm:$0xff]  ;;  %v11338_v54 = vld [vmem:[#allocation53_spill] sm:$0xff]  ;;  %v11349_v63 = vld [vmem:[#allocation132_spill] sm:$0xff] }
 0x46d   : > { %6530 = vmatmul.mubr.msk.f32.gmra.mrb[14].mxu1 %vm4035_vm12, %v4002_v17  ;;  %v3843_v8 = vsel %vm3821_vm6, %v3810_v61, %v11334_v44  ;;  %v11335_v17 = vld [vmem:[#allocation36_spill] sm:$0xff]  ;;  %v4509_v34 = vld [vmem:[#allocation3 + $0x1] sm:$0xff] }
 0x46e   : > { %6532 = vmatprep.mubr.msk.f32.mxu1 %vm4035_vm12, %v4003_v46  ;;  %v3778_v46 = vsel %vm342_vm0, %v7304_v27, %v11335_v17  ;;  %v3876_v24 = vsel %vm3854_vm7, %v3843_v8, %v11338_v54  ;;  %v4541_v27 = vld [vmem:[#allocation3 + $0x2] sm:$0xff] }
 0x46f   : > { %v3573_v48 = vpop.permute.xlu0 %3572  ;;  %v3567_v45 = vpop.permute.xlu1 %3566  ;;  %v3811_v2 = vsel %vm3788_vm5, %v3778_v46, %v11336_v49  ;;  %v11352_v46 = vld [vmem:[#allocation113_spill] sm:$0xff]  ;;  %v7308_v54 = vld [vmem:[#allocation2 + $0x138] sm:$0xff] }
 0x470   : > { %v3971_v39 = vsel %vm3953_vm10, %v3938_v60, %v3567_v45  ;;  %v3974_v51 = vsel %vm3953_vm10, %v3941_v37, %v3573_v48  ;;  %v3844_v36 = vsel %vm3821_vm6, %v3811_v2, %v11337_v12  ;;  %v3909_v45 = vsel %vm3887_vm8, %v3876_v24, %v9530_v14  ;;  %v7305_v14 = vld [vmem:[#allocation2 + $0x120] sm:$0xff]  ;;  %v11353_v12 = vld [vmem:[#allocation77_spill] sm:$0xff] }
 0x471   : > { %v3877_v48 = vsel %vm3854_vm7, %v3844_v36, %v11339_v29  ;;  %v11354_v24 = vld [vmem:[#allocation60_spill] sm:$0xff] }
 0x472   : > { %v3910_v58 = vsel %vm3887_vm8, %v3877_v48, %v9500_v3  ;;  %v11340_v3 = vld [vmem:[#allocation105_spill] sm:$0xff]  ;;  %v3782_v29 = vsel %vm342_vm0, %v7308_v54, %v11354_v24 }
 0x473   : > { %v3701_v50 = vpop.permute.xlu0 %3700  ;;  %v3695_v0 = vpop.permute.xlu1 %3694  ;;  %v3780_v60 = vsel %vm342_vm0, %v7305_v14, %v11340_v3  ;;  %v11360_v3 = vld [vmem:[#allocation128_spill] sm:$0xff]  ;;  %v11373_v24 = vld [vmem:[#allocation69_spill] sm:$0xff] }
 0x474   : > { %v4004_v32 = vsel %vm3986_vm11, %v3971_v39, %v3695_v0  ;;  %v4007_v10 = vsel %vm3986_vm11, %v3974_v51, %v3701_v50  ;;  %v11341_v39 = vld [vmem:[#allocation112_spill] sm:$0xff]  ;;  %v11342_v0 = vmov 0.0  }
 0x475   : > { %6533 = vmatmul.mubr.msk.f32.gmra.mrb[16].mxu1 %vm4035_vm12, %v4004_v32  ;;  %v3813_v50 = vsel %vm3788_vm5, %v3780_v60, %v11341_v39  ;;  %4395 = vst.msk [vmem:[#allocation3 + $0x28] sm:$0x3] %vm4391_vm13, %v11342_v0  ;;  %4392 = vst.msk [vmem:[#allocation3 + $0x10] sm:$0x3] %vm4391_vm13, %v11342_v0  ;;  %v11343_v32 = vld [vmem:[#allocation47_spill] sm:$0xff] }
 0x476   : > { %6535 = vmatprep.mubr.msk.f32.mxu1 %vm4035_vm12, %v4005_v11  ;;  %4398 = vst.msk [vmem:[#allocation3 + $0x40] sm:$0x3] %vm4391_vm13, %v11342_v0  ;;  %4401 = vst.msk [vmem:[#allocation3 + $0x58] sm:$0x3] %vm4391_vm13, %v11342_v0  ;;  %v3779_v9 = vsel %vm342_vm0, %v7306_v7, %v11343_v32  ;;  %v11345_v11 = vld [vmem:[#allocation62_spill] sm:$0xff] }
 0x477   : > { %v3449_v28 = vpop.permute.xlu0 %3448  ;;  %v3571_v20 = vpop.permute.xlu1 %3570  ;;  %4404 = vst.msk [vmem:[#allocation3 + $0x70] sm:$0x3] %vm4391_vm13, %v11342_v0  ;;  %4407 = vst.msk [vmem:[#allocation3 + $0x88] sm:$0x3] %vm4391_vm13, %v11342_v0  ;;  %v3812_v25 = vsel %vm3788_vm5, %v3779_v9, %v11344_v42  ;;  %v3846_v56 = vsel %vm3821_vm6, %v3813_v50, %v11345_v11  ;;  %v7309_v42 = vld [vmem:[#allocation2 + $0x150] sm:$0xff] }
 0x478   : > { %v3973_v35 = vsel %vm3953_vm10, %v3940_v16, %v3571_v20  ;;  %v3943_v33 = vsel %vm3920_vm9, %v3910_v58, %v3449_v28  ;;  %4410 = vst.msk [vmem:[#allocation3 + $0xa0] sm:$0x3] %vm4391_vm13, %v11342_v0  ;;  %4413 = vst.msk [vmem:[#allocation3 + $0xb8] sm:$0x3] %vm4391_vm13, %v11342_v0  ;;  %v3845_v26 = vsel %vm3821_vm6, %v3812_v25, %v11346_v57  ;;  %v11347_v28 = vld [vmem:[#allocation116_spill] sm:$0xff]  ;;  %v11350_v16 = vld [vmem:[#allocation126_spill] sm:$0xff] }
 0x479   : > { %4416 = vst.msk [vmem:[#allocation3 + $0xd0] sm:$0x3] %vm4391_vm13, %v11342_v0  ;;  %4419 = vst.msk [vmem:[#allocation3 + $0xe8] sm:$0x3] %vm4391_vm13, %v11342_v0  ;;  %v3878_v20 = vsel %vm3854_vm7, %v3845_v26, %v11347_v28  ;;  %v3879_v18 = vsel %vm3854_vm7, %v3846_v56, %v11348_v30  ;;  %v11361_v25 = vld [vmem:[#allocation118_spill] sm:$0xff]  ;;  %v11362_v56 = vld [vmem:[#allocation121_spill] sm:$0xff] }
 0x47a   : > { %4422 = vst.msk [vmem:[#allocation3 + $0x100] sm:$0x3] %vm4391_vm13, %v11342_v0  ;;  %4425 = vst.msk [vmem:[#allocation3 + $0x118] sm:$0x3] %vm4391_vm13, %v11342_v0  ;;  %v3911_v5 = vsel %vm3887_vm8, %v3878_v20, %v11349_v63  ;;  %v3912_v37 = vsel %vm3887_vm8, %v3879_v18, %v11350_v16  ;;  %v3784_v11 = vsel %vm342_vm0, %v7309_v42, %v11361_v25  ;;  %v7310_v26 = vld [vmem:[#allocation2 + $0x140] sm:$0xff]  ;;  %v11363_v28 = vld [vmem:[#allocation73_spill] sm:$0xff] }
 0x47b   : > { %v3577_v55 = vpop.permute.xlu0 %3576  ;;  %v3699_v15 = vpop.permute.xlu1 %3698  ;;  %4428 = vst.msk [vmem:[#allocation3 + $0x130] sm:$0x3] %vm4391_vm13, %v11342_v0  ;;  %4431 = vst.msk [vmem:[#allocation3 + $0x148] sm:$0x3] %vm4391_vm13, %v11342_v0  ;;  %v3783_v20 = vsel %vm342_vm0, %v7310_v26, %v11363_v28  ;;  %v11365_v18 = vld [vmem:[#allocation56_spill] sm:$0xff]  ;;  %v11383_v28 = vld [vmem:[#allocation122_spill] sm:$0xff] }
 0x47c   : > { %v4006_v22 = vsel %vm3986_vm11, %v3973_v35, %v3699_v15  ;;  %v3976_v6 = vsel %vm3953_vm10, %v3943_v33, %v3577_v55  ;;  %4434 = vst.msk [vmem:[#allocation3 + $0x160] sm:$0x3] %vm4391_vm13, %v11342_v0  ;;  %4437 = vst.msk [vmem:[#allocation3 + $0x178] sm:$0x3] %vm4391_vm13, %v11342_v0  ;;  %v4510_v15 = vld [vmem:[#allocation3 + $0x9] sm:$0xff] }
 0x47d   : > { %6536 = vmatmul.mubr.msk.f32.gmra.mrb[18].mxu1 %vm4035_vm12, %v4006_v22  ;;  %4440 = vst.msk [vmem:[#allocation3 + $0x190] sm:$0x3] %vm4391_vm13, %v11342_v0  ;;  %4443 = vst.msk [vmem:[#allocation3 + $0x1a8] sm:$0x3] %vm4391_vm13, %v11342_v0  ;;  %v6646_v59 = vpack.i.bf16 %v4510_v15, %v4509_v34  ;;  %v4542_v17 = vld [vmem:[#allocation3 + $0xa] sm:$0xff]  ;;  %v11368_v15 = vld [vmem:[#allocation58_spill] sm:$0xff] }
 0x47e   : > { %6538 = vmatprep.mubr.msk.f32.mxu1 %vm4035_vm12, %v4007_v10  ;;  %v11356_v33 = vld [vmem:[#allocation119_spill] sm:$0xff] }
 0x47f   : > { %v3705_v4 = vpop.permute.xlu0 %3704  ;;  %v3447_v13 = vpop.permute.xlu1 %3446  ;;  %6647 = vrot.lane.b32.xlu0 %v6646_v59, %s7339_s23  ;;  %v11364_v34 = vld [vmem:[#allocation75_spill] sm:$0xff]  ;;  %v11370_v59 = vld [vmem:[#allocation130_spill] sm:$0xff] }
 0x480   : > { %v3942_v21 = vsel %vm3920_vm9, %v3909_v45, %v3447_v13  ;;  %v4009_v1 = vsel %vm3986_vm11, %v3976_v6, %v3705_v4  ;;  %v7307_v4 = vld [vmem:[#allocation2 + $0x128] sm:$0xff]  ;;  %v11351_v13 = vld [vmem:[#allocation111_spill] sm:$0xff]  ;;  %v11355_v45 = vld [vmem:[#allocation68_spill] sm:$0xff]  ;;  %v3816_v30 = vsel %vm3788_vm5, %v3783_v20, %v11364_v34 }
 0x481   : > { %v3781_v44 = vsel %vm342_vm0, %v7307_v4, %v11351_v13  ;;  %v3815_v58 = vsel %vm3788_vm5, %v3782_v29, %v11355_v45  ;;  %v11358_v6 = vld [vmem:[#allocation120_spill] sm:$0xff]  ;;  %v11374_v45 = vld [vmem:[#allocation54_spill] sm:$0xff] }
 0x482   : > { %v3814_v49 = vsel %vm3788_vm5, %v3781_v44, %v11352_v46  ;;  %v7311_v46 = vld [vmem:[#allocation2 + $0x158] sm:$0xff] }
 0x483   : > { %v3453_v52 = vpop.permute.xlu0 %3452  ;;  %v3575_v41 = vpop.permute.xlu1 %3574  ;;  %v3847_v36 = vsel %vm3821_vm6, %v3814_v49, %v11353_v12  ;;  %v11371_v49 = vld [vmem:[#allocation124_spill] sm:$0xff] }
 0x484   : > { %v3975_v53 = vsel %vm3953_vm10, %v3942_v21, %v3575_v41  ;;  %v3945_v51 = vsel %vm3920_vm9, %v3912_v37, %v3453_v52  ;;  %v6651_v52 = vpack.i.bf16 %v4542_v17, %v4541_v27 }
 0x486   : > { %6652 = vrot.lane.b32.xlu0 %v6651_v52, %s7333_s13 }
 0x487   : > { %v3581_v38 = vpop.permute.xlu0 %3580  ;;  %v3703_v31 = vpop.permute.xlu1 %3702 }
 0x488   : > { %v4008_v23 = vsel %vm3986_vm11, %v3975_v53, %v3703_v31  ;;  %v3978_v10 = vsel %vm3953_vm10, %v3945_v51, %v3581_v38  ;;  %v3848_v53 = vsel %vm3821_vm6, %v3815_v58, %v11356_v33  ;;  %v11357_v38 = vld [vmem:[#allocation79_spill] sm:$0xff] }
 0x489   : > { %6539 = vmatmul.mubr.msk.f32.gmra.mrb[20].mxu1 %vm4035_vm12, %v4008_v23  ;;  %v3880_v31 = vsel %vm3854_vm7, %v3847_v36, %v11357_v38  ;;  %v3881_v23 = vsel %vm3854_vm7, %v3848_v53, %v11358_v6  ;;  %v11376_v38 = vld [vmem:[#allocation115_spill] sm:$0xff] }
 0x48a   : > { %6541 = vmatprep.mubr.msk.f32.mxu1 %vm4035_vm12, %v4009_v1  ;;  %v11359_v1 = vld [vmem:[#allocation133_spill] sm:$0xff]  ;;  %v3914_v60 = vsel %vm3887_vm8, %v3881_v23, %v11360_v3  ;;  %v11377_v6 = vld [vmem:[#allocation71_spill] sm:$0xff] }
 0x48b   : > { %v3709_v47 = vpop.permute.xlu0 %3708  ;;  %v3451_v43 = vpop.permute.xlu1 %3450  ;;  %v3913_v14 = vsel %vm3887_vm8, %v3880_v31, %v11359_v1  ;;  %v11378_v1 = vld [vmem:[#allocation117_spill] sm:$0xff]  ;;  %v11379_v3 = vld [vmem:[#allocation135_spill] sm:$0xff] }
 0x48c   : > { %v3944_v35 = vsel %vm3920_vm9, %v3911_v5, %v3451_v43  ;;  %v4011_v8 = vsel %vm3986_vm11, %v3978_v10, %v3709_v47  ;;  %v11366_v5 = vld [vmem:[#allocation127_spill] sm:$0xff] }
 0x48d   : > { %v3849_v16 = vsel %vm3821_vm6, %v3816_v30, %v11366_v5  ;;  %v11384_v30 = vld [vmem:[#allocation123_spill] sm:$0xff] }
 0x48f   : > { %v3457_v62 = vpop.permute.xlu0 %3456  ;;  %v3579_v19 = vpop.permute.xlu1 %3578 }
 0x490   : > { %v3977_v22 = vsel %vm3953_vm10, %v3944_v35, %v3579_v19  ;;  %v3947_v39 = vsel %vm3920_vm9, %v3914_v60, %v3457_v62  ;;  %v3817_v62 = vsel %vm3788_vm5, %v3784_v11, %v11362_v56  ;;  %v11367_v35 = vld [vmem:[#allocation129_spill] sm:$0xff]  ;;  %v7313_v56 = vld [vmem:[#allocation2 + $0x170] sm:$0xff] }
 0x491   : > { %v3850_v63 = vsel %vm3821_vm6, %v3817_v62, %v11365_v18  ;;  %v11381_v62 = vld [vmem:[#allocation65_spill] sm:$0xff] }
 0x492   : > { %v3883_v51 = vsel %vm3854_vm7, %v3850_v63, %v11368_v15  ;;  %v11385_v63 = vld [vmem:[#allocation136_spill] sm:$0xff] }
 0x493   : > { %v3585_v55 = vpop.permute.xlu0 %3584  ;;  %v3916_v10 = vsel %vm3887_vm8, %v3883_v51, %v11370_v59  ;;  %v10161_v15 = vld [vmem:[%s11058_s5] ss:$0 sm:$0xff] }
 0x494   : > { %v3707_v40 = vpop.permute.xlu1 %3706  ;;  %v3980_v7 = vsel %vm3953_vm10, %v3947_v39, %v3585_v55  ;;  %v3882_v55 = vsel %vm3854_vm7, %v3849_v16, %v11367_v35 }
 0x495   : > { %v4010_v61 = vsel %vm3986_vm11, %v3977_v22, %v3707_v40  ;;  %v11369_v22 = vld [vmem:[#allocation134_spill] sm:$0xff] }
 0x496   : > { %6542 = vmatmul.mubr.msk.f32.gmra.mrb[22].mxu1 %vm4035_vm12, %v4010_v61  ;;  %v3915_v40 = vsel %vm3887_vm8, %v3882_v55, %v11369_v22 }
 0x497   : > { %6544 = vmatprep.mubr.msk.f32.mxu1 %vm4035_vm12, %v4011_v8  ;;  %v3713_v2 = vpop.permute.xlu0 %3712 }
 0x498   : > { %v3455_v41 = vpop.permute.xlu1 %3454  ;;  %v4013_v9 = vsel %vm3986_vm11, %v3980_v7, %v3713_v2  ;;  %v3785_v2 = vsel %vm342_vm0, %v7311_v46, %v11371_v49 }
 0x499   : > { %v3946_v47 = vsel %vm3920_vm9, %v3913_v14, %v3455_v41  ;;  %v11372_v41 = vld [vmem:[#allocation125_spill] sm:$0xff] }
 0x49a   : > { %v3818_v12 = vsel %vm3788_vm5, %v3785_v2, %v11372_v41 }
 0x49b   : > { %v3461_v48 = vpop.permute.xlu0 %3460  ;;  %v3851_v29 = vsel %vm3821_vm6, %v3818_v12, %v11373_v24 }
 0x49c   : > { %v3583_v21 = vpop.permute.xlu1 %3582  ;;  %v3949_v13 = vsel %vm3920_vm9, %v3916_v10, %v3461_v48  ;;  %v7312_v48 = vld [vmem:[#allocation2 + $0x168] sm:$0xff]  ;;  %v3884_v23 = vsel %vm3854_vm7, %v3851_v29, %v11377_v6 }
 0x49d   : > { %v3979_v50 = vsel %vm3953_vm10, %v3946_v47, %v3583_v21  ;;  %v3786_v58 = vsel %vm342_vm0, %v7312_v48, %v11374_v45  ;;  %v11375_v21 = vld [vmem:[#allocation66_spill] sm:$0xff]  ;;  %v3917_v60 = vsel %vm3887_vm8, %v3884_v23, %v11379_v3  ;;  %v11380_v47 = vld [vmem:[#allocation131_spill] sm:$0xff] }
 0x49e   : > { %v3819_v33 = vsel %vm3788_vm5, %v3786_v58, %v11375_v21 }
 0x49f   : > { %v3589_v43 = vpop.permute.xlu0 %3588  ;;  %v3852_v31 = vsel %vm3821_vm6, %v3819_v33, %v11376_v38 }
 0x4a0   : > { %v3711_v0 = vpop.permute.xlu1 %3710  ;;  %v3982_v27 = vsel %vm3953_vm10, %v3949_v13, %v3589_v43  ;;  %v3885_v14 = vsel %vm3854_vm7, %v3852_v31, %v11378_v1 }
 0x4a1   : > { %v4012_v32 = vsel %vm3986_vm11, %v3979_v50, %v3711_v0  ;;  %v3918_v43 = vsel %vm3887_vm8, %v3885_v14, %v11380_v47 }
 0x4a2   : > { %6545 = vmatmul.mubr.msk.f32.gmra.mrb[24].mxu1 %vm4035_vm12, %v4012_v32 }
 0x4a3   : > { %6547 = vmatprep.mubr.msk.f32.mxu1 %vm4035_vm12, %v4013_v9  ;;  %v3717_v57 = vpop.permute.xlu0 %3716 }
 0x4a4   : > { %v3459_v19 = vpop.permute.xlu1 %3458  ;;  %v4015_v52 = vsel %vm3986_vm11, %v3982_v27, %v3717_v57  ;;  %v11382_v57 = vld [vmem:[#allocation67_spill] sm:$0xff] }
 0x4a5   : > { %v3948_v61 = vsel %vm3920_vm9, %v3915_v40, %v3459_v19  ;;  %v3787_v19 = vsel %vm342_vm0, %v7313_v56, %v11381_v62 }
 0x4a6   : > { %v3820_v26 = vsel %vm3788_vm5, %v3787_v19, %v11382_v57 }
 0x4a7   : > { %v3465_v4 = vpop.permute.xlu0 %3464  ;;  %v3853_v20 = vsel %vm3821_vm6, %v3820_v26, %v11383_v28 }
 0x4a8   : > { %v3587_v37 = vpop.permute.xlu1 %3586  ;;  %v3951_v0 = vsel %vm3920_vm9, %v3918_v43, %v3465_v4  ;;  %v3886_v18 = vsel %vm3854_vm7, %v3853_v20, %v11384_v30 }
 0x4a9   : > { %v3981_v44 = vsel %vm3953_vm10, %v3948_v61, %v3587_v37  ;;  %v3919_v5 = vsel %vm3887_vm8, %v3886_v18, %v11385_v63 }
 0x4ab   : > { %v3593_v54 = vpop.permute.xlu0 %3592 }
 0x4ac   : > { %v3715_v8 = vpop.permute.xlu1 %3714  ;;  %v3984_v9 = vsel %vm3953_vm10, %v3951_v0, %v3593_v54 }
 0x4ad   : > { %v4014_v17 = vsel %vm3986_vm11, %v3981_v44, %v3715_v8 }
 0x4ae   : > { %6548 = vmatmul.mubr.msk.f32.gmra.mrb[26].mxu1 %vm4035_vm12, %v4014_v17 }
 0x4af   : > { %6550 = vmatprep.mubr.msk.f32.mxu1 %vm4035_vm12, %v4015_v52  ;;  %v3721_v39 = vpop.permute.xlu0 %3720 }
 0x4b0   : > { %v3463_v36 = vpop.permute.xlu1 %3462  ;;  %v4017_v25 = vsel %vm3986_vm11, %v3984_v9, %v3721_v39 }
 0x4b1   : > { %v3950_v50 = vsel %vm3920_vm9, %v3917_v60, %v3463_v36 }
 0x4b4   : > { %v3591_v53 = vpop.permute.xlu1 %3590 }
 0x4b5   : > { %v3983_v7 = vsel %vm3953_vm10, %v3950_v50, %v3591_v53 }
 0x4b8   : > { %v3719_v32 = vpop.permute.xlu1 %3718 }
 0x4b9   : > { %v4016_v42 = vsel %vm3986_vm11, %v3983_v7, %v3719_v32 }
 0x4ba   : > { %6551 = vmatmul.mubr.msk.f32.gmra.mrb[28].mxu1 %vm4035_vm12, %v4016_v42 }
 0x4bb   : > { %6553 = vmatprep.mubr.msk.f32.mxu1 %vm4035_vm12, %v4017_v25 }
 0x4bc   : > { %v3467_v11 = vpop.permute.xlu1 %3466 }
 0x4bd   : > { %v3952_v16 = vsel %vm3920_vm9, %v3919_v5, %v3467_v11 }
 0x4c0   : > { %v3595_v34 = vpop.permute.xlu1 %3594 }
 0x4c1   : > { %v3985_v37 = vsel %vm3953_vm10, %v3952_v16, %v3595_v34 }
 0x4c4   : > { %v3723_v35 = vpop.permute.xlu1 %3722 }
 0x4c5   : > { %v4018_v55 = vsel %vm3986_vm11, %v3985_v37, %v3723_v35 }
 0x4c6   : > { %6554 = vmatmul.mubr.msk.f32.gmra.mrb[30].mxu1 %vm4035_vm12, %v4018_v55 }
 0x508   : > { %v6510_v51 = vpop.f32.mrb[0].mxu1 }
 0x509   : > { %v4204_v22 = vadd.f32 %v6510_v51, %v10161_v15  ;;  %v4198_v40 = vpop.f32.mrb[1].mxu1 }
 0x50a   : > { %v4199_v59 = vadd.f32 %v10161_v15, %v4198_v40 }
 0x50b   : > { %v4358_v10 = vmax.f32 %v4204_v22, 0.0 }
 0x50c   : > { %v4357_v61 = vmax.f32 %v4199_v59, 0.0 }
 0x50d   : > { %4446 = vst.msk [vmem:[#allocation3 + $0x21] sm:$0xff] %vm568_vm3, %v4358_v10 }
 0x50e   : > { %4445 = vst.msk [vmem:[#allocation3 + $0x19] sm:$0xff] %vm568_vm3, %v4357_v61 }
 0x510   : > { %v6513_v4 = vpop.f32.mrb[2].mxu1 }
 0x511   : > { %v4214_v13 = vadd.f32 %v6513_v4, %v10161_v15  ;;  %v4208_v44 = vpop.f32.mrb[3].mxu1 }
 0x512   : > { %v4209_v8 = vadd.f32 %v10161_v15, %v4208_v44 }
 0x513   : > { %v4360_v27 = vmax.f32 %v4214_v13, 0.0 }
 0x514   : > { %v4359_v17 = vmax.f32 %v4209_v8, 0.0  ;;  %v4512_v46 = vld [vmem:[#allocation3 + $0x21] sm:$0xff] }
 0x515   : > { %4448 = vst.msk [vmem:[#allocation3 + $0x39] sm:$0xff] %vm568_vm3, %v4360_v27  ;;  %v4573_v49 = vld [vmem:[#allocation3 + $0x18] sm:$0xff]  ;;  %v4574_v2 = vld [vmem:[#allocation3 + $0x20] sm:$0xff] }
 0x516   : > { %v4511_v52 = vld [vmem:[#allocation3 + $0x19] sm:$0xff]  ;;  %4447 = vst.msk [vmem:[#allocation3 + $0x31] sm:$0xff] %vm568_vm3, %v4359_v17  ;;  %v6666_v41 = vpack.i.bf16 %v4574_v2, %v4573_v49  ;;  %v4544_v54 = vld [vmem:[#allocation3 + $0x22] sm:$0xff] }
 0x517   : > { %v6656_v12 = vpack.i.bf16 %v4512_v46, %v4511_v52  ;;  %v4543_v36 = vld [vmem:[#allocation3 + $0x1a] sm:$0xff] }
 0x518   : > { %6667 = vrot.lane.b32.xlu0 %v6666_v41, %s7346_s17  ;;  %v6516_v24 = vpop.f32.mrb[4].mxu1  ;;  %v6661_v58 = vpack.i.bf16 %v4544_v54, %v4543_v36 }
 0x519   : > { %6657 = vrot.lane.b32.xlu1 %v6656_v12, %s7339_s23  ;;  %v4224_v29 = vadd.f32 %v6516_v24, %v10161_v15  ;;  %v4218_v48 = vpop.f32.mrb[5].mxu1 }
 0x51a   : > { %v4219_v45 = vadd.f32 %v10161_v15, %v4218_v48 }
 0x51b   : > { %v4362_v21 = vmax.f32 %v4224_v29, 0.0 }
 0x51c   : > { %v4361_v33 = vmax.f32 %v4219_v45, 0.0  ;;  %v4514_v53 = vld [vmem:[#allocation3 + $0x39] sm:$0xff] }
 0x51d   : > { %6662 = vrot.lane.b32.xlu1 %v6661_v58, %s7333_s13  ;;  %4450 = vst.msk [vmem:[#allocation3 + $0x51] sm:$0xff] %vm568_vm3, %v4362_v21  ;;  %v4513_v38 = vld [vmem:[#allocation3 + $0x31] sm:$0xff]  ;;  %v4546_v23 = vld [vmem:[#allocation3 + $0x3a] sm:$0xff] }
 0x51e   : > { %4449 = vst.msk [vmem:[#allocation3 + $0x49] sm:$0xff] %vm568_vm3, %v4361_v33  ;;  %v6681_v31 = vpack.i.bf16 %v4514_v53, %v4513_v38  ;;  %v4545_v6 = vld [vmem:[#allocation3 + $0x32] sm:$0xff] }
 0x51f   : > { %v6686_v47 = vpack.i.bf16 %v4546_v23, %v4545_v6  ;;  %v4575_v39 = vld [vmem:[#allocation3 + $0x30] sm:$0xff]  ;;  %v4576_v50 = vld [vmem:[#allocation3 + $0x38] sm:$0xff] }
 0x520   : > { %6682 = vrot.lane.b32.xlu0 %v6681_v31, %s7339_s23  ;;  %v6519_v1 = vpop.f32.mrb[6].mxu1  ;;  %v6691_v9 = vpack.i.bf16 %v4576_v50, %v4575_v39 }
 0x521   : > { %6672 = vrot.lane.b32.xlu1 %v6656_v12, %s7334_s14  ;;  %v4234_v14 = vadd.f32 %v6519_v1, %v10161_v15  ;;  %v4228_v3 = vpop.f32.mrb[7].mxu1 }
 0x522   : > { %v4229_v60 = vadd.f32 %v10161_v15, %v4228_v3 }
 0x523   : > { %v4364_v43 = vmax.f32 %v4234_v14, 0.0 }
 0x524   : > { %v4363_v0 = vmax.f32 %v4229_v60, 0.0  ;;  %6687 = vrot.lane.b32.xlu0 %v6686_v47, %s7333_s13  ;;  %v4610_v11 = vld [vmem:[#allocation3 + $0x51] sm:$0xff] }
 0x525   : > { %6677 = vrot.lane.b32.xlu1 %v6661_v58, %s7347_s18  ;;  %4452 = vst.msk [vmem:[#allocation3 + $0x69] sm:$0xff] %vm568_vm3, %v4364_v43  ;;  %v10185_v7 = vld [vmem:[#allocation3 + $0x48] sm:$0xff]  ;;  %v10187_v32 = vld [vmem:[#allocation3 + $0x50] sm:$0xff] }
 0x526   : > { %4451 = vst.msk [vmem:[#allocation3 + $0x61] sm:$0xff] %vm568_vm3, %v4363_v0  ;;  %v10192_v42 = vpack.i.bf16 %v10187_v32, %v10185_v7  ;;  %v4609_v25 = vld [vmem:[#allocation3 + $0x49] sm:$0xff]  ;;  %v4642_v34 = vld [vmem:[#allocation3 + $0x52] sm:$0xff] }
 0x527   : > { %v10199_v26 = vpack.i.bf16 %v4610_v11, %v4609_v25  ;;  %v4641_v20 = vld [vmem:[#allocation3 + $0x4a] sm:$0xff] }
 0x528   : > { %6732 = vrot.lane.b32.xlu0 %v10192_v42, %s7346_s17  ;;  %v6522_v56 = vpop.f32.mrb[8].mxu1  ;;  %v10206_v18 = vpack.i.bf16 %v4642_v34, %v4641_v20 }
 0x529   : > { %6692 = vrot.lane.b32.xlu1 %v6691_v9, %s7346_s17  ;;  %v4244_v62 = vadd.f32 %v6522_v56, %v10161_v15  ;;  %v4238_v19 = vpop.f32.mrb[9].mxu1 }
 0x52a   : > { %v4239_v57 = vadd.f32 %v10161_v15, %v4238_v19 }
 0x52b   : > { %v4366_v28 = vmax.f32 %v4244_v62, 0.0 }
 0x52c   : > { %v4365_v30 = vmax.f32 %v4239_v57, 0.0  ;;  %6752 = vrot.lane.b32.xlu0 %v10199_v26, %s7334_s14  ;;  %v4518_v5 = vld [vmem:[#allocation3 + $0x69] sm:$0xff] }
 0x52d   : > { %6697 = vrot.lane.b32.xlu1 %v6691_v9, %s7340_s24  ;;  %4454 = vst.msk [vmem:[#allocation3 + $0x81] sm:$0xff] %vm568_vm3, %v4366_v28  ;;  %v4517_v63 = vld [vmem:[#allocation3 + $0x61] sm:$0xff]  ;;  %v4550_v59 = vld [vmem:[#allocation3 + $0x6a] sm:$0xff] }
 0x52e   : > { %4453 = vst.msk [vmem:[#allocation3 + $0x79] sm:$0xff] %vm568_vm3, %v4365_v30  ;;  %v10213_v51 = vpack.i.bf16 %v4518_v5, %v4517_v63  ;;  %v4549_v40 = vld [vmem:[#allocation3 + $0x62] sm:$0xff] }
 0x52f   : > { %v10220_v61 = vpack.i.bf16 %v4550_v59, %v4549_v40  ;;  %v4674_v4 = vld [vmem:[#allocation3 + $0x60] sm:$0xff]  ;;  %v4675_v13 = vld [vmem:[#allocation3 + $0x68] sm:$0xff] }
 0x530   : > { %6757 = vrot.lane.b32.xlu0 %v10206_v18, %s7347_s18  ;;  %v6525_v16 = vpop.f32.mrb[10].mxu1  ;;  %v6776_v46 = vpack.i.bf16 %v4675_v13, %v4674_v4 }
 0x531   : > { %6702 = vrot.lane.b32.xlu1 %v6681_v31, %s7348_s19  ;;  %v4254_v37 = vadd.f32 %v6525_v16, %v10161_v15  ;;  %v4248_v35 = vpop.f32.mrb[11].mxu1 }
 0x532   : > { %v4249_v55 = vadd.f32 %v10161_v15, %v4248_v35 }
 0x533   : > { %v4368_v22 = vmax.f32 %v4254_v37, 0.0 }
 0x534   : > { %v4367_v10 = vmax.f32 %v4249_v55, 0.0  ;;  %6762 = vrot.lane.b32.xlu0 %v10213_v51, %s7339_s23  ;;  %v4520_v20 = vld [vmem:[#allocation3 + $0x81] sm:$0xff] }
 0x535   : > { %6707 = vrot.lane.b32.xlu1 %v6686_v47, %s7341_s25  ;;  %4456 = vst.msk [vmem:[#allocation3 + $0x99] sm:$0xff] %vm568_vm3, %v4368_v22  ;;  %v4581_v24 = vld [vmem:[#allocation3 + $0x78] sm:$0xff]  ;;  %v4582_v29 = vld [vmem:[#allocation3 + $0x80] sm:$0xff] }
 0x536   : > { %4455 = vst.msk [vmem:[#allocation3 + $0x91] sm:$0xff] %vm568_vm3, %v4367_v10  ;;  %v10243_v45 = vpack.i.bf16 %v4582_v29, %v4581_v24  ;;  %v4519_v34 = vld [vmem:[#allocation3 + $0x79] sm:$0xff] }
 0x537   : > { %v10276_v35 = vpack.i.bf16 %v4520_v20, %v4519_v34  ;;  %v4551_v40 = vld [vmem:[#allocation3 + $0x7a] sm:$0xff] }
 0x538   : > { %6767 = vrot.lane.b32.xlu0 %v10220_v61, %s7333_s13  ;;  %v6528_v44 = vpop.f32.mrb[12].mxu1 }
 0x539   : > { %6712 = vrot.lane.b32.xlu1 %v6681_v31, %s7334_s14  ;;  %v4264_v8 = vadd.f32 %v6528_v44, %v10161_v15  ;;  %v4258_v27 = vpop.f32.mrb[13].mxu1 }
 0x53a   : > { %v4259_v17 = vadd.f32 %v10161_v15, %v4258_v27 }
 0x53b   : > { %v4370_v49 = vmax.f32 %v4264_v8, 0.0 }
 0x53c   : > { %v4369_v2 = vmax.f32 %v4259_v17, 0.0  ;;  %6777 = vrot.lane.b32.xlu0 %v6776_v46, %s7340_s24  ;;  %v4522_v21 = vld [vmem:[#allocation3 + $0x99] sm:$0xff] }
 0x53d   : > { %6717 = vrot.lane.b32.xlu1 %v6686_v47, %s7347_s18  ;;  %4458 = vst.msk [vmem:[#allocation3 + $0xb1] sm:$0xff] %vm568_vm3, %v4370_v49  ;;  %v4521_v58 = vld [vmem:[#allocation3 + $0x91] sm:$0xff]  ;;  %v4554_v14 = vld [vmem:[#allocation3 + $0x9a] sm:$0xff] }
 0x53e   : > { %4457 = vst.msk [vmem:[#allocation3 + $0xa9] sm:$0xff] %vm568_vm3, %v4369_v2  ;;  %v10251_v6 = vpack.i.bf16 %v4522_v21, %v4521_v58  ;;  %v4553_v1 = vld [vmem:[#allocation3 + $0x92] sm:$0xff] }
 0x53f   : > { %v6831_v60 = vpack.i.bf16 %v4554_v14, %v4553_v1 }
 0x540   : > { %6782 = vrot.lane.b32.xlu0 %v10213_v51, %s7348_s19  ;;  %v6531_v52 = vpop.f32.mrb[14].mxu1 }
 0x541   : > { %6722 = vrot.lane.b32.xlu1 %v10199_v26, %s7339_s23  ;;  %v4274_v41 = vadd.f32 %v6531_v52, %v10161_v15  ;;  %v4268_v12 = vpop.f32.mrb[15].mxu1 }
 0x542   : > { %v4269_v36 = vadd.f32 %v10161_v15, %v4268_v12  ;;  %v4583_v12 = vld [vmem:[#allocation3 + $0x90] sm:$0xff] }
 0x543   : > { %v4372_v54 = vmax.f32 %v4274_v41, 0.0 }
 0x544   : > { %v4371_v48 = vmax.f32 %v4269_v36, 0.0  ;;  %6787 = vrot.lane.b32.xlu0 %v10220_v61, %s7341_s25 }
 0x545   : > { %6727 = vrot.lane.b32.xlu1 %v10206_v18, %s7333_s13  ;;  %4460 = vst.msk [vmem:[#allocation3 + $0xc9] sm:$0xff] %vm568_vm3, %v4372_v54  ;;  %v4585_v47 = vld [vmem:[#allocation3 + $0xa8] sm:$0xff]  ;;  %v4586_v43 = vld [vmem:[#allocation3 + $0xb0] sm:$0xff]  ;;  %v4584_v54 = vld [vmem:[#allocation3 + $0x98] sm:$0xff] }
 0x546   : > { %4459 = vst.msk [vmem:[#allocation3 + $0xc1] sm:$0xff] %vm568_vm3, %v4371_v48  ;;  %v10297_v58 = vpack.i.bf16 %v4584_v54, %v4583_v12  ;;  %v4555_v14 = vld [vmem:[#allocation3 + $0xaa] sm:$0xff] }
 0x548   : > { %6812 = vrot.lane.b32.xlu0 %v10243_v45, %s7346_s17  ;;  %v6534_v33 = vpop.f32.mrb[16].mxu1 }
 0x549   : > { %6737 = vrot.lane.b32.xlu1 %v10192_v42, %s7340_s24  ;;  %v4284_v53 = vadd.f32 %v6534_v33, %v10161_v15  ;;  %v4278_v38 = vpop.f32.mrb[17].mxu1  ;;  %v6851_v42 = vpack.i.bf16 %v4586_v43, %v4585_v47  ;;  %v4524_v33 = vld [vmem:[#allocation3 + $0xb1] sm:$0xff] }
 0x54a   : > { %v4279_v31 = vadd.f32 %v10161_v15, %v4278_v38 }
 0x54b   : > { %v4374_v23 = vmax.f32 %v4284_v53, 0.0  ;;  %v4523_v53 = vld [vmem:[#allocation3 + $0xa9] sm:$0xff] }
 0x54c   : > { %v4373_v3 = vmax.f32 %v4279_v31, 0.0  ;;  %6827 = vrot.lane.b32.xlu0 %v10251_v6, %s7339_s23  ;;  %v4526_v56 = vld [vmem:[#allocation3 + $0xc9] sm:$0xff] }
 0x54d   : > { %6742 = vrot.lane.b32.xlu1 %v10199_v26, %s7348_s19  ;;  %4462 = vst.msk [vmem:[#allocation3 + $0xe1] sm:$0xff] %vm568_vm3, %v4374_v23  ;;  %v4525_v11 = vld [vmem:[#allocation3 + $0xc1] sm:$0xff]  ;;  %v4558_v26 = vld [vmem:[#allocation3 + $0xca] sm:$0xff]  ;;  %v6841_v23 = vpack.i.bf16 %v4524_v33, %v4523_v53 }
 0x54e   : > { %4461 = vst.msk [vmem:[#allocation3 + $0xd9] sm:$0xff] %vm568_vm3, %v4373_v3  ;;  %v6856_v19 = vpack.i.bf16 %v4526_v56, %v4525_v11  ;;  %v4557_v57 = vld [vmem:[#allocation3 + $0xc2] sm:$0xff]  ;;  %v4556_v3 = vld [vmem:[#allocation3 + $0xb2] sm:$0xff] }
 0x54f   : > { %v6861_v28 = vpack.i.bf16 %v4558_v26, %v4557_v57 }
 0x550   : > { %6832 = vrot.lane.b32.xlu0 %v6831_v60, %s7333_s13  ;;  %v6537_v39 = vpop.f32.mrb[18].mxu1 }
 0x551   : > { %6747 = vrot.lane.b32.xlu1 %v10206_v18, %s7341_s25  ;;  %v4294_v50 = vadd.f32 %v6537_v39, %v10161_v15  ;;  %v4288_v0 = vpop.f32.mrb[19].mxu1  ;;  %v6846_v39 = vpack.i.bf16 %v4556_v3, %v4555_v14 }
 0x552   : > { %v4289_v9 = vadd.f32 %v10161_v15, %v4288_v0  ;;  %v10307_v0 = vld [vmem:[#allocation3 + $0xc0] sm:$0xff] }
 0x553   : > { %v4376_v25 = vmax.f32 %v4294_v50, 0.0 }
 0x554   : > { %v4375_v62 = vmax.f32 %v4289_v9, 0.0  ;;  %6852 = vrot.lane.b32.xlu0 %v6851_v42, %s7346_s17  ;;  %v4622_v10 = vld [vmem:[#allocation3 + $0xe1] sm:$0xff] }
 0x555   : > { %6772 = vrot.lane.b32.xlu1 %v6776_v46, %s7346_s17  ;;  %4464 = vst.msk [vmem:[#allocation3 + $0xf9] sm:$0xff] %vm568_vm3, %v4376_v25  ;;  %v4589_v30 = vld [vmem:[#allocation3 + $0xd8] sm:$0xff]  ;;  %v4590_v18 = vld [vmem:[#allocation3 + $0xe0] sm:$0xff]  ;;  %v10309_v9 = vld [vmem:[#allocation3 + $0xc8] sm:$0xff] }
 0x556   : > { %4463 = vst.msk [vmem:[#allocation3 + $0xf1] sm:$0xff] %vm568_vm3, %v4375_v62  ;;  %v6881_v55 = vpack.i.bf16 %v4590_v18, %v4589_v30  ;;  %v4621_v59 = vld [vmem:[#allocation3 + $0xd9] sm:$0xff]  ;;  %v4654_v8 = vld [vmem:[#allocation3 + $0xe2] sm:$0xff]  ;;  %v6866_v11 = vpack.i.bf16 %v10309_v9, %v10307_v0  ;;  %v10321_v62 = vpop.permute.xlu0 %6647 }
 0x557   : > { %v6886_v13 = vpack.i.bf16 %v4622_v10, %v4621_v59  ;;  %v4653_v44 = vld [vmem:[#allocation3 + $0xda] sm:$0xff] }
 0x558   : > { %6857 = vrot.lane.b32.xlu0 %v6856_v19, %s7339_s23  ;;  %v6891_v27 = vpack.i.bf16 %v4654_v8, %v4653_v44 }
 0x559   : > { %6792 = vrot.lane.b32.xlu1 %v10213_v51, %s7334_s14  ;;  %v4552_v51 = vld [vmem:[#allocation3 + $0x82] sm:$0xff] }
 0x55c   : > { %6862 = vrot.lane.b32.xlu0 %v6861_v28, %s7333_s13  ;;  %v6540_v63 = vpop.f32.mrb[20].mxu1  ;;  %v4530_v46 = vld [vmem:[#allocation3 + $0xf9] sm:$0xff] }
 0x55d   : > { %6797 = vrot.lane.b32.xlu1 %v10220_v61, %s7347_s18  ;;  %v4304_v5 = vadd.f32 %v6540_v63, %v10161_v15  ;;  %v4298_v16 = vpop.f32.mrb[21].mxu1  ;;  %v10283_v61 = vpack.i.bf16 %v4552_v51, %v4551_v40  ;;  %v4529_v17 = vld [vmem:[#allocation3 + $0xf1] sm:$0xff]  ;;  %v4562_v29 = vld [vmem:[#allocation3 + $0xfa] sm:$0xff]  ;;  %v10329_v63 = vpop.permute.xlu0 %6652 }
 0x55e   : > { %v4299_v37 = vadd.f32 %v10161_v15, %v4298_v16  ;;  %v6896_v41 = vpack.i.bf16 %v4530_v46, %v4529_v17  ;;  %v4561_v24 = vld [vmem:[#allocation3 + $0xf2] sm:$0xff] }
 0x55f   : > { %v4378_v22 = vmax.f32 %v4304_v5, 0.0  ;;  %v6901_v21 = vpack.i.bf16 %v4562_v29, %v4561_v24  ;;  %v4686_v38 = vld [vmem:[#allocation3 + $0xf0] sm:$0xff]  ;;  %v4687_v31 = vld [vmem:[#allocation3 + $0xf8] sm:$0xff] }
 0x560   : > { %v4377_v4 = vmax.f32 %v4299_v37, 0.0  ;;  %6882 = vrot.lane.b32.xlu0 %v6881_v55, %s7346_s17  ;;  %v6911_v1 = vpack.i.bf16 %v4687_v31, %v4686_v38 }
 0x561   : > { %6802 = vrot.lane.b32.xlu1 %v10276_v35, %s7339_s23  ;;  %4466 = vst.msk [vmem:[#allocation3 + $0x111] sm:$0xff] %vm568_vm3, %v4378_v22 }
 0x562   : > { %4465 = vst.msk [vmem:[#allocation3 + $0x109] sm:$0xff] %vm568_vm3, %v4377_v4 }
 0x564   : > { %6887 = vrot.lane.b32.xlu0 %v6886_v13, %s7334_s14 }
 0x565   : > { %6807 = vrot.lane.b32.xlu1 %v10283_v61, %s7333_s13 }
 0x568   : > { %6892 = vrot.lane.b32.xlu0 %v6891_v27, %s7347_s18  ;;  %v4721_v16 = vld [vmem:[#allocation3 + $0x111] sm:$0xff] }
 0x569   : > { %6817 = vrot.lane.b32.xlu1 %v10243_v45, %s7340_s24  ;;  %v6543_v49 = vpop.f32.mrb[22].mxu1  ;;  %v4688_v28 = vld [vmem:[#allocation3 + $0x108] sm:$0xff]  ;;  %v4689_v20 = vld [vmem:[#allocation3 + $0x110] sm:$0xff] }
 0x56a   : > { %v4314_v2 = vadd.f32 %v6543_v49, %v10161_v15  ;;  %v4308_v52 = vpop.f32.mrb[23].mxu1  ;;  %v6946_v18 = vpack.i.bf16 %v4689_v20, %v4688_v28  ;;  %v4720_v5 = vld [vmem:[#allocation3 + $0x109] sm:$0xff]  ;;  %v4753_v22 = vld [vmem:[#allocation3 + $0x112] sm:$0xff] }
 0x56b   : > { %v4309_v36 = vadd.f32 %v10161_v15, %v4308_v52  ;;  %v6951_v55 = vpack.i.bf16 %v4721_v16, %v4720_v5  ;;  %v4752_v51 = vld [vmem:[#allocation3 + $0x10a] sm:$0xff] }
 0x56c   : > { %v4380_v48 = vmax.f32 %v4314_v2, 0.0  ;;  %6897 = vrot.lane.b32.xlu0 %v6896_v41, %s7339_s23  ;;  %v6956_v44 = vpack.i.bf16 %v4753_v22, %v4752_v51 }
 0x56d   : > { %6822 = vrot.lane.b32.xlu1 %v10276_v35, %s7348_s19  ;;  %v4379_v45 = vmax.f32 %v4309_v36, 0.0 }
 0x56e   : > { %4468 = vst.msk [vmem:[#allocation3 + $0x129] sm:$0xff] %vm568_vm3, %v4380_v48 }
 0x56f   : > { %4467 = vst.msk [vmem:[#allocation3 + $0x121] sm:$0xff] %vm568_vm3, %v4379_v45 }
 0x570   : > { %6902 = vrot.lane.b32.xlu0 %v6901_v21, %s7333_s13 }
 0x571   : > { %6837 = vrot.lane.b32.xlu1 %v10297_v58, %s7346_s17 }
 0x574   : > { %6912 = vrot.lane.b32.xlu0 %v6911_v1, %s7340_s24 }
 0x575   : > { %6842 = vrot.lane.b32.xlu1 %v6841_v23, %s7339_s23  ;;  %v6546_v60 = vpop.f32.mrb[24].mxu1  ;;  %v4534_v52 = vld [vmem:[#allocation3 + $0x129] sm:$0xff] }
 0x576   : > { %v4324_v47 = vadd.f32 %v6546_v60, %v10161_v15  ;;  %v4318_v43 = vpop.f32.mrb[25].mxu1  ;;  %v4533_v2 = vld [vmem:[#allocation3 + $0x121] sm:$0xff]  ;;  %v4566_v54 = vld [vmem:[#allocation3 + $0x12a] sm:$0xff] }
 0x577   : > { %v4319_v50 = vadd.f32 %v10161_v15, %v4318_v43  ;;  %v6976_v36 = vpack.i.bf16 %v4534_v52, %v4533_v2  ;;  %v4690_v24 = vld [vmem:[#allocation3 + $0x120] sm:$0xff]  ;;  %v4691_v29 = vld [vmem:[#allocation3 + $0x128] sm:$0xff] }
 0x578   : > { %v4382_v42 = vmax.f32 %v4324_v47, 0.0  ;;  %6917 = vrot.lane.b32.xlu0 %v6896_v41, %s7348_s19  ;;  %v4565_v48 = vld [vmem:[#allocation3 + $0x122] sm:$0xff]  ;;  %v6986_v38 = vpack.i.bf16 %v4691_v29, %v4690_v24 }
 0x579   : > { %6847 = vrot.lane.b32.xlu1 %v6846_v39, %s7333_s13  ;;  %v4381_v25 = vmax.f32 %v4319_v50, 0.0  ;;  %v6981_v31 = vpack.i.bf16 %v4566_v54, %v4565_v48 }
 0x57a   : > { %4470 = vst.msk [vmem:[#allocation3 + $0x141] sm:$0xff] %vm568_vm3, %v4382_v42 }
 0x57b   : > { %4469 = vst.msk [vmem:[#allocation3 + $0x139] sm:$0xff] %vm568_vm3, %v4381_v25 }
 0x57c   : > { %6922 = vrot.lane.b32.xlu0 %v6901_v21, %s7341_s25 }
 0x57d   : > { %6867 = vrot.lane.b32.xlu1 %v6866_v11, %s7346_s17 }
 0x580   : > { %6927 = vrot.lane.b32.xlu0 %v6896_v41, %s7334_s14 }
 0x581   : > { %6872 = vrot.lane.b32.xlu1 %v6886_v13, %s7339_s23  ;;  %v6549_v56 = vpop.f32.mrb[26].mxu1  ;;  %v4568_v28 = vld [vmem:[#allocation3 + $0x142] sm:$0xff] }
 0x582   : > { %v4334_v19 = vadd.f32 %v6549_v56, %v10161_v15  ;;  %v4328_v57 = vpop.f32.mrb[27].mxu1  ;;  %v4692_v39 = vld [vmem:[#allocation3 + $0x138] sm:$0xff]  ;;  %v4693_v50 = vld [vmem:[#allocation3 + $0x140] sm:$0xff] }
 0x583   : > { %v4329_v26 = vadd.f32 %v10161_v15, %v4328_v57  ;;  %v7026_v25 = vpack.i.bf16 %v4693_v50, %v4692_v39  ;;  %v4724_v56 = vld [vmem:[#allocation3 + $0x139] sm:$0xff] }
 0x584   : > { %v4384_v34 = vmax.f32 %v4334_v19, 0.0  ;;  %6932 = vrot.lane.b32.xlu0 %v6901_v21, %s7347_s18  ;;  %v4725_v19 = vld [vmem:[#allocation3 + $0x141] sm:$0xff] }
 0x585   : > { %6877 = vrot.lane.b32.xlu1 %v6891_v27, %s7333_s13  ;;  %v4383_v30 = vmax.f32 %v4329_v26, 0.0  ;;  %v7031_v26 = vpack.i.bf16 %v4725_v19, %v4724_v56 }
 0x586   : > { %4472 = vst.msk [vmem:[#allocation3 + $0x159] sm:$0xff] %vm568_vm3, %v4384_v34  ;;  %v4567_v34 = vld [vmem:[#allocation3 + $0x13a] sm:$0xff] }
 0x587   : > { %4471 = vst.msk [vmem:[#allocation3 + $0x151] sm:$0xff] %vm568_vm3, %v4383_v30  ;;  %v7021_v16 = vpack.i.bf16 %v4568_v28, %v4567_v34 }
 0x588   : > { %6947 = vrot.lane.b32.xlu0 %v6946_v18, %s7340_s24 }
 0x589   : > { %6907 = vrot.lane.b32.xlu1 %v6911_v1, %s7346_s17 }
 0x58a   : > { %v10337_v40 = vpop.permute.xlu0 %6667 }
 0x58b   : > { %v10333_v37 = vpop.permute.xlu1 %6657 }
 0x58c   : > { %6952 = vrot.lane.b32.xlu0 %v6951_v55, %s7348_s19 }
 0x58d   : > { %6937 = vrot.lane.b32.xlu1 %v6951_v55, %s7339_s23  ;;  %v6552_v59 = vpop.f32.mrb[28].mxu1 }
 0x58e   : > { %v4344_v10 = vadd.f32 %v6552_v59, %v10161_v15  ;;  %v4338_v4 = vpop.f32.mrb[29].mxu1  ;;  %v4537_v30 = vld [vmem:[#allocation3 + $0x151] sm:$0xff]  ;;  %v4570_v59 = vld [vmem:[#allocation3 + $0x15a] sm:$0xff] }
 0x58f   : > { %v10340_v13 = vpop.permute.xlu1 %6662  ;;  %v4339_v8 = vadd.f32 %v10161_v15, %v4338_v4  ;;  %v4569_v22 = vld [vmem:[#allocation3 + $0x152] sm:$0xff] }
 0x590   : > { %v4386_v27 = vmax.f32 %v4344_v10, 0.0  ;;  %6957 = vrot.lane.b32.xlu0 %v6956_v44, %s7341_s25  ;;  %v10404_v4 = vpack.i.bf16 %v4570_v59, %v4569_v22 }
 0x591   : > { %6942 = vrot.lane.b32.xlu1 %v6956_v44, %s7333_s13  ;;  %v4385_v17 = vmax.f32 %v4339_v8, 0.0 }
 0x592   : > { %4474 = vst.msk [vmem:[#allocation3 + $0x171] sm:$0xff] %vm568_vm3, %v4386_v27  ;;  %v10346_v46 = vpop.permute.xlu0 %6682 }
 0x593   : > { %v10348_v49 = vpop.permute.xlu1 %6672  ;;  %4473 = vst.msk [vmem:[#allocation3 + $0x169] sm:$0xff] %vm568_vm3, %v4385_v17 }
 0x594   : > { %6962 = vrot.lane.b32.xlu0 %v6946_v18, %s7346_s17  ;;  %v4538_v18 = vld [vmem:[#allocation3 + $0x159] sm:$0xff] }
 0x595   : > { %6967 = vrot.lane.b32.xlu1 %v6951_v55, %s7334_s14  ;;  %v10395_v55 = vpack.i.bf16 %v4538_v18, %v4537_v30  ;;  %v4742_v18 = vld [vmem:[#allocation3 + $0x92] sm:$0xff] }
 0x596   : > { %v10353_v41 = vpop.permute.xlu0 %6687 }
 0x597   : > { %v10355_v12 = vpop.permute.xlu1 %6677 }
 0x598   : > { %6977 = vrot.lane.b32.xlu0 %v6976_v36, %s7339_s23 }
 0x599   : > { %6972 = vrot.lane.b32.xlu1 %v6956_v44, %s7347_s18  ;;  %v6555_v45 = vpop.f32.mrb[30].mxu1  ;;  %v4540_v27 = vld [vmem:[#allocation3 + $0x171] sm:$0xff] }
 0x59a   : > { %v4354_v21 = vadd.f32 %v6555_v45, %v10161_v15  ;;  %v4348_v33 = vpop.f32.mrb[31].mxu1  ;;  %v10360_v53 = vpop.permute.xlu0 %6732  ;;  %v4539_v8 = vld [vmem:[#allocation3 + $0x169] sm:$0xff]  ;;  %v4572_v54 = vld [vmem:[#allocation3 + $0x172] sm:$0xff] }
 0x59b   : > { %v4349_v23 = vadd.f32 %v10161_v15, %v4348_v33  ;;  %v10363_v1 = vpop.permute.xlu1 %6692  ;;  %v10412_v2 = vpack.i.bf16 %v4540_v27, %v4539_v8 }
 0x59c   : > { %v4388_v14 = vmax.f32 %v4354_v21, 0.0  ;;  %6982 = vrot.lane.b32.xlu0 %v6981_v31, %s7333_s13 }
 0x59d   : > { %6987 = vrot.lane.b32.xlu1 %v6986_v38, %s7340_s24  ;;  %v4387_v3 = vmax.f32 %v4349_v23, 0.0  ;;  %v10439_v23 = vld [vmem:[#allocation3 + $0x158] sm:$0xff] }
 0x59e   : > { %4476 = vst.msk [vmem:[#allocation3 + $0x189] sm:$0xff] %vm568_vm3, %v4388_v14  ;;  %v10368_v60 = vpop.permute.xlu0 %6752 }
 0x59f   : > { %4475 = vst.msk [vmem:[#allocation3 + $0x181] sm:$0xff] %vm568_vm3, %v4387_v3  ;;  %v10371_v47 = vpop.permute.xlu1 %6697 }
 0x5a0   : > { %7007 = vrot.lane.b32.xlu0 %v6976_v36, %s7334_s14 }
 0x5a1   : > { %6992 = vrot.lane.b32.xlu1 %v6976_v36, %s7348_s19  ;;  %v4571_v36 = vld [vmem:[#allocation3 + $0x16a] sm:$0xff] }
 0x5a2   : > { %v10375_v15 = vpop.permute.xlu0 %6757  ;;  %v10419_v29 = vpack.i.bf16 %v4572_v54, %v4571_v36 }
 0x5a3   : > { %v10377_v43 = vpop.permute.xlu1 %6702 }
 0x5a4   : > { %7012 = vrot.lane.b32.xlu0 %v6981_v31, %s7347_s18 }
 0x5a5   : > { %6997 = vrot.lane.b32.xlu1 %v6981_v31, %s7341_s25  ;;  %v10437_v31 = vld [vmem:[#allocation3 + $0x150] sm:$0xff] }
 0x5a6   : > { %v10381_v42 = vpop.permute.xlu0 %6762 }
 0x5a7   : > { %v10383_v11 = vpop.permute.xlu1 %6707 }
 0x5a8   : > { %7027 = vrot.lane.b32.xlu0 %v7026_v25, %s7340_s24 }
 0x5a9   : > { %7002 = vrot.lane.b32.xlu1 %v6986_v38, %s7346_s17 }
 0x5aa   : > { %v10387_v57 = vpop.permute.xlu0 %6767 }
 0x5ab   : > { %11386 = vst [vmem:[#allocation15_spill] sm:$0xff] %v10387_v57  ;;  %v10389_v20 = vpop.permute.xlu1 %6712 }
 0x5ac   : > { %7032 = vrot.lane.b32.xlu0 %v7031_v26, %s7348_s19 }
 0x5ad   : > { %7017 = vrot.lane.b32.xlu1 %v7031_v26, %s7339_s23 }
 0x5ae   : > { %v10393_v5 = vpop.permute.xlu0 %6777 }
 0x5af   : > { %v10397_v51 = vpop.permute.xlu1 %6717 }
 0x5b0   : > { %7037 = vrot.lane.b32.xlu0 %v10395_v55, %s7339_s23 }
 0x5b1   : > { %7022 = vrot.lane.b32.xlu1 %v7021_v16, %s7333_s13 }
 0x5b2   : > { %v10402_v10 = vpop.permute.xlu0 %6782 }
 0x5b3   : > { %v6723_v44 = vpop.permute.xlu1 %6722 }
 0x5b4   : > { %7042 = vrot.lane.b32.xlu0 %v10404_v4, %s7333_s13  ;;  %v6725_v3 = vunpack.i.h.bf16 %v6723_v44  ;;  %v6724_v39 = vunpack.i.l.bf16 %v6723_v44 }
 0x5b5   : > { %7052 = vrot.lane.b32.xlu1 %v10283_v61, %s7341_s25 }
 0x5b6   : > { %v10410_v17 = vpop.permute.xlu0 %6787  ;;  %v5797_v28 = vsel %vm568_vm3, %v10187_v32, %v6725_v3  ;;  %v5796_v34 = vsel %vm568_vm3, %v10185_v7, %v6724_v39 }
 0x5b7   : > { %v6728_v52 = vpop.permute.xlu1 %6727 }
 0x5b8   : > { %7047 = vrot.lane.b32.xlu0 %v7021_v16, %s7341_s25  ;;  %v6729_v56 = vunpack.i.l.bf16 %v6728_v52 }
 0x5b9   : > { %7062 = vrot.lane.b32.xlu1 %v10412_v2, %s7339_s23 }
 0x5ba   : > { %v10417_v24 = vpop.permute.xlu0 %6812  ;;  %v5828_v22 = vsel %vm342_vm0, %v5796_v34, %v6729_v56  ;;  %v4477_v34 = vld [vmem:[#allocation3] sm:$0xff] }
 0x5bb   : > { %11387 = vst [vmem:[#allocation18_spill] sm:$0xff] %v10417_v24  ;;  %v10421_v48 = vpop.permute.xlu1 %6737 }
 0x5bc   : > { %7057 = vrot.lane.b32.xlu0 %v7026_v25, %s7346_s17  ;;  %v6730_v25 = vunpack.i.h.bf16 %v6728_v52 }
 0x5bd   : > { %7067 = vrot.lane.b32.xlu1 %v10419_v29, %s7333_s13 }
 0x5be   : > { %v10426_v45 = vpop.permute.xlu0 %6827 }
 0x5bf   : > { %11388 = vst [vmem:[#allocation16_spill] sm:$0xff] %v10426_v45  ;;  %v10428_v21 = vpop.permute.xlu1 %6742 }
 0x5c0   : > { %7077 = vrot.lane.b32.xlu0 %v10276_v35, %s7334_s14  ;;  %v7091_v35 = vpack.i.bf16 %v10439_v23, %v10437_v31 }
 0x5c1   : > { %7072 = vrot.lane.b32.xlu1 %v7031_v26, %s7334_s14 }
 0x5c2   : > { %v10433_v33 = vpop.permute.xlu0 %6832 }
 0x5c3   : > { %11389 = vst [vmem:[#allocation20_spill] sm:$0xff] %v10433_v33  ;;  %v10435_v38 = vpop.permute.xlu1 %6747  ;;  %v6699_v33 = vunpack.i.l.bf16 %v10371_v47 }
 0x5c4   : > { %7087 = vrot.lane.b32.xlu0 %v10283_v61, %s7347_s18 }
 0x5c5   : > { %7082 = vrot.lane.b32.xlu1 %v7021_v16, %s7347_s18  ;;  %v4743_v16 = vld [vmem:[#allocation3 + $0x9a] sm:$0xff] }
 0x5c6   : > { %v10444_v14 = vpop.permute.xlu0 %6852  ;;  %v7116_v36 = vpack.i.bf16 %v4743_v16, %v4742_v18  ;;  %v6650_v16 = vunpack.i.h.bf16 %v10321_v62 }
 0x5c7   : > { %11390 = vst [vmem:[#allocation76_spill] sm:$0xff] %v10444_v14  ;;  %v6773_v50 = vpop.permute.xlu1 %6772 }
 0x5c8   : > { %7097 = vrot.lane.b32.xlu0 %v10297_v58, %s7340_s24  ;;  %v6775_v19 = vunpack.i.h.bf16 %v6773_v50  ;;  %v6774_v26 = vunpack.i.l.bf16 %v6773_v50  ;;  %v5829_v58 = vsel %vm342_vm0, %v5797_v28, %v6730_v25  ;;  %v6649_v28 = vunpack.i.l.bf16 %v10321_v62 }
 0x5c9   : > { %7092 = vrot.lane.b32.xlu1 %v7091_v35, %s7340_s24  ;;  %v6655_v62 = vunpack.i.h.bf16 %v10329_v63 }
 0x5ca   : > { %v10451_v61 = vpop.permute.xlu0 %6857  ;;  %v5861_v32 = vsel %vm5854_vm14, %v5828_v22, %v6774_v26  ;;  %v5862_v8 = vsel %vm5854_vm14, %v5829_v58, %v6775_v19  ;;  %v4615_v19 = vld [vmem:[#allocation3 + $0x91] sm:$0xff]  ;;  %v4616_v26 = vld [vmem:[#allocation3 + $0x99] sm:$0xff] }
 0x5cb   : > { %v6793_v30 = vpop.permute.xlu1 %6792  ;;  %v7131_v58 = vpack.i.bf16 %v4616_v26, %v4615_v19 }
 0x5cc   : > { %v6795_v59 = vunpack.i.h.bf16 %v6793_v30  ;;  %v6794_v44 = vunpack.i.l.bf16 %v6793_v30  ;;  %7107 = vrot.lane.b32.xlu0 %v10251_v6, %s7348_s19 }
 0x5cd   : > { %7102 = vrot.lane.b32.xlu1 %v10395_v55, %s7348_s19 }
 0x5ce   : > { %v5893_v7 = vsel %vm3788_vm5, %v5861_v32, %v6794_v44  ;;  %v5894_v27 = vsel %vm3788_vm5, %v5862_v8, %v6795_v59  ;;  %v10467_v52 = vpop.permute.xlu0 %6862  ;;  %v4478_v59 = vld [vmem:[#allocation3 + $0x8] sm:$0xff]  ;;  %v6654_v44 = vunpack.i.l.bf16 %v10329_v63  ;;  %v10510_v63 = vld [vmem:[#allocation3 + $0xb0] sm:$0xff] }
 0x5cf   : > { %v6798_v54 = vpop.permute.xlu1 %6797  ;;  %v10484_v8 = vld [vmem:[#allocation3 + $0x168] sm:$0xff]  ;;  %v5791_v19 = vsel %vm568_vm3, %v4478_v59, %v6650_v16  ;;  %v6670_v16 = vunpack.i.h.bf16 %v10337_v40  ;;  %v6669_v59 = vunpack.i.l.bf16 %v10337_v40  ;;  %v6680_v40 = vunpack.i.h.bf16 %v10355_v12 }
 0x5d0   : > { %v6800_v3 = vunpack.i.h.bf16 %v6798_v54  ;;  %v6799_v39 = vunpack.i.l.bf16 %v6798_v54  ;;  %7117 = vrot.lane.b32.xlu0 %v7116_v36, %s7341_s25 }
 0x5d1   : > { %7112 = vrot.lane.b32.xlu1 %v10404_v4, %s7341_s25 }
 0x5d2   : > { %v5926_v6 = vsel %vm5919_vm15, %v5893_v7, %v6799_v39  ;;  %v5927_v50 = vsel %vm5919_vm15, %v5894_v27, %v6800_v3  ;;  %v10474_v25 = vpop.permute.xlu0 %6882  ;;  %v10486_v7 = vld [vmem:[#allocation3 + $0x170] sm:$0xff]  ;;  %v4487_v27 = vld [vmem:[#allocation3 + $0x78] sm:$0xff] }
 0x5d3   : > { %v6803_v56 = vpop.permute.xlu1 %6802 }
 0x5d4   : > { %7127 = vrot.lane.b32.xlu0 %v10395_v55, %s7334_s14  ;;  %v6805_v30 = vunpack.i.h.bf16 %v6803_v56  ;;  %v6804_v18 = vunpack.i.l.bf16 %v6803_v56  ;;  %v5790_v55 = vsel %vm568_vm3, %v4477_v34, %v6649_v28 }
 0x5d5   : > { %7122 = vrot.lane.b32.xlu1 %v7091_v35, %s7346_s17  ;;  %v4488_v35 = vld [vmem:[#allocation3 + $0x80] sm:$0xff] }
 0x5d6   : > { %v10481_v22 = vpop.permute.xlu0 %6887  ;;  %v5801_v39 = vsel %vm568_vm3, %v4488_v35, %v6805_v30  ;;  %v5800_v56 = vsel %vm568_vm3, %v4487_v27, %v6804_v18  ;;  %v5822_v30 = vsel %vm342_vm0, %v5790_v55, %v6654_v44  ;;  %v4712_v35 = vld [vmem:[#allocation3 + $0xa9] sm:$0xff]  ;;  %v6674_v44 = vunpack.i.l.bf16 %v10348_v49 }
 0x5d7   : > { %v6808_v32 = vpop.permute.xlu1 %6807  ;;  %v5855_v45 = vsel %vm5854_vm14, %v5822_v30, %v6669_v59 }
 0x5d8   : > { %v6810_v54 = vunpack.i.h.bf16 %v6808_v32  ;;  %v6809_v3 = vunpack.i.l.bf16 %v6808_v32  ;;  %7137 = vrot.lane.b32.xlu0 %v10404_v4, %s7347_s18  ;;  %v10506_v4 = vpack.i.bf16 %v10486_v7, %v10484_v8 }
 0x5d9   : > { %7132 = vrot.lane.b32.xlu1 %v7131_v58, %s7334_s14  ;;  %v10508_v58 = vld [vmem:[#allocation3 + $0xa8] sm:$0xff] }
 0x5da   : > { %v10497_v26 = vsel %vm342_vm0, %v5800_v56, %v6809_v3  ;;  %v10500_v28 = vsel %vm342_vm0, %v5801_v39, %v6810_v54  ;;  %v10502_v34 = vpop.permute.xlu0 %6892  ;;  %v4713_v54 = vld [vmem:[#allocation3 + $0xb1] sm:$0xff]  ;;  %v5823_v3 = vsel %vm342_vm0, %v5791_v19, %v6655_v62  ;;  %v6675_v39 = vunpack.i.h.bf16 %v10348_v49 }
 0x5db   : > { %v6818_v18 = vpop.permute.xlu1 %6817  ;;  %v7151_v55 = vpack.i.bf16 %v10510_v63, %v10508_v58  ;;  %v6679_v56 = vunpack.i.l.bf16 %v10355_v12  ;;  %v10530_v19 = vpack.i.bf16 %v4713_v54, %v4712_v35  ;;  %v5856_v49 = vsel %vm5854_vm14, %v5823_v3, %v6670_v16  ;;  %v4745_v3 = vld [vmem:[#allocation3 + $0xb2] sm:$0xff] }
 0x5dc   : > { %v6820_v32 = vunpack.i.h.bf16 %v6818_v18  ;;  %v6819_v27 = vunpack.i.l.bf16 %v6818_v18  ;;  %7147 = vrot.lane.b32.xlu0 %v10506_v4, %s7340_s24  ;;  %v5888_v12 = vsel %vm3788_vm5, %v5856_v49, %v6675_v39  ;;  %v10551_v39 = vld [vmem:[#allocation3 + $0xc0] sm:$0xff]  ;;  %v6865_v49 = vunpack.i.h.bf16 %v10467_v52 }
 0x5dd   : > { %7142 = vrot.lane.b32.xlu1 %v7116_v36, %s7347_s18  ;;  %v5921_v30 = vsel %vm5919_vm15, %v5888_v12, %v6680_v40  ;;  %v6709_v40 = vunpack.i.l.bf16 %v10383_v11 }
 0x5de   : > { %v5958_v18 = vsel %vm3821_vm6, %v5926_v6, %v6819_v27  ;;  %v5959_v14 = vsel %vm3821_vm6, %v5927_v50, %v6820_v32  ;;  %v10527_v36 = vpop.permute.xlu0 %6897  ;;  %v5887_v6 = vsel %vm3788_vm5, %v5855_v45, %v6674_v44  ;;  %v6700_v50 = vunpack.i.h.bf16 %v10371_v47  ;;  %v4744_v27 = vld [vmem:[#allocation3 + $0xaa] sm:$0xff] }
 0x5df   : > { %v6823_v62 = vpop.permute.xlu1 %6822  ;;  %v6704_v32 = vunpack.i.l.bf16 %v10377_v43  ;;  %v5920_v16 = vsel %vm5919_vm15, %v5887_v6, %v6679_v56  ;;  %v10553_v45 = vld [vmem:[#allocation3 + $0xc8] sm:$0xff]  ;;  %v6705_v44 = vunpack.i.h.bf16 %v10377_v43  ;;  %v6860_v56 = vunpack.i.h.bf16 %v10451_v61 }
 0x5e0   : > { %v6825_v24 = vunpack.i.h.bf16 %v6823_v62  ;;  %v6824_v57 = vunpack.i.l.bf16 %v6823_v62  ;;  %7157 = vrot.lane.b32.xlu0 %v10412_v2, %s7348_s19  ;;  %v5952_v47 = vsel %vm3821_vm6, %v5920_v16, %v6699_v33  ;;  %v5953_v33 = vsel %vm3821_vm6, %v5921_v30, %v6700_v50 }
 0x5e1   : > { %7152 = vrot.lane.b32.xlu1 %v7151_v55, %s7340_s24  ;;  %v6710_v55 = vunpack.i.h.bf16 %v10383_v11  ;;  %v5985_v43 = vsel %vm5984_vm1, %v5952_v47, %v6704_v32  ;;  %v7171_v62 = vpack.i.bf16 %v4745_v3, %v4744_v27  ;;  %v7206_v11 = vpack.i.bf16 %v10553_v45, %v10551_v39  ;;  %v7315_v39 = vld [vmem:[#allocation3 + $0x20] sm:$0xff] }
 0x5e2   : > { %v10544_v59 = vsel %vm5984_vm1, %v5958_v18, %v6824_v57  ;;  %v10547_v35 = vsel %vm5984_vm1, %v5959_v14, %v6825_v24  ;;  %v10549_v54 = vpop.permute.xlu0 %6902  ;;  %v6859_v24 = vunpack.i.l.bf16 %v10451_v61  ;;  %v6864_v61 = vunpack.i.l.bf16 %v10467_v52 }
 0x5e3   : > { %v6838_v57 = vpop.permute.xlu1 %6837  ;;  %v5986_v50 = vsel %vm5984_vm1, %v5953_v33, %v6705_v44  ;;  %v10581_v32 = vsel %vm3854_vm7, %v5985_v43, %v6709_v40  ;;  %v6885_v27 = vunpack.i.h.bf16 %v10474_v25  ;;  %v6884_v30 = vunpack.i.l.bf16 %v10474_v25 }
 0x5e4   : > { %v6840_v14 = vunpack.i.h.bf16 %v6838_v57  ;;  %v6839_v18 = vunpack.i.l.bf16 %v6838_v57  ;;  %7167 = vrot.lane.b32.xlu0 %v10419_v29, %s7341_s25  ;;  %v10586_v52 = vsel %vm3854_vm7, %v5986_v50, %v6710_v55  ;;  %v6890_v47 = vunpack.i.h.bf16 %v10481_v22 }
 0x5e5   : > { %7162 = vrot.lane.b32.xlu1 %v10530_v19, %s7348_s19  ;;  %v6889_v25 = vunpack.i.l.bf16 %v10481_v22 }
 0x5e6   : > { %v10573_v12 = vsel %vm5854_vm14, %v10497_v26, %v6839_v18  ;;  %v10577_v6 = vsel %vm5854_vm14, %v10500_v28, %v6840_v14  ;;  %v6913_v16 = vpop.permute.xlu0 %6912  ;;  %v5806_v26 = vsel %vm568_vm3, %v10307_v0, %v6859_v24  ;;  %v5807_v28 = vsel %vm568_vm3, %v10309_v9, %v6860_v56 }
 0x5e7   : > { %v6843_v3 = vpop.permute.xlu1 %6842  ;;  %v5838_v55 = vsel %vm342_vm0, %v5806_v26, %v6864_v61  ;;  %v5839_v57 = vsel %vm342_vm0, %v5807_v28, %v6865_v49  ;;  %v6895_v0 = vunpack.i.h.bf16 %v10502_v34  ;;  %v6894_v9 = vunpack.i.l.bf16 %v10502_v34 }
 0x5e8   : > { %7177 = vrot.lane.b32.xlu0 %v10506_v4, %s7346_s17  ;;  %v6845_v44 = vunpack.i.h.bf16 %v6843_v3  ;;  %v6844_v40 = vunpack.i.l.bf16 %v6843_v3  ;;  %v5872_v4 = vsel %vm5854_vm14, %v5839_v57, %v6885_v27  ;;  %v5871_v24 = vsel %vm5854_vm14, %v5838_v55, %v6884_v30 }
 0x5e9   : > { %7172 = vrot.lane.b32.xlu1 %v7171_v62, %s7341_s25  ;;  %v6915_v14 = vunpack.i.h.bf16 %v6913_v16  ;;  %v6914_v18 = vunpack.i.l.bf16 %v6913_v16  ;;  %v5903_v34 = vsel %vm3788_vm5, %v5871_v24, %v6889_v25  ;;  %v5904_v49 = vsel %vm3788_vm5, %v5872_v4, %v6890_v47 }
 0x5ea   : > { %v6918_v56 = vpop.permute.xlu0 %6917  ;;  %v5805_v61 = vsel %vm568_vm3, %v10510_v63, %v6845_v44  ;;  %v5804_v16 = vsel %vm568_vm3, %v10508_v58, %v6844_v40  ;;  %v5936_v27 = vsel %vm5919_vm15, %v5903_v34, %v6894_v9  ;;  %v5937_v30 = vsel %vm5919_vm15, %v5904_v49, %v6895_v0  ;;  %v4698_v0 = vld [vmem:[#allocation3 + $0x180] sm:$0xff]  ;;  %v4699_v9 = vld [vmem:[#allocation3 + $0x188] sm:$0xff] }
 0x5eb   : > { %v6848_v33 = vpop.permute.xlu1 %6847  ;;  %v6920_v43 = vunpack.i.h.bf16 %v6918_v56  ;;  %v6919_v22 = vunpack.i.l.bf16 %v6918_v56  ;;  %v5968_v25 = vsel %vm3821_vm6, %v5936_v27, %v6914_v18  ;;  %v6660_v56 = vunpack.i.h.bf16 %v10333_v37  ;;  %v4746_v27 = vld [vmem:[#allocation3 + $0xc2] sm:$0xff] }
 0x5ec   : > { %v6850_v50 = vunpack.i.h.bf16 %v6848_v33  ;;  %v6849_v3 = vunpack.i.l.bf16 %v6848_v33  ;;  %7187 = vrot.lane.b32.xlu0 %v10530_v19, %s7334_s14  ;;  %v6659_v4 = vunpack.i.l.bf16 %v10333_v37  ;;  %v10647_v49 = vpack.i.bf16 %v4699_v9, %v4698_v0 }
 0x5ed   : > { %7182 = vrot.lane.b32.xlu1 %v10412_v2, %s7334_s14  ;;  %v5969_v2 = vsel %vm3821_vm6, %v5937_v30, %v6915_v14  ;;  %v6001_v63 = vsel %vm5984_vm1, %v5968_v25, %v6919_v22  ;;  %v6665_v22 = vunpack.i.h.bf16 %v10340_v13  ;;  %v6695_v30 = vunpack.i.h.bf16 %v10363_v1  ;;  %v4763_v25 = vld [vmem:[#allocation3 + $0x18a] sm:$0xff] }
 0x5ee   : > { %v5836_v26 = vsel %vm342_vm0, %v5804_v16, %v6849_v3  ;;  %v5837_v19 = vsel %vm342_vm0, %v5805_v61, %v6850_v50  ;;  %v6923_v28 = vpop.permute.xlu0 %6922  ;;  %v6002_v58 = vsel %vm5984_vm1, %v5969_v2, %v6920_v43  ;;  %v6694_v50 = vunpack.i.l.bf16 %v10363_v1  ;;  %v4714_v61 = vld [vmem:[#allocation3 + $0xc1] sm:$0xff]  ;;  %v4715_v16 = vld [vmem:[#allocation3 + $0xc9] sm:$0xff] }
 0x5ef   : > { %v6925_v47 = vunpack.i.h.bf16 %v6923_v28  ;;  %v6924_v55 = vunpack.i.l.bf16 %v6923_v28  ;;  %v6868_v57 = vpop.permute.xlu1 %6867  ;;  %v6575_v3 = vpack.c.bf16 %v10586_v52, %v10581_v32  ;;  %v7314_v32 = vld [vmem:[#allocation3 + $0x18] sm:$0xff]  ;;  %v6715_v28 = vunpack.i.h.bf16 %v10389_v20  ;;  %v4762_v1 = vld [vmem:[#allocation3 + $0x182] sm:$0xff] }
 0x5f0   : > { %v6870_v44 = vunpack.i.h.bf16 %v6868_v57  ;;  %v6869_v40 = vunpack.i.l.bf16 %v6868_v57  ;;  %7197 = vrot.lane.b32.xlu0 %v7171_v62, %s7347_s18  ;;  %v6664_v62 = vunpack.i.l.bf16 %v10340_v13  ;;  %v4730_v13 = vld [vmem:[#allocation3 + $0x181] sm:$0xff]  ;;  %v5792_v52 = vsel %vm568_vm3, %v7314_v32, %v6659_v4 }
 0x5f1   : > { %7192 = vrot.lane.b32.xlu1 %v10419_v29, %s7347_s18  ;;  %v6033_v24 = vsel %vm3854_vm7, %v6001_v63, %v6924_v55  ;;  %v6034_v14 = vsel %vm3854_vm7, %v6002_v58, %v6925_v47  ;;  %v6714_v2 = vunpack.i.l.bf16 %v10389_v20  ;;  %v5793_v45 = vsel %vm568_vm3, %v7315_v39, %v6660_v56 }
 0x5f2   : > { %v6572_v33 = vpack.c.bf16 %v6034_v14, %v6033_v24  ;;  %v10636_v29 = vsel %vm5854_vm14, %v5836_v26, %v6869_v40  ;;  %v10639_v43 = vsel %vm5854_vm14, %v5837_v19, %v6870_v44  ;;  %v10641_v37 = vpop.permute.xlu0 %6927  ;;  %v4731_v26 = vld [vmem:[#allocation3 + $0x189] sm:$0xff]  ;;  %v10665_v55 = vpack.i.bf16 %v4715_v16, %v4714_v61 }
 0x5f3   : > { %v6873_v34 = vpop.permute.xlu1 %6872  ;;  %v4747_v19 = vld [vmem:[#allocation3 + $0xca] sm:$0xff]  ;;  %v5825_v57 = vsel %vm342_vm0, %v5793_v45, %v6665_v22  ;;  %v7211_v58 = vpack.i.bf16 %v4731_v26, %v4730_v13  ;;  %v10674_v56 = vpack.i.bf16 %v4763_v25, %v4762_v1  ;;  %v6719_v22 = vunpack.i.l.bf16 %v10397_v51  ;;  %v10687_v13 = vld [vmem:[#allocation3 + $0xd8] sm:$0xff]  ;;  %v10689_v26 = vld [vmem:[#allocation3 + $0xe0] sm:$0xff] }
 0x5f4   : > { %6574 = vmatprep.subr.msk.bf16.mxu0 %vm10630_vm4, %v6572_v33  ;;  %7207 = vrot.lane.b32.xlu0 %v7206_v11, %s7340_s24  ;;  %v5824_v11 = vsel %vm342_vm0, %v5792_v52, %v6664_v62  ;;  %v10669_v44 = vpack.i.bf16 %v4747_v19, %v4746_v27  ;;  %v5858_v40 = vsel %vm5854_vm14, %v5825_v57, %v6695_v30  ;;  %v6875_v0 = vunpack.i.h.bf16 %v6873_v34 }
 0x5f5   : > { %7202 = vrot.lane.b32.xlu1 %v10647_v49, %s7340_s24  ;;  %6577 = vmatpush3.bf16.xpose.msk.msra.mxu0 %vm10630_vm4, %v6575_v3  ;;  %v5857_v20 = vsel %vm5854_vm14, %v5824_v11, %v6694_v50  ;;  %v6874_v9 = vunpack.i.l.bf16 %v6873_v34  ;;  %v5890_v24 = vsel %vm3788_vm5, %v5858_v40, %v6715_v28  ;;  %v6720_v33 = vunpack.i.h.bf16 %v10397_v51 }
 0x5f6   : > { %v6933_v47 = vpop.permute.xlu0 %6932  ;;  %v5889_v4 = vsel %vm3788_vm5, %v5857_v20, %v6714_v2  ;;  %v6740_v50 = vunpack.i.h.bf16 %v10421_v48  ;;  %v6739_v3 = vunpack.i.l.bf16 %v10421_v48  ;;  %v6745_v61 = vunpack.i.h.bf16 %v10428_v21 }
 0x5f7   : > { %v6878_v63 = vpop.permute.xlu1 %6877  ;;  %v6744_v16 = vunpack.i.l.bf16 %v10428_v21  ;;  %v6750_v27 = vunpack.i.h.bf16 %v10435_v38  ;;  %v6749_v30 = vunpack.i.l.bf16 %v10435_v38  ;;  %v5809_v51 = vsel %vm568_vm3, %v10689_v26, %v6875_v0  ;;  %v4700_v0 = vld [vmem:[#allocation3 + $0x198] sm:$0xff] }
 0x5f8   : > { %7217 = vrot.lane.b32.xlu0 %v10665_v55, %s7348_s19  ;;  %v6880_v14 = vunpack.i.h.bf16 %v6878_v63  ;;  %v6879_v62 = vunpack.i.l.bf16 %v6878_v63  ;;  %v5808_v48 = vsel %vm568_vm3, %v10687_v13, %v6874_v9  ;;  %v6930_v21 = vunpack.i.h.bf16 %v10641_v37  ;;  %v4701_v9 = vld [vmem:[#allocation3 + $0x1a0] sm:$0xff] }
 0x5f9   : > { %7212 = vrot.lane.b32.xlu1 %v7211_v58, %s7348_s19  ;;  %v6929_v38 = vunpack.i.l.bf16 %v10641_v37  ;;  %v6935_v1 = vunpack.i.h.bf16 %v6933_v47  ;;  %v6934_v25 = vunpack.i.l.bf16 %v6933_v47 }
 0x5fa   : > { %v6948_v34 = vpop.permute.xlu0 %6947  ;;  %v5840_v28 = vsel %vm342_vm0, %v5808_v48, %v6879_v62  ;;  %v5841_v2 = vsel %vm342_vm0, %v5809_v51, %v6880_v14  ;;  %v5922_v51 = vsel %vm5919_vm15, %v5889_v4, %v6719_v22 }
 0x5fb   : > { %v6908_v19 = vpop.permute.xlu1 %6907  ;;  %v6950_v57 = vunpack.i.h.bf16 %v6948_v34  ;;  %v6949_v20 = vunpack.i.l.bf16 %v6948_v34  ;;  %v5923_v34 = vsel %vm5919_vm15, %v5890_v24, %v6720_v33 }
 0x5fc   : > { %v6910_v32 = vunpack.i.h.bf16 %v6908_v19  ;;  %v6909_v52 = vunpack.i.l.bf16 %v6908_v19  ;;  %7227 = vrot.lane.b32.xlu0 %v10669_v44, %s7341_s25 }
 0x5fd   : > { %7222 = vrot.lane.b32.xlu1 %v10674_v56, %s7341_s25 }
 0x5fe   : > { %v5873_v39 = vsel %vm5854_vm14, %v5840_v28, %v6909_v52  ;;  %v5874_v45 = vsel %vm5854_vm14, %v5841_v2, %v6910_v32  ;;  %v6953_v11 = vpop.permute.xlu0 %6952  ;;  %v5954_v52 = vsel %vm3821_vm6, %v5922_v51, %v6739_v3  ;;  %v7256_v28 = vpack.i.bf16 %v4701_v9, %v4700_v0 }
 0x5ff   : > { %v5905_v63 = vsel %vm3788_vm5, %v5873_v39, %v6929_v38  ;;  %v5906_v37 = vsel %vm3788_vm5, %v5874_v45, %v6930_v21  ;;  %v10707_v40 = vpop.permute.xlu1 %6937  ;;  %v6955_v14 = vunpack.i.h.bf16 %v6953_v11  ;;  %v6954_v62 = vunpack.i.l.bf16 %v6953_v11  ;;  %v4717_v11 = vld [vmem:[#allocation3 + $0xe1] sm:$0xff] }
 0x600   : > { %v5938_v19 = vsel %vm5919_vm15, %v5905_v63, %v6934_v25  ;;  %v5939_v47 = vsel %vm5919_vm15, %v5906_v37, %v6935_v1  ;;  %7237 = vrot.lane.b32.xlu0 %v7211_v58, %s7334_s14  ;;  %v5955_v21 = vsel %vm3821_vm6, %v5923_v34, %v6740_v50  ;;  %v5987_v2 = vsel %vm5984_vm1, %v5954_v52, %v6744_v16  ;;  %v4733_v25 = vld [vmem:[#allocation3 + $0x1a1] sm:$0xff]  ;;  %v7316_v52 = vld [vmem:[#allocation3 + $0x30] sm:$0xff] }
 0x601   : > { %v5970_v48 = vsel %vm3821_vm6, %v5938_v19, %v6949_v20  ;;  %v5971_v32 = vsel %vm3821_vm6, %v5939_v47, %v6950_v57  ;;  %7232 = vrot.lane.b32.xlu1 %v10647_v49, %s7346_s17  ;;  %v5988_v58 = vsel %vm5984_vm1, %v5955_v21, %v6745_v61  ;;  %v6019_v33 = vsel %vm3854_vm7, %v5987_v2, %v6749_v30  ;;  %v4732_v61 = vld [vmem:[#allocation3 + $0x199] sm:$0xff]  ;;  %v10745_v37 = vld [vmem:[#allocation3 + $0xe2] sm:$0xff] }
 0x602   : > { %v6958_v38 = vpop.permute.xlu0 %6957  ;;  %v6020_v1 = vsel %vm3854_vm7, %v5988_v58, %v6750_v27  ;;  %v6003_v49 = vsel %vm5984_vm1, %v5970_v48, %v6954_v62  ;;  %v6004_v3 = vsel %vm5984_vm1, %v5971_v32, %v6955_v14  ;;  %v6685_v57 = vunpack.i.h.bf16 %v10346_v46  ;;  %v10743_v63 = vld [vmem:[#allocation3 + $0xda] sm:$0xff]  ;;  %v4765_v14 = vld [vmem:[#allocation3 + $0x1a2] sm:$0xff] }
 0x603   : > { %v6960_v4 = vunpack.i.h.bf16 %v6958_v38  ;;  %v6959_v22 = vunpack.i.l.bf16 %v6958_v38  ;;  %v10722_v24 = vpop.permute.xlu1 %6942  ;;  %v6581_v27 = vpack.c.bf16 %v6020_v1, %v6019_v33  ;;  %v7266_v20 = vpack.i.bf16 %v4733_v25, %v4732_v61  ;;  %v7317_v38 = vld [vmem:[#allocation3 + $0x38] sm:$0xff] }
 0x604   : > { %7247 = vrot.lane.b32.xlu0 %v10674_v56, %s7347_s18  ;;  %v6684_v56 = vunpack.i.l.bf16 %v10346_v46  ;;  %v6690_v0 = vunpack.i.h.bf16 %v10353_v41  ;;  %v6689_v9 = vunpack.i.l.bf16 %v10353_v41  ;;  %v4764_v46 = vld [vmem:[#allocation3 + $0x19a] sm:$0xff]  ;;  %v6735_v62 = vunpack.i.h.bf16 %v10360_v53 }
 0x605   : > { %v6035_v50 = vsel %vm3854_vm7, %v6003_v49, %v6959_v22  ;;  %v6036_v16 = vsel %vm3854_vm7, %v6004_v3, %v6960_v4  ;;  %7242 = vrot.lane.b32.xlu1 %v10665_v55, %s7334_s14  ;;  %v4716_v55 = vld [vmem:[#allocation3 + $0xd9] sm:$0xff]  ;;  %v6734_v19 = vunpack.i.l.bf16 %v10360_v53  ;;  %v7261_v51 = vpack.i.bf16 %v10689_v26, %v10687_v13  ;;  %v10777_v4 = vld [vmem:[%s11059_s6] sm:$0xf] }
 0x606   : > { %v6578_v39 = vpack.c.bf16 %v6036_v16, %v6035_v50  ;;  %v10734_v30 = vpop.permute.xlu0 %6962  ;;  %v6755_v34 = vunpack.i.h.bf16 %v10368_v60  ;;  %v6754_v41 = vunpack.i.l.bf16 %v10368_v60  ;;  %v7281_v32 = vpack.i.bf16 %v10745_v37, %v10743_v63  ;;  %6474 = vmatprep.mubr.msk.f32.mxu0 %vm6056_vm2, %v10777_v4  ;;  %v7319_v63 = vld [vmem:[#allocation3 + $0xf8] sm:$0xff] }
 0x607   : > { %v10736_v45 = vpop.permute.xlu1 %6967  ;;  %v5794_v21 = vsel %vm568_vm3, %v7316_v52, %v6684_v56  ;;  %v5795_v53 = vsel %vm568_vm3, %v7317_v38, %v6685_v57  ;;  %v7276_v13 = vpack.i.bf16 %v4765_v14, %v4764_v46  ;;  %v6900_v2 = vunpack.i.h.bf16 %v10527_v36 }
 0x608   : > { %7257 = vrot.lane.b32.xlu0 %v7256_v28, %s7340_s24  ;;  %6580 = vmatprep.subr.msk.bf16.mxu0 %vm10630_vm4, %v6578_v39  ;;  %v6759_v28 = vunpack.i.l.bf16 %v10375_v15  ;;  %v5826_v26 = vsel %vm342_vm0, %v5794_v21, %v6689_v9  ;;  %v5827_v60 = vsel %vm342_vm0, %v5795_v53, %v6690_v0  ;;  %v6899_v58 = vunpack.i.l.bf16 %v10527_v36 }
 0x609   : > { %7252 = vrot.lane.b32.xlu1 %v10669_v44, %s7347_s18  ;;  %6583 = vmatpush3.bf16.xpose.msk.msra.mxu0 %vm10630_vm4, %v6581_v27  ;;  %v7271_v44 = vpack.i.bf16 %v4717_v11, %v4716_v55  ;;  %v5860_v22 = vsel %vm5854_vm14, %v5827_v60, %v6735_v62  ;;  %v5859_v33 = vsel %vm5854_vm14, %v5826_v26, %v6734_v19  ;;  %v6905_v1 = vunpack.i.h.bf16 %v10549_v54 }
 0x60a   : > { %v10755_v47 = vpop.permute.xlu0 %6977  ;;  %v6904_v49 = vunpack.i.l.bf16 %v10549_v54  ;;  %v5891_v36 = vsel %vm3788_vm5, %v5859_v33, %v6754_v41  ;;  %v5892_v50 = vsel %vm3788_vm5, %v5860_v22, %v6755_v34  ;;  %v6965_v16 = vunpack.i.h.bf16 %v10734_v30 }
 0x60b   : > { %v10761_v48 = vpop.permute.xlu1 %6972  ;;  %v6964_v61 = vunpack.i.l.bf16 %v10734_v30  ;;  %v6760_v39 = vunpack.i.h.bf16 %v10375_v15  ;;  %v5924_v27 = vsel %vm5919_vm15, %v5891_v36, %v6759_v28  ;;  %v6780_v54 = vunpack.i.h.bf16 %v10393_v5 }
 0x60c   : > { %7267 = vrot.lane.b32.xlu0 %v7266_v20, %s7348_s19  ;;  %v6779_v11 = vunpack.i.l.bf16 %v10393_v5  ;;  %v6785_v57 = vunpack.i.h.bf16 %v10402_v10  ;;  %v6784_v56 = vunpack.i.l.bf16 %v10402_v10  ;;  %v7318_v20 = vld [vmem:[#allocation3 + $0xf0] sm:$0xff]  ;;  %v5811_v30 = vsel %vm568_vm3, %v7319_v63, %v6900_v2 }
 0x60d   : > { %7262 = vrot.lane.b32.xlu1 %v7261_v51, %s7340_s24  ;;  %v5810_v55 = vsel %vm568_vm3, %v7318_v20, %v6899_v58  ;;  %v5843_v37 = vsel %vm342_vm0, %v5811_v30, %v6905_v1  ;;  %v6970_v5 = vunpack.i.h.bf16 %v10736_v45  ;;  %v6969_v0 = vunpack.i.l.bf16 %v10736_v45 }
 0x60e   : > { %v10783_v3 = vpop.permute.xlu0 %6982  ;;  %v5842_v15 = vsel %vm342_vm0, %v5810_v55, %v6904_v49  ;;  %v5876_v10 = vsel %vm5854_vm14, %v5843_v37, %v6965_v16  ;;  %v6975_v14 = vunpack.i.h.bf16 %v10761_v48  ;;  %v6974_v62 = vunpack.i.l.bf16 %v10761_v48 }
 0x60f   : > { %v6988_v25 = vpop.permute.xlu1 %6987  ;;  %v5875_v46 = vsel %vm5854_vm14, %v5842_v15, %v6964_v61  ;;  %v5925_v51 = vsel %vm5919_vm15, %v5892_v50, %v6760_v39  ;;  %v6790_v45 = vunpack.i.h.bf16 %v10410_v17  ;;  %v6789_v52 = vunpack.i.l.bf16 %v10410_v17 }
 0x610   : > { %7277 = vrot.lane.b32.xlu0 %v7276_v13, %s7341_s25  ;;  %v6990_v34 = vunpack.i.h.bf16 %v6988_v25  ;;  %v6989_v41 = vunpack.i.l.bf16 %v6988_v25  ;;  %v7349_v53 = vmov 0   ;;  %v5957_v48 = vsel %vm3821_vm6, %v5925_v51, %v6780_v54 }
 0x611   : > { %7272 = vrot.lane.b32.xlu1 %v7271_v44, %s7348_s19  ;;  %v6050_v44 = vld [vmem:[%s11060_s7] sm:$0xf]  ;;  %7286 = vset.pattern.permute.xlu0 %v7349_v53  ;;  %v5956_v28 = vsel %vm3821_vm6, %v5924_v27, %v6779_v11  ;;  %v5908_v13 = vsel %vm3788_vm5, %v5876_v10, %v6970_v5  ;;  %v5907_v26 = vsel %vm3788_vm5, %v5875_v46, %v6969_v0  ;;  %v6940_v39 = vunpack.i.h.bf16 %v10707_v40  ;;  %v4499_v5 = vld [vmem:[#allocation3 + $0x108] sm:$0xff] }
 0x612   : > { %v10805_v9 = vpop.permute.xlu0 %7007  ;;  %v5989_v2 = vsel %vm5984_vm1, %v5956_v28, %v6784_v56  ;;  %v5990_v17 = vsel %vm5984_vm1, %v5957_v48, %v6785_v57  ;;  %v5940_v58 = vsel %vm5919_vm15, %v5907_v26, %v6974_v62  ;;  %v6939_v27 = vunpack.i.l.bf16 %v10707_v40  ;;  %v4500_v0 = vld [vmem:[#allocation3 + $0x110] sm:$0xff] }
 0x613   : > { %v6993_v19 = vpop.permute.xlu1 %6992  ;;  %v5972_v33 = vsel %vm3821_vm6, %v5940_v58, %v6989_v41  ;;  %v6021_v50 = vsel %vm3854_vm7, %v5989_v2, %v6789_v52  ;;  %v6022_v16 = vsel %vm3854_vm7, %v5990_v17, %v6790_v45  ;;  %v6945_v56 = vunpack.i.h.bf16 %v10722_v24 }
 0x614   : > { %v6995_v21 = vunpack.i.h.bf16 %v6993_v19  ;;  %v6994_v38 = vunpack.i.l.bf16 %v6993_v19  ;;  %6053 = vperm.xlu0 %7286, %v6050_v44   ;;  %v6944_v20 = vunpack.i.l.bf16 %v10722_v24  ;;  %v6587_v30 = vpack.c.bf16 %v6022_v16, %v6021_v50 }
 0x615   : > { %7282 = vrot.lane.b32.xlu1 %v7281_v32, %s7341_s25  ;;  %v5941_v32 = vsel %vm5919_vm15, %v5908_v13, %v6975_v14  ;;  %v5813_v40 = vsel %vm568_vm3, %v4500_v0, %v6940_v39  ;;  %v5812_v10 = vsel %vm568_vm3, %v4499_v5, %v6939_v27  ;;  %v7009_v41 = vunpack.i.l.bf16 %v10805_v9  ;;  %s6391_s25 = sshll.u32 %s11399_s28, 3 }
 0x616   : > { %v7013_v60 = vpop.permute.xlu0 %7012  ;;  %v5973_v1 = vsel %vm3821_vm6, %v5941_v32, %v6990_v34  ;;  %v6005_v61 = vsel %vm5984_vm1, %v5972_v33, %v6994_v38  ;;  %v5844_v24 = vsel %vm342_vm0, %v5812_v10, %v6944_v20  ;;  %v5845_v14 = vsel %vm342_vm0, %v5813_v40, %v6945_v56  ;;  %s325_s22 = scalar_lea.vmem %s11061_s8, %s6391_s25 }
 0x617   : > { %v6998_v22 = vpop.permute.xlu1 %6997  ;;  %v6006_v25 = vsel %vm5984_vm1, %v5973_v1, %v6995_v21  ;;  %v7010_v34 = vunpack.i.h.bf16 %v10805_v9  ;;  %v7015_v38 = vunpack.i.h.bf16 %v7013_v60  ;;  %v7014_v53 = vunpack.i.l.bf16 %v7013_v60 }
 0x618   : > { %v7000_v49 = vunpack.i.h.bf16 %v6998_v22  ;;  %v6999_v36 = vunpack.i.l.bf16 %v6998_v22 }
 0x61a   : > { %v6037_v54 = vsel %vm3854_vm7, %v6005_v61, %v6999_v36  ;;  %v6038_v11 = vsel %vm3854_vm7, %v6006_v25, %v7000_v49  ;;  %v7028_v57 = vpop.permute.xlu0 %7027 }
 0x61b   : > { %v6584_v55 = vpack.c.bf16 %v6038_v11, %v6037_v54  ;;  %v7003_v63 = vpop.permute.xlu1 %7002  ;;  %v7030_v13 = vunpack.i.h.bf16 %v7028_v57  ;;  %v7029_v26 = vunpack.i.l.bf16 %v7028_v57 }
 0x61c   : > { %v7005_v15 = vunpack.i.h.bf16 %v7003_v63  ;;  %v7004_v37 = vunpack.i.l.bf16 %v7003_v63 }
 0x61d   : > { %6586 = vmatprep.subr.msk.bf16.mxu0 %vm10630_vm4, %v6584_v55 }
 0x61e   : > { %6589 = vmatpush3.bf16.xpose.msk.msra.mxu0 %vm10630_vm4, %v6587_v30  ;;  %v7033_v46 = vpop.permute.xlu0 %7032  ;;  %v5877_v19 = vsel %vm5854_vm14, %v5844_v24, %v7004_v37  ;;  %v5878_v51 = vsel %vm5854_vm14, %v5845_v14, %v7005_v15 }
 0x61f   : > { %v10846_v62 = vpop.permute.xlu1 %7017  ;;  %v5909_v45 = vsel %vm3788_vm5, %v5877_v19, %v7009_v41  ;;  %v5910_v52 = vsel %vm3788_vm5, %v5878_v51, %v7010_v34  ;;  %v7035_v32 = vunpack.i.h.bf16 %v7033_v46  ;;  %v7034_v9 = vunpack.i.l.bf16 %v7033_v46 }
 0x620   : > { %v5942_v2 = vsel %vm5919_vm15, %v5909_v45, %v7014_v53  ;;  %v5943_v17 = vsel %vm5919_vm15, %v5910_v52, %v7015_v38  ;;  %v6765_v34 = vunpack.i.h.bf16 %v10381_v42  ;;  %v6764_v41 = vunpack.i.l.bf16 %v10381_v42 }
 0x621   : > { %v5974_v16 = vsel %vm3821_vm6, %v5942_v2, %v7029_v26  ;;  %v5975_v61 = vsel %vm3821_vm6, %v5943_v17, %v7030_v13  ;;  %v7320_v26 = vld [vmem:[#allocation3 + $0x60] sm:$0xff]  ;;  %v7321_v17 = vld [vmem:[#allocation3 + $0x68] sm:$0xff] }
 0x622   : > { %v7038_v44 = vpop.permute.xlu0 %7037  ;;  %v6007_v20 = vsel %vm5984_vm1, %v5974_v16, %v7034_v9  ;;  %v6008_v55 = vsel %vm5984_vm1, %v5975_v61, %v7035_v32  ;;  %v5798_v2 = vsel %vm568_vm3, %v7320_v26, %v6764_v41  ;;  %v5799_v42 = vsel %vm568_vm3, %v7321_v17, %v6765_v34 }
 0x623   : > { %v10854_v21 = vpop.permute.xlu1 %7022  ;;  %v7040_v48 = vunpack.i.h.bf16 %v7038_v44  ;;  %v7039_v28 = vunpack.i.l.bf16 %v7038_v44  ;;  %v11393_v44 = vld [vmem:[#allocation15_spill] sm:$0xff]  ;;  %v6984_v32 = vunpack.i.l.bf16 %v10783_v3 }
 0x624   : > { %v6769_v45 = vunpack.i.l.bf16 %v11393_v44 }
 0x625   : > { %v5818_v49 = vsel %vm568_vm3, %v10437_v31, %v7039_v28  ;;  %v5819_v60 = vsel %vm568_vm3, %v10439_v23, %v7040_v48  ;;  %v6980_v48 = vunpack.i.h.bf16 %v10755_v47  ;;  %v6979_v28 = vunpack.i.l.bf16 %v10755_v47 }
 0x626   : > { %v7043_v58 = vpop.permute.xlu0 %7042  ;;  %v5830_v9 = vsel %vm342_vm0, %v5798_v2, %v6769_v45 }
 0x627   : > { %v7045_v22 = vunpack.i.h.bf16 %v7043_v58  ;;  %v7044_v33 = vunpack.i.l.bf16 %v7043_v58  ;;  %v7053_v1 = vpop.permute.xlu1 %7052  ;;  %v6985_v58 = vunpack.i.h.bf16 %v10783_v3 }
 0x628   : > { %v7055_v36 = vunpack.i.h.bf16 %v7053_v1  ;;  %v7054_v50 = vunpack.i.l.bf16 %v7053_v1 }
 0x629   : > { %v10865_v25 = vsel %vm342_vm0, %v5818_v49, %v7044_v33  ;;  %v10868_v39 = vsel %vm342_vm0, %v5819_v60, %v7045_v22  ;;  %v4501_v60 = vld [vmem:[#allocation3 + $0x120] sm:$0xff] }
 0x62a   : > { %v6023_v27 = vsel %vm3854_vm7, %v10544_v59, %v7054_v50  ;;  %v6024_v31 = vsel %vm3854_vm7, %v10547_v35, %v7055_v36  ;;  %v7048_v54 = vpop.permute.xlu0 %7047  ;;  %v4502_v36 = vld [vmem:[#allocation3 + $0x128] sm:$0xff]  ;;  %v5814_v16 = vsel %vm568_vm3, %v4501_v60, %v6979_v28 }
 0x62b   : > { %v6593_v23 = vpack.c.bf16 %v6024_v31, %v6023_v27  ;;  %v7050_v11 = vunpack.i.h.bf16 %v7048_v54  ;;  %v7049_v57 = vunpack.i.l.bf16 %v7048_v54  ;;  %v7063_v56 = vpop.permute.xlu1 %7062  ;;  %v5815_v61 = vsel %vm568_vm3, %v4502_v36, %v6980_v48 }
 0x62c   : > { %v7065_v15 = vunpack.i.h.bf16 %v7063_v56  ;;  %v7064_v37 = vunpack.i.l.bf16 %v7063_v56  ;;  %v5846_v54 = vsel %vm342_vm0, %v5814_v16, %v6984_v32 }
 0x62d   : > { %v6039_v63 = vsel %vm3854_vm7, %v6007_v20, %v7049_v57  ;;  %v6040_v30 = vsel %vm3854_vm7, %v6008_v55, %v7050_v11 }
 0x62e   : > { %v6590_v5 = vpack.c.bf16 %v6040_v30, %v6039_v63  ;;  %v7058_v59 = vpop.permute.xlu0 %7057  ;;  %v5821_v10 = vsel %vm568_vm3, %v10486_v7, %v7065_v15  ;;  %v5820_v46 = vsel %vm568_vm3, %v10484_v8, %v7064_v37  ;;  %v6770_v7 = vunpack.i.h.bf16 %v11393_v44  ;;  %v11394_v8 = vld [vmem:[#allocation18_spill] sm:$0xff] }
 0x62f   : > { %v7068_v0 = vpop.permute.xlu1 %7067  ;;  %v6815_v52 = vunpack.i.h.bf16 %v11394_v8  ;;  %v6814_v38 = vunpack.i.l.bf16 %v11394_v8  ;;  %v7060_v33 = vunpack.i.h.bf16 %v7058_v59  ;;  %v7059_v1 = vunpack.i.l.bf16 %v7058_v59 }
 0x630   : > { %v7070_v40 = vunpack.i.h.bf16 %v7068_v0  ;;  %v7069_v35 = vunpack.i.l.bf16 %v7068_v0  ;;  %6592 = vmatprep.subr.msk.bf16.mxu0 %vm10630_vm4, %v6590_v5  ;;  %v5831_v22 = vsel %vm342_vm0, %v5799_v42, %v6770_v7 }
 0x631   : > { %6595 = vmatpush3.bf16.xpose.msk.msra.mxu0 %vm10630_vm4, %v6593_v23  ;;  %v5864_v49 = vsel %vm5854_vm14, %v5831_v22, %v6815_v52  ;;  %v5863_v47 = vsel %vm5854_vm14, %v5830_v9, %v6814_v38  ;;  %v5847_v23 = vsel %vm342_vm0, %v5815_v61, %v6985_v58  ;;  %v5879_v20 = vsel %vm5854_vm14, %v5846_v54, %v7059_v1 }
 0x632   : > { %v10887_v24 = vsel %vm342_vm0, %v5820_v46, %v7069_v35  ;;  %v10890_v14 = vsel %vm342_vm0, %v5821_v10, %v7070_v40  ;;  %v7078_v19 = vpop.permute.xlu0 %7077  ;;  %v5880_v56 = vsel %vm5854_vm14, %v5847_v23, %v7060_v33  ;;  %v7020_v54 = vunpack.i.h.bf16 %v10846_v62 }
 0x633   : > { %v7073_v51 = vpop.permute.xlu1 %7072  ;;  %v7080_v27 = vunpack.i.h.bf16 %v7078_v19  ;;  %v7079_v31 = vunpack.i.l.bf16 %v7078_v19  ;;  %v7019_v23 = vunpack.i.l.bf16 %v10846_v62 }
 0x634   : > { %v7075_v11 = vunpack.i.h.bf16 %v7073_v51  ;;  %v7074_v57 = vunpack.i.l.bf16 %v7073_v51 }
 0x635   : > { %v5896_v0 = vsel %vm3788_vm5, %v5864_v49, %v7080_v27  ;;  %v5895_v40 = vsel %vm3788_vm5, %v5863_v47, %v7079_v31 }
 0x636   : > { %v7088_v53 = vpop.permute.xlu0 %7087  ;;  %v5912_v19 = vsel %vm3788_vm5, %v5880_v56, %v7075_v11  ;;  %v5911_v51 = vsel %vm3788_vm5, %v5879_v20, %v7074_v57  ;;  %v7025_v11 = vunpack.i.h.bf16 %v10854_v21  ;;  %v7024_v57 = vunpack.i.l.bf16 %v10854_v21 }
 0x637   : > { %v7083_v13 = vpop.permute.xlu1 %7082  ;;  %v7090_v55 = vunpack.i.h.bf16 %v7088_v53  ;;  %v7089_v63 = vunpack.i.l.bf16 %v7088_v53 }
 0x638   : > { %v7085_v30 = vunpack.i.h.bf16 %v7083_v13  ;;  %v7084_v15 = vunpack.i.l.bf16 %v7083_v13 }
 0x639   : > { %v5928_v44 = vsel %vm5919_vm15, %v5895_v40, %v7089_v63  ;;  %v5929_v7 = vsel %vm5919_vm15, %v5896_v0, %v7090_v55  ;;  %v4503_v63 = vld [vmem:[#allocation3 + $0x138] sm:$0xff] }
 0x63a   : > { %v7098_v50 = vpop.permute.xlu0 %7097  ;;  %v5944_v52 = vsel %vm5919_vm15, %v5911_v51, %v7084_v15  ;;  %v5945_v38 = vsel %vm5919_vm15, %v5912_v19, %v7085_v30  ;;  %v4504_v30 = vld [vmem:[#allocation3 + $0x140] sm:$0xff] }
 0x63b   : > { %v7093_v3 = vpop.permute.xlu1 %7092  ;;  %v7100_v37 = vunpack.i.h.bf16 %v7098_v50  ;;  %v7099_v5 = vunpack.i.l.bf16 %v7098_v50 }
 0x63c   : > { %v7095_v35 = vunpack.i.h.bf16 %v7093_v3  ;;  %v7094_v10 = vunpack.i.l.bf16 %v7093_v3 }
 0x63d   : > { %v5960_v53 = vsel %vm3821_vm6, %v5928_v44, %v7099_v5  ;;  %v5961_v48 = vsel %vm3821_vm6, %v5929_v7, %v7100_v37  ;;  %v5817_v37 = vsel %vm568_vm3, %v4504_v30, %v7020_v54  ;;  %v5816_v5 = vsel %vm568_vm3, %v4503_v63, %v7019_v23 }
 0x63e   : > { %v7108_v59 = vpop.permute.xlu0 %7107  ;;  %v5976_v13 = vsel %vm3821_vm6, %v5944_v52, %v7094_v10  ;;  %v5977_v26 = vsel %vm3821_vm6, %v5945_v38, %v7095_v35  ;;  %v5849_v0 = vsel %vm342_vm0, %v5817_v37, %v7025_v11  ;;  %v11395_v37 = vld [vmem:[#allocation16_spill] sm:$0xff] }
 0x63f   : > { %v7103_v46 = vpop.permute.xlu1 %7102  ;;  %v7110_v34 = vunpack.i.h.bf16 %v7108_v59  ;;  %v7109_v41 = vunpack.i.l.bf16 %v7108_v59  ;;  %v5848_v59 = vsel %vm342_vm0, %v5816_v5, %v7024_v57  ;;  %v6830_v5 = vunpack.i.h.bf16 %v11395_v37 }
 0x640   : > { %v7105_v45 = vunpack.i.h.bf16 %v7103_v46  ;;  %v7104_v8 = vunpack.i.l.bf16 %v7103_v46 }
 0x641   : > { %v5993_v58 = vsel %vm5984_vm1, %v5960_v53, %v7109_v41  ;;  %v5994_v32 = vsel %vm5984_vm1, %v5961_v48, %v7110_v34 }
 0x642   : > { %v7118_v28 = vpop.permute.xlu0 %7117  ;;  %v6009_v33 = vsel %vm5984_vm1, %v5976_v13, %v7104_v8  ;;  %v6010_v1 = vsel %vm5984_vm1, %v5977_v26, %v7105_v45 }
 0x643   : > { %v7120_v2 = vunpack.i.h.bf16 %v7118_v28  ;;  %v7119_v17 = vunpack.i.l.bf16 %v7118_v28  ;;  %v7113_v42 = vpop.permute.xlu1 %7112 }
 0x644   : > { %v7115_v9 = vunpack.i.h.bf16 %v7113_v42  ;;  %v7114_v22 = vunpack.i.l.bf16 %v7113_v42 }
 0x645   : > { %v6025_v49 = vsel %vm3854_vm7, %v5993_v58, %v7119_v17  ;;  %v6026_v47 = vsel %vm3854_vm7, %v5994_v32, %v7120_v2 }
 0x646   : > { %v6599_v60 = vpack.c.bf16 %v6026_v47, %v6025_v49  ;;  %v6041_v36 = vsel %vm3854_vm7, %v6009_v33, %v7114_v22  ;;  %v6042_v50 = vsel %vm3854_vm7, %v6010_v1, %v7115_v9  ;;  %v7128_v16 = vpop.permute.xlu0 %7127 }
 0x647   : > { %v6596_v61 = vpack.c.bf16 %v6042_v50, %v6041_v36  ;;  %v7123_v27 = vpop.permute.xlu1 %7122  ;;  %v7130_v40 = vunpack.i.h.bf16 %v7128_v16  ;;  %v7129_v62 = vunpack.i.l.bf16 %v7128_v16 }
 0x648   : > { %v7125_v56 = vunpack.i.h.bf16 %v7123_v27  ;;  %v7124_v20 = vunpack.i.l.bf16 %v7123_v27 }
 0x649   : > { %6598 = vmatprep.subr.msk.bf16.mxu0 %vm10630_vm4, %v6596_v61 }
 0x64a   : > { %6601 = vmatpush3.bf16.xpose.msk.msra.mxu0 %vm10630_vm4, %v6599_v60  ;;  %v7138_v31 = vpop.permute.xlu0 %7137  ;;  %v5881_v35 = vsel %vm5854_vm14, %v5848_v59, %v7124_v20  ;;  %v5882_v21 = vsel %vm5854_vm14, %v5849_v0, %v7125_v56  ;;  %v6829_v59 = vunpack.i.l.bf16 %v11395_v37 }
 0x64b   : > { %v7133_v3 = vpop.permute.xlu1 %7132  ;;  %v7140_v10 = vunpack.i.h.bf16 %v7138_v31  ;;  %v7139_v46 = vunpack.i.l.bf16 %v7138_v31  ;;  %v5913_v45 = vsel %vm3788_vm5, %v5881_v35, %v7129_v62  ;;  %v5914_v8 = vsel %vm3788_vm5, %v5882_v21, %v7130_v40  ;;  %v11396_v40 = vld [vmem:[#allocation20_spill] sm:$0xff] }
 0x64c   : > { %v7135_v52 = vunpack.i.h.bf16 %v7133_v3  ;;  %v7134_v38 = vunpack.i.l.bf16 %v7133_v3  ;;  %v6835_v62 = vunpack.i.h.bf16 %v11396_v40  ;;  %v6834_v35 = vunpack.i.l.bf16 %v11396_v40 }
 0x64d   : > { %v5946_v53 = vsel %vm5919_vm15, %v5913_v45, %v7139_v46  ;;  %v5947_v48 = vsel %vm5919_vm15, %v5914_v8, %v7140_v10  ;;  %v11397_v10 = vld [vmem:[#allocation76_spill] sm:$0xff] }
 0x64e   : > { %v7148_v55 = vpop.permute.xlu0 %7147  ;;  %v5897_v50 = vsel %vm3788_vm5, %v10573_v12, %v7134_v38  ;;  %v5898_v16 = vsel %vm3788_vm5, %v10577_v6, %v7135_v52  ;;  %v6855_v46 = vunpack.i.h.bf16 %v11397_v10 }
 0x64f   : > { %v7143_v15 = vpop.permute.xlu1 %7142  ;;  %v7150_v51 = vunpack.i.h.bf16 %v7148_v55  ;;  %v7149_v34 = vunpack.i.l.bf16 %v7148_v55 }
 0x650   : > { %v7145_v28 = vunpack.i.h.bf16 %v7143_v15  ;;  %v7144_v13 = vunpack.i.l.bf16 %v7143_v15 }
 0x651   : > { %v5978_v2 = vsel %vm3821_vm6, %v5946_v53, %v7149_v34  ;;  %v5979_v17 = vsel %vm3821_vm6, %v5947_v48, %v7150_v51 }
 0x652   : > { %v7158_v19 = vpop.permute.xlu0 %7157  ;;  %v5930_v31 = vsel %vm5919_vm15, %v5897_v50, %v7144_v13  ;;  %v5931_v3 = vsel %vm5919_vm15, %v5898_v16, %v7145_v28 }
 0x653   : > { %v7153_v41 = vpop.permute.xlu1 %7152  ;;  %v7160_v44 = vunpack.i.h.bf16 %v7158_v19  ;;  %v7159_v7 = vunpack.i.l.bf16 %v7158_v19  ;;  %v6854_v19 = vunpack.i.l.bf16 %v11397_v10 }
 0x654   : > { %v7155_v33 = vunpack.i.h.bf16 %v7153_v41  ;;  %v7154_v1 = vunpack.i.l.bf16 %v7153_v41  ;;  %v7322_v41 = vld [vmem:[#allocation3 + $0x90] sm:$0xff] }
 0x655   : > { %v6011_v9 = vsel %vm5984_vm1, %v5978_v2, %v7159_v7  ;;  %v6012_v22 = vsel %vm5984_vm1, %v5979_v17, %v7160_v44  ;;  %v5802_v44 = vsel %vm568_vm3, %v7322_v41, %v6829_v59  ;;  %v7323_v7 = vld [vmem:[#allocation3 + $0x98] sm:$0xff] }
 0x656   : > { %v7168_v26 = vpop.permute.xlu0 %7167  ;;  %v5962_v23 = vsel %vm3821_vm6, %v5930_v31, %v7154_v1  ;;  %v5963_v11 = vsel %vm3821_vm6, %v5931_v3, %v7155_v33  ;;  %v5803_v45 = vsel %vm568_vm3, %v7323_v7, %v6830_v5  ;;  %v5834_v52 = vsel %vm342_vm0, %v5802_v44, %v6834_v35 }
 0x657   : > { %v7170_v42 = vunpack.i.h.bf16 %v7168_v26  ;;  %v7169_v58 = vunpack.i.l.bf16 %v7168_v26  ;;  %v7163_v32 = vpop.permute.xlu1 %7162  ;;  %v5835_v38 = vsel %vm342_vm0, %v5803_v45, %v6835_v62  ;;  %v5867_v26 = vsel %vm5854_vm14, %v5834_v52, %v6854_v19 }
 0x658   : > { %v7165_v60 = vunpack.i.h.bf16 %v7163_v32  ;;  %v7164_v36 = vunpack.i.l.bf16 %v7163_v32  ;;  %v5868_v13 = vsel %vm5854_vm14, %v5835_v38, %v6855_v46 }
 0x659   : > { %v6043_v49 = vsel %vm3854_vm7, %v6011_v9, %v7169_v58  ;;  %v6044_v47 = vsel %vm3854_vm7, %v6012_v22, %v7170_v42 }
 0x65a   : > { %v6602_v61 = vpack.c.bf16 %v6044_v47, %v6043_v49  ;;  %v7178_v27 = vpop.permute.xlu0 %7177  ;;  %v5995_v12 = vsel %vm5984_vm1, %v5962_v23, %v7164_v36  ;;  %v5996_v6 = vsel %vm5984_vm1, %v5963_v11, %v7165_v60 }
 0x65b   : > { %v7173_v54 = vpop.permute.xlu1 %7172  ;;  %v7180_v51 = vunpack.i.h.bf16 %v7178_v27  ;;  %v7179_v34 = vunpack.i.l.bf16 %v7178_v27 }
 0x65c   : > { %v7175_v57 = vunpack.i.h.bf16 %v7173_v54  ;;  %v7174_v56 = vunpack.i.l.bf16 %v7173_v54  ;;  %6604 = vmatprep.subr.msk.bf16.mxu0 %vm10630_vm4, %v6602_v61 }
 0x65d   : > { %v5884_v42 = vsel %vm5854_vm14, %v10868_v39, %v7180_v51  ;;  %v5883_v58 = vsel %vm5854_vm14, %v10865_v25, %v7179_v34 }
 0x65e   : > { %v6027_v20 = vsel %vm3854_vm7, %v5995_v12, %v7174_v56  ;;  %v6028_v55 = vsel %vm3854_vm7, %v5996_v6, %v7175_v57  ;;  %v7188_v63 = vpop.permute.xlu0 %7187 }
 0x65f   : > { %v6605_v30 = vpack.c.bf16 %v6028_v55, %v6027_v20  ;;  %v7183_v15 = vpop.permute.xlu1 %7182  ;;  %v7190_v53 = vunpack.i.h.bf16 %v7188_v63  ;;  %v7189_v48 = vunpack.i.l.bf16 %v7188_v63 }
 0x660   : > { %v7185_v2 = vunpack.i.h.bf16 %v7183_v15  ;;  %v7184_v17 = vunpack.i.l.bf16 %v7183_v15 }
 0x661   : > { %6607 = vmatpush3.bf16.xpose.msk.msra.mxu0 %vm10630_vm4, %v6605_v30  ;;  %v5900_v60 = vsel %vm3788_vm5, %v5868_v13, %v7190_v53  ;;  %v5899_v36 = vsel %vm3788_vm5, %v5867_v26, %v7189_v48 }
 0x662   : > { %v7198_v0 = vpop.permute.xlu0 %7197  ;;  %v5916_v27 = vsel %vm3788_vm5, %v5884_v42, %v7185_v2  ;;  %v5915_v39 = vsel %vm3788_vm5, %v5883_v58, %v7184_v17 }
 0x663   : > { %v7193_v21 = vpop.permute.xlu1 %7192  ;;  %v7200_v32 = vunpack.i.h.bf16 %v7198_v0  ;;  %v7199_v9 = vunpack.i.l.bf16 %v7198_v0 }
 0x664   : > { %v7195_v22 = vunpack.i.h.bf16 %v7193_v21  ;;  %v7194_v33 = vunpack.i.l.bf16 %v7193_v21 }
 0x665   : > { %v5932_v3 = vsel %vm5919_vm15, %v5899_v36, %v7199_v9  ;;  %v5933_v54 = vsel %vm5919_vm15, %v5900_v60, %v7200_v32 }
 0x666   : > { %v7208_v8 = vpop.permute.xlu0 %7207  ;;  %v5948_v57 = vsel %vm5919_vm15, %v5915_v39, %v7194_v33  ;;  %v5949_v56 = vsel %vm5919_vm15, %v5916_v27, %v7195_v22 }
 0x667   : > { %v7203_v28 = vpop.permute.xlu1 %7202  ;;  %v7210_v1 = vunpack.i.h.bf16 %v7208_v8  ;;  %v7209_v49 = vunpack.i.l.bf16 %v7208_v8 }
 0x668   : > { %v7205_v50 = vunpack.i.h.bf16 %v7203_v28  ;;  %v7204_v16 = vunpack.i.l.bf16 %v7203_v28 }
 0x669   : > { %v5964_v12 = vsel %vm3821_vm6, %v5932_v3, %v7209_v49  ;;  %v5965_v6 = vsel %vm3821_vm6, %v5933_v54, %v7210_v1 }
 0x66a   : > { %v7218_v47 = vpop.permute.xlu0 %7217  ;;  %v5980_v55 = vsel %vm3821_vm6, %v5948_v57, %v7204_v16  ;;  %v5981_v63 = vsel %vm3821_vm6, %v5949_v56, %v7205_v50 }
 0x66b   : > { %v7213_v61 = vpop.permute.xlu1 %7212  ;;  %v7220_v31 = vunpack.i.h.bf16 %v7218_v47  ;;  %v7219_v25 = vunpack.i.l.bf16 %v7218_v47 }
 0x66c   : > { %v7215_v23 = vunpack.i.h.bf16 %v7213_v61  ;;  %v7214_v11 = vunpack.i.l.bf16 %v7213_v61 }
 0x66d   : > { %v5997_v5 = vsel %vm5984_vm1, %v5964_v12, %v7219_v25  ;;  %v5998_v59 = vsel %vm5984_vm1, %v5965_v6, %v7220_v31 }
 0x66e   : > { %v7228_v20 = vpop.permute.xlu0 %7227  ;;  %v6013_v62 = vsel %vm5984_vm1, %v5980_v55, %v7214_v11  ;;  %v6014_v35 = vsel %vm5984_vm1, %v5981_v63, %v7215_v23 }
 0x66f   : > { %v7230_v30 = vunpack.i.h.bf16 %v7228_v20  ;;  %v7229_v15 = vunpack.i.l.bf16 %v7228_v20  ;;  %v7223_v37 = vpop.permute.xlu1 %7222 }
 0x670   : > { %v7225_v0 = vunpack.i.h.bf16 %v7223_v37  ;;  %v7224_v40 = vunpack.i.l.bf16 %v7223_v37 }
 0x671   : > { %v6029_v21 = vsel %vm3854_vm7, %v5997_v5, %v7229_v15  ;;  %v6030_v10 = vsel %vm3854_vm7, %v5998_v59, %v7230_v30 }
 0x672   : > { %v6611_v46 = vpack.c.bf16 %v6030_v10, %v6029_v21  ;;  %v6045_v19 = vsel %vm3854_vm7, %v6013_v62, %v7224_v40  ;;  %v6046_v51 = vsel %vm3854_vm7, %v6014_v35, %v7225_v0  ;;  %v7238_v34 = vpop.permute.xlu0 %7237 }
 0x673   : > { %v6608_v41 = vpack.c.bf16 %v6046_v51, %v6045_v19  ;;  %v7233_v44 = vpop.permute.xlu1 %7232  ;;  %v7240_v48 = vunpack.i.h.bf16 %v7238_v34  ;;  %v7239_v28 = vunpack.i.l.bf16 %v7238_v34 }
 0x674   : > { %v7235_v8 = vunpack.i.h.bf16 %v7233_v44  ;;  %v7234_v52 = vunpack.i.l.bf16 %v7233_v44 }
 0x675   : > { %6610 = vmatprep.subr.msk.bf16.mxu0 %vm10630_vm4, %v6608_v41 }
 0x676   : > { %6613 = vmatpush3.bf16.xpose.msk.msra.mxu0 %vm10630_vm4, %v6611_v46  ;;  %v7248_v7 = vpop.permute.xlu0 %7247  ;;  %v5885_v13 = vsel %vm5854_vm14, %v10887_v24, %v7234_v52  ;;  %v5886_v26 = vsel %vm5854_vm14, %v10890_v14, %v7235_v8 }
 0x677   : > { %v7243_v45 = vpop.permute.xlu1 %7242  ;;  %v7250_v2 = vunpack.i.h.bf16 %v7248_v7  ;;  %v7249_v17 = vunpack.i.l.bf16 %v7248_v7  ;;  %v5917_v1 = vsel %vm3788_vm5, %v5885_v13, %v7239_v28  ;;  %v5918_v49 = vsel %vm3788_vm5, %v5886_v26, %v7240_v48 }
 0x678   : > { %v7245_v47 = vunpack.i.h.bf16 %v7243_v45  ;;  %v7244_v60 = vunpack.i.l.bf16 %v7243_v45 }
 0x679   : > { %v5950_v36 = vsel %vm5919_vm15, %v5917_v1, %v7249_v17  ;;  %v5951_v24 = vsel %vm5919_vm15, %v5918_v49, %v7250_v2 }
 0x67a   : > { %v7258_v38 = vpop.permute.xlu0 %7257  ;;  %v5901_v20 = vsel %vm3788_vm5, %v10636_v29, %v7244_v60  ;;  %v5902_v55 = vsel %vm3788_vm5, %v10639_v43, %v7245_v47 }
 0x67b   : > { %v7253_v53 = vpop.permute.xlu1 %7252  ;;  %v7260_v58 = vunpack.i.h.bf16 %v7258_v38  ;;  %v7259_v32 = vunpack.i.l.bf16 %v7258_v38 }
 0x67c   : > { %v7255_v50 = vunpack.i.h.bf16 %v7253_v53  ;;  %v7254_v14 = vunpack.i.l.bf16 %v7253_v53 }
 0x67d   : > { %v5982_v61 = vsel %vm3821_vm6, %v5950_v36, %v7259_v32  ;;  %v5983_v27 = vsel %vm3821_vm6, %v5951_v24, %v7260_v58 }
 0x67e   : > { %v7268_v42 = vpop.permute.xlu0 %7267  ;;  %v5934_v30 = vsel %vm5919_vm15, %v5901_v20, %v7254_v14  ;;  %v5935_v15 = vsel %vm5919_vm15, %v5902_v55, %v7255_v50 }
 0x67f   : > { %v7263_v9 = vpop.permute.xlu1 %7262  ;;  %v7270_v22 = vunpack.i.h.bf16 %v7268_v42  ;;  %v7269_v33 = vunpack.i.l.bf16 %v7268_v42 }
 0x680   : > { %v7265_v23 = vunpack.i.h.bf16 %v7263_v9  ;;  %v7264_v11 = vunpack.i.l.bf16 %v7263_v9 }
 0x681   : > { %v6015_v3 = vsel %vm5984_vm1, %v5982_v61, %v7269_v33  ;;  %v6016_v54 = vsel %vm5984_vm1, %v5983_v27, %v7270_v22 }
 0x682   : > { %v7278_v16 = vpop.permute.xlu0 %7277  ;;  %v5966_v5 = vsel %vm3821_vm6, %v5934_v30, %v7264_v11  ;;  %v5967_v59 = vsel %vm3821_vm6, %v5935_v15, %v7265_v23 }
 0x683   : > { %v7280_v39 = vunpack.i.h.bf16 %v7278_v16  ;;  %v7279_v31 = vunpack.i.l.bf16 %v7278_v16  ;;  %v7273_v25 = vpop.permute.xlu1 %7272 }
 0x684   : > { %v7275_v12 = vunpack.i.h.bf16 %v7273_v25  ;;  %v7274_v6 = vunpack.i.l.bf16 %v7273_v25 }
 0x685   : > { %v6047_v57 = vsel %vm3854_vm7, %v6015_v3, %v7279_v31  ;;  %v6048_v56 = vsel %vm3854_vm7, %v6016_v54, %v7280_v39 }
 0x686   : > { %v6614_v63 = vpack.c.bf16 %v6048_v56, %v6047_v57  ;;  %v5999_v29 = vsel %vm5984_vm1, %v5966_v5, %v7274_v6  ;;  %v6000_v43 = vsel %vm5984_vm1, %v5967_v59, %v7275_v12 }
 0x687   : > { %v7283_v37 = vpop.permute.xlu1 %7282 }
 0x688   : > { %v7285_v0 = vunpack.i.h.bf16 %v7283_v37  ;;  %v7284_v40 = vunpack.i.l.bf16 %v7283_v37  ;;  %6616 = vmatprep.subr.msk.bf16.mxu0 %vm10630_vm4, %v6614_v63 }
 0x68a   : > { %v6031_v62 = vsel %vm3854_vm7, %v5999_v29, %v7284_v40  ;;  %v6032_v35 = vsel %vm3854_vm7, %v6000_v43, %v7285_v0 }
 0x68b   : > { %v6617_v21 = vpack.c.bf16 %v6032_v35, %v6031_v62 }
 0x68d   : > { %6619 = vmatpush3.bf16.xpose.msk.msra.mxu0 %vm10630_vm4, %v6617_v21 }
 0x693   : > { %v6054_v10 = vpop.permute.xlu0 %6053 }
 0x694   : > { %6475 = vmatmul.mubr.msk.f32.vlgmr.msra.gmra.mrb[8].mxu0 %vm6056_vm2, %v10777_v4 }
 0x767   : > { %v6222_v46 = vpop.f32.mrb[8].mxu0 }
 0x768   : > { %v6223_v19 = vadd.f32 %v6222_v46, %v6054_v10  ;;  %v6224_v51 = vpop.f32.mrb[9].mxu0 }
 0x769   : > { %v6225_v34 = vadd.f32 %v6224_v51, %v6054_v10 }
 0x76a   : > { %v6227_v41 = vmax.f32 %v6223_v19, 0.0 }
 0x76b   : > { %v6228_v44 = vmax.f32 %v6225_v34, 0.0 }
 0x76d   : > { %v6231_v7 = vcombine.low %v6227_v41, %v6228_v44 }
 0x76f   : > { %6233 = vst [vmem:[%s325_s22] sm:$0xff] %v6231_v7 }
 0x770 PF: > { %s18_s27 = sadd.s32 1, %s7330_s27  }
 0x771   : > { %p15_p4 = scmp.ge.s32.totalorder %s18_s27, 4  }
 0x773   :  { %17 = sbr.rel (!%p15_p4) target bundleno = 1 (0x1), region = 89 }

</bundles_post_ra>
